<compile_context>
chip_gen: v7x
topology: tpu7x:2x2x1
jax: 0.10.0
libtpu: 0.0.40
codegen_flags: <defaults>
</compile_context>

<pallas_src>
import functools

import jax
import jax.numpy as jnp
from jax.experimental import pallas as pl
from jax.experimental.pallas import tpu as pltpu

# ---- model dims (true / padded-for-the-kernel) ------------------------------
D_IN, D_IN_PAD = 554, 640                     # pad input features to a lane multiple
TRUE_SIZES = [(554, 1024), (1024, 512), (512, 256), (256, 128), (128, 64), (64, 1)]
# Padded (in, out) shapes of the five MXU matmul layers as stored for the kernel.
KERNEL_SIZES = [(D_IN_PAD, 1024), (1024, 512), (512, 256), (256, 128), (128, 128)]


def mlp_kernel(x_ref,
               w1, b1, w2, b2, w3, b3, w4, b4, w5, b5, w6, b6,
               o_ref):
    """Fused 6-layer MLP forward on one batch tile (all weights VMEM-resident)."""

    def dense_relu(h_bf16, w_ref, b_ref):
        # bf16 x bf16 matmul on the MXU with f32 accumulation; bias + ReLU in f32.
        y = jnp.dot(h_bf16, w_ref[...],
                    preferred_element_type=jnp.float32) + b_ref[...]
        return jnp.maximum(y, 0.0)

    h = x_ref[...]                                    # (tile, 640) bf16
    h = dense_relu(h, w1, b1).astype(jnp.bfloat16)    # (tile, 1024)
    h = dense_relu(h, w2, b2).astype(jnp.bfloat16)    # (tile, 512)
    h = dense_relu(h, w3, b3).astype(jnp.bfloat16)    # (tile, 256)
    h = dense_relu(h, w4, b4).astype(jnp.bfloat16)    # (tile, 128)
    h5 = dense_relu(h, w5, b5)                        # (tile, 128) f32; cols 64+ are 0

    # Final 64->1 layer as a lane-dense (1, tile) row:
    #   out[j] = sum_k h5[j, k] * w6[k, 0] + b6
    # (XLU transpose + VPU multiply + sublane reduce).  w6 rows 64..127 are zero,
    # so the padded lanes contribute nothing.  This keeps the HBM writeback at
    # 4 B per batch row instead of a 128x-padded f32 column.
    yT = jnp.sum(h5.T * w6[...], axis=0, keepdims=True) + b6[...]   # (1, tile) f32
    o_ref[...] = yT.reshape(o_ref.shape)


def _pick_batch_tile(batch, requested, num_core_shards=1):
    """Return (tile, grid_steps).

    One grid step covering the whole batch whenever it fits under `requested`
    (v5e/v6e have a single TensorCore, so extra grid steps are pure serial
    overhead); otherwise balanced steps.  Tiles are rounded up to a multiple of
    16 (bf16 (16,128) packing), floor 16.  `num_core_shards > 1` forces at least
    that many steps (used with pltpu.CORE_PARALLEL on v7x).
    """
    grid = pl.cdiv(batch, requested)
    if num_core_shards > 1 and batch >= 16 * num_core_shards:
        grid = max(grid, num_core_shards)
    tile = max(16, ((pl.cdiv(batch, grid) + 15) // 16) * 16)
    return tile, pl.cdiv(batch, tile)


@functools.partial(jax.jit, static_argnames=("batch_tile", "use_core_parallel"))
def net_forward(x, params, batch_tile=512, use_core_parallel=False):
    """x: (B, 554) float32.  params: output of init_params().  Returns (B, 1) f32."""
    B = x.shape[0]
    num_shards = 2 if use_core_parallel else 1
    tile, grid_steps = _pick_batch_tile(B, batch_tile, num_shards)
    B_pad = tile * grid_steps

    # Single fused pad (batch rows + feature lanes) and bf16 cast.  With
    # allow_input_fusion below, XLA may fuse this producer into the Mosaic call
    # instead of doing an extra HBM round trip.
    x_p = jnp.pad(x, ((0, B_pad - B), (0, D_IN_PAD - D_IN))).astype(jnp.bfloat16)

    flat_params = []
    weight_specs = []
    for (w, b) in params:
        flat_params += [w, b]
        # Full-array blocks with a constant index_map: weights stay resident in
        # VMEM across all grid steps (fetched once).
        weight_specs.append(pl.BlockSpec(w.shape, lambda i: (0, 0)))
        weight_specs.append(pl.BlockSpec(b.shape, lambda i: (0, 0)))
    # NOTE: pipeline_mode=pl.Buffered(1) on these resident specs would drop the
    # redundant second weight buffer (~2.6 MiB); skipped since VMEM use is already
    # far below the 32 MiB scoped limit at these tile sizes.

    if use_core_parallel and grid_steps > 1:
        # v7x: actually shard the batch steps across the two TensorCores.
        dim_sem = (pltpu.CORE_PARALLEL,)
    else:
        # 1-TC chips (v5e/v6e): the grid is a serial loop; no need for "parallel".
        dim_sem = ("arbitrary",)

    # Advisory cost estimate for XLA's scheduler.
    flops = 2 * B_pad * (sum(k * n for k, n in KERNEL_SIZES) + 128)
    param_bytes = sum(int(p.size) * p.dtype.itemsize for p in flat_params)
    bytes_accessed = param_bytes + B_pad * D_IN_PAD * 2 + B_pad * 4
    cost = pl.CostEstimate(flops=flops, transcendentals=0,
                           bytes_accessed=bytes_accessed)

    out_pad = pl.pallas_call(
        mlp_kernel,
        out_shape=jax.ShapeDtypeStruct((grid_steps, 1, tile), jnp.float32),
        grid_spec=pltpu.PrefetchScalarGridSpec(
            num_scalar_prefetch=0,
            grid=(grid_steps,),
            in_specs=[pl.BlockSpec((tile, D_IN_PAD), lambda i: (i, 0))]
                     + weight_specs,
            out_specs=pl.BlockSpec((1, 1, tile), lambda i: (i, 0, 0)),
        ),
        compiler_params=pltpu.CompilerParams(
            dimension_semantics=dim_sem,
            vmem_limit_bytes=32 * 1024 * 1024,
            allow_input_fusion=[True] + [False] * len(flat_params),
        ),
        cost_estimate=cost,
    )(x_p, *flat_params)

    # (grid, 1, tile) -> (B, 1); batch row g*tile + j lives at out_pad[g, 0, j].
    return out_pad.reshape(B_pad, 1)[:B]


def init_params(key):
    """PyTorch nn.Linear-style U(-1/sqrt(fan_in), 1/sqrt(fan_in)) init.

    Layers 1-5 are stored transposed as (in, out) bf16 weights, zero-padded to
    KERNEL_SIZES, with (1, out) f32 biases.  The final 64->1 layer is stored as a
    (128, 1) f32 column (rows 64..127 zero) plus a (1, 1) f32 bias.
    """
    params = []
    for li, (fan_in, fan_out) in enumerate(TRUE_SIZES):
        key, kw, kb = jax.random.split(key, 3)
        bound = 1.0 / (fan_in ** 0.5)
        w = jax.random.uniform(kw, (fan_in, fan_out), jnp.float32, -bound, bound)
        b = jax.random.uniform(kb, (1, fan_out), jnp.float32, -bound, bound)
        if li < len(TRUE_SIZES) - 1:
            in_p, out_p = KERNEL_SIZES[li]
            w_pad = jnp.zeros((in_p, out_p), jnp.float32).at[:fan_in, :fan_out].set(w)
            b_pad = jnp.zeros((1, out_p), jnp.float32).at[:, :fan_out].set(b)
            params.append((w_pad.astype(jnp.bfloat16), b_pad))
        else:
            w_col = jnp.zeros((128, 1), jnp.float32).at[:fan_in, :].set(w)
            params.append((w_col, b))             # b: (1, 1) f32
    return params


def reference_forward(x, params):
    """Plain-JAX reference using the same bf16 weights / f32 accumulation path."""
    h = jnp.pad(x, ((0, 0), (0, D_IN_PAD - D_IN))).astype(jnp.bfloat16)
    h_f32 = None
    for (w, b) in params[:-1]:
        h_f32 = jnp.maximum(
            jnp.dot(h, w, preferred_element_type=jnp.float32) + b, 0.0)
        h = h_f32.astype(jnp.bfloat16)
    w6, b6 = params[-1]                               # (128, 1) f32, (1, 1) f32
    return jnp.sum(h_f32 * w6[:, 0], axis=1, keepdims=True) + b6


if __name__ == "__main__":
    key = jax.random.PRNGKey(0)
    key, kx = jax.random.split(key)
    B = 128                                    # small demo batch -> one 128-row tile
    x = jax.random.normal(kx, (B, D_IN), jnp.float32)

    params = init_params(key)

    out = jax.block_until_ready(net_forward(x, params))
    ref = reference_forward(x, params)

    assert out.shape == (B, 1)
    assert jnp.allclose(out, ref, atol=1e-2, rtol=1e-2)
    print("KERNEL_OK")
</pallas_src>

<mosaic_0001>
module attributes {stable_mosaic.version = 11 : i64} {
  func.func @mlp_kernel(%arg0: i32, %arg1: memref<128x640xbf16, #tpu.memory_space<vmem>>, %arg2: memref<640x1024xbf16, #tpu.memory_space<vmem>>, %arg3: memref<1x1024xf32, #tpu.memory_space<vmem>>, %arg4: memref<1024x512xbf16, #tpu.memory_space<vmem>>, %arg5: memref<1x512xf32, #tpu.memory_space<vmem>>, %arg6: memref<512x256xbf16, #tpu.memory_space<vmem>>, %arg7: memref<1x256xf32, #tpu.memory_space<vmem>>, %arg8: memref<256x128xbf16, #tpu.memory_space<vmem>>, %arg9: memref<1x128xf32, #tpu.memory_space<vmem>>, %arg10: memref<128x128xbf16, #tpu.memory_space<vmem>>, %arg11: memref<1x128xf32, #tpu.memory_space<vmem>>, %arg12: memref<128x1xf32, #tpu.memory_space<vmem>>, %arg13: memref<1x1xf32, #tpu.memory_space<vmem>>, %arg14: memref<1x1x128xf32, #tpu.memory_space<vmem>>) attributes {dimension_semantics = [#tpu.dimension_semantics<arbitrary>], iteration_bounds = array<i64: 1>, scalar_prefetch = 0 : i64, scratch_operands = 0 : i64, tpu.core_type = #tpu.core_type<tc>, window_params = [{transform_indices = @transform_0, window_bounds = array<i64: 128, 640>}, {pipeline_mode = #tpu.pipeline_mode<synchronous>, transform_indices = @transform_1, window_bounds = array<i64: 640, 1024>}, {pipeline_mode = #tpu.pipeline_mode<synchronous>, transform_indices = @transform_2, window_bounds = array<i64: 1, 1024>}, {pipeline_mode = #tpu.pipeline_mode<synchronous>, transform_indices = @transform_3, window_bounds = array<i64: 1024, 512>}, {pipeline_mode = #tpu.pipeline_mode<synchronous>, transform_indices = @transform_4, window_bounds = array<i64: 1, 512>}, {pipeline_mode = #tpu.pipeline_mode<synchronous>, transform_indices = @transform_5, window_bounds = array<i64: 512, 256>}, {pipeline_mode = #tpu.pipeline_mode<synchronous>, transform_indices = @transform_6, window_bounds = array<i64: 1, 256>}, {pipeline_mode = #tpu.pipeline_mode<synchronous>, transform_indices = @transform_7, window_bounds = array<i64: 256, 128>}, {pipeline_mode = #tpu.pipeline_mode<synchronous>, transform_indices = @transform_8, window_bounds = array<i64: 1, 128>}, {pipeline_mode = #tpu.pipeline_mode<synchronous>, transform_indices = @transform_9, window_bounds = array<i64: 128, 128>}, {pipeline_mode = #tpu.pipeline_mode<synchronous>, transform_indices = @transform_10, window_bounds = array<i64: 1, 128>}, {pipeline_mode = #tpu.pipeline_mode<synchronous>, transform_indices = @transform_11, window_bounds = array<i64: 128, 1>}, {pipeline_mode = #tpu.pipeline_mode<synchronous>, transform_indices = @transform_12, window_bounds = array<i64: 1, 1>}, {transform_indices = @transform_13, window_bounds = array<i64: 1, 1, 128>}]} {
    %c0 = arith.constant 0 : index
    %c0_0 = arith.constant 0 : index
    %0 = vector.load %arg1[%c0, %c0_0] : memref<128x640xbf16, #tpu.memory_space<vmem>>, vector<128x640xbf16>
    %c0_1 = arith.constant 0 : index
    %c0_2 = arith.constant 0 : index
    %1 = vector.load %arg2[%c0_1, %c0_2] : memref<640x1024xbf16, #tpu.memory_space<vmem>>, vector<640x1024xbf16>
    %cst = arith.constant dense<0.000000e+00> : vector<128x1024xf32>
    %2 = tpu.matmul %0, %1, %cst {dimension_numbers = #tpu.dot_dimension_numbers<[1], [0], [0], [1], [0, 0, 1, 1], [], []>} : vector<128x640xbf16>, vector<640x1024xbf16>, vector<128x1024xf32> -> vector<128x1024xf32>
    %c0_3 = arith.constant 0 : index
    %c0_4 = arith.constant 0 : index
    %3 = vector.load %arg3[%c0_3, %c0_4] : memref<1x1024xf32, #tpu.memory_space<vmem>>, vector<1x1024xf32>
    %4 = vector.broadcast %3 : vector<1x1024xf32> to vector<128x1024xf32>
    %5 = arith.addf %2, %4 : vector<128x1024xf32>
    %cst_5 = arith.constant 0.000000e+00 : f32
    %6 = vector.broadcast %cst_5 : f32 to vector<128x1024xf32>
    %7 = arith.maximumf %5, %6 : vector<128x1024xf32>
    %8 = arith.truncf %7 : vector<128x1024xf32> to vector<128x1024xbf16>
    %c0_6 = arith.constant 0 : index
    %c0_7 = arith.constant 0 : index
    %9 = vector.load %arg4[%c0_6, %c0_7] : memref<1024x512xbf16, #tpu.memory_space<vmem>>, vector<1024x512xbf16>
    %cst_8 = arith.constant dense<0.000000e+00> : vector<128x512xf32>
    %10 = tpu.matmul %8, %9, %cst_8 {dimension_numbers = #tpu.dot_dimension_numbers<[1], [0], [0], [1], [0, 0, 1, 1], [], []>} : vector<128x1024xbf16>, vector<1024x512xbf16>, vector<128x512xf32> -> vector<128x512xf32>
    %c0_9 = arith.constant 0 : index
    %c0_10 = arith.constant 0 : index
    %11 = vector.load %arg5[%c0_9, %c0_10] : memref<1x512xf32, #tpu.memory_space<vmem>>, vector<1x512xf32>
    %12 = vector.broadcast %11 : vector<1x512xf32> to vector<128x512xf32>
    %13 = arith.addf %10, %12 : vector<128x512xf32>
    %cst_11 = arith.constant 0.000000e+00 : f32
    %14 = vector.broadcast %cst_11 : f32 to vector<128x512xf32>
    %15 = arith.maximumf %13, %14 : vector<128x512xf32>
    %16 = arith.truncf %15 : vector<128x512xf32> to vector<128x512xbf16>
    %c0_12 = arith.constant 0 : index
    %c0_13 = arith.constant 0 : index
    %17 = vector.load %arg6[%c0_12, %c0_13] : memref<512x256xbf16, #tpu.memory_space<vmem>>, vector<512x256xbf16>
    %cst_14 = arith.constant dense<0.000000e+00> : vector<128x256xf32>
    %18 = tpu.matmul %16, %17, %cst_14 {dimension_numbers = #tpu.dot_dimension_numbers<[1], [0], [0], [1], [0, 0, 1, 1], [], []>} : vector<128x512xbf16>, vector<512x256xbf16>, vector<128x256xf32> -> vector<128x256xf32>
    %c0_15 = arith.constant 0 : index
    %c0_16 = arith.constant 0 : index
    %19 = vector.load %arg7[%c0_15, %c0_16] : memref<1x256xf32, #tpu.memory_space<vmem>>, vector<1x256xf32>
    %20 = vector.broadcast %19 : vector<1x256xf32> to vector<128x256xf32>
    %21 = arith.addf %18, %20 : vector<128x256xf32>
    %cst_17 = arith.constant 0.000000e+00 : f32
    %22 = vector.broadcast %cst_17 : f32 to vector<128x256xf32>
    %23 = arith.maximumf %21, %22 : vector<128x256xf32>
    %24 = arith.truncf %23 : vector<128x256xf32> to vector<128x256xbf16>
    %c0_18 = arith.constant 0 : index
    %c0_19 = arith.constant 0 : index
    %25 = vector.load %arg8[%c0_18, %c0_19] : memref<256x128xbf16, #tpu.memory_space<vmem>>, vector<256x128xbf16>
    %cst_20 = arith.constant dense<0.000000e+00> : vector<128x128xf32>
    %26 = tpu.matmul %24, %25, %cst_20 {dimension_numbers = #tpu.dot_dimension_numbers<[1], [0], [0], [1], [0, 0, 1, 1], [], []>} : vector<128x256xbf16>, vector<256x128xbf16>, vector<128x128xf32> -> vector<128x128xf32>
    %c0_21 = arith.constant 0 : index
    %c0_22 = arith.constant 0 : index
    %27 = vector.load %arg9[%c0_21, %c0_22] : memref<1x128xf32, #tpu.memory_space<vmem>>, vector<1x128xf32>
    %28 = vector.broadcast %27 : vector<1x128xf32> to vector<128x128xf32>
    %29 = arith.addf %26, %28 : vector<128x128xf32>
    %cst_23 = arith.constant 0.000000e+00 : f32
    %30 = vector.broadcast %cst_23 : f32 to vector<128x128xf32>
    %31 = arith.maximumf %29, %30 : vector<128x128xf32>
    %32 = arith.truncf %31 : vector<128x128xf32> to vector<128x128xbf16>
    %c0_24 = arith.constant 0 : index
    %c0_25 = arith.constant 0 : index
    %33 = vector.load %arg10[%c0_24, %c0_25] : memref<128x128xbf16, #tpu.memory_space<vmem>>, vector<128x128xbf16>
    %cst_26 = arith.constant dense<0.000000e+00> : vector<128x128xf32>
    %34 = tpu.matmul %32, %33, %cst_26 {dimension_numbers = #tpu.dot_dimension_numbers<[1], [0], [0], [1], [0, 0, 1, 1], [], []>} : vector<128x128xbf16>, vector<128x128xbf16>, vector<128x128xf32> -> vector<128x128xf32>
    %c0_27 = arith.constant 0 : index
    %c0_28 = arith.constant 0 : index
    %35 = vector.load %arg11[%c0_27, %c0_28] : memref<1x128xf32, #tpu.memory_space<vmem>>, vector<1x128xf32>
    %36 = vector.broadcast %35 : vector<1x128xf32> to vector<128x128xf32>
    %37 = arith.addf %34, %36 : vector<128x128xf32>
    %cst_29 = arith.constant 0.000000e+00 : f32
    %38 = vector.broadcast %cst_29 : f32 to vector<128x128xf32>
    %39 = arith.maximumf %37, %38 : vector<128x128xf32>
    %40 = tpu.transpose %39, [1, 0] : vector<128x128xf32> -> vector<128x128xf32>
    %c0_30 = arith.constant 0 : index
    %c0_31 = arith.constant 0 : index
    %41 = vector.load %arg12[%c0_30, %c0_31] : memref<128x1xf32, #tpu.memory_space<vmem>>, vector<128x1xf32>
    %42 = vector.broadcast %41 : vector<128x1xf32> to vector<128x128xf32>
    %43 = arith.mulf %40, %42 : vector<128x128xf32>
    %cst_32 = arith.constant dense<0.000000e+00> : vector<128xf32>
    %44 = vector.multi_reduction <add>, %43, %cst_32 [0] : vector<128x128xf32> to vector<128xf32>
    %45 = vector.shape_cast %44 : vector<128xf32> to vector<1x128xf32>
    %c0_33 = arith.constant 0 : index
    %c0_34 = arith.constant 0 : index
    %46 = vector.load %arg13[%c0_33, %c0_34] : memref<1x1xf32, #tpu.memory_space<vmem>>, vector<1x1xf32>
    %47 = vector.broadcast %46 : vector<1x1xf32> to vector<1x128xf32>
    %48 = arith.addf %45, %47 : vector<1x128xf32>
    %49 = vector.shape_cast %48 : vector<1x128xf32> to vector<1x1x128xf32>
    %c0_35 = arith.constant 0 : index
    %c0_36 = arith.constant 0 : index
    %c0_37 = arith.constant 0 : index
    %50 = vector.load %arg14[%c0_35, %c0_36, %c0_37] : memref<1x1x128xf32, #tpu.memory_space<vmem>>, vector<1x1x128xf32>
    tpu.vector_store %arg14[%c0_35, %c0_36, %c0_37], %49 {strides = array<i32>} : memref<1x1x128xf32, #tpu.memory_space<vmem>>, vector<1x1x128xf32>,
    return
  }
  func.func @transform_0(%arg0: i32) -> (i32, i32) {
    %c0_i32 = arith.constant 0 : i32
    %c0_i32_0 = arith.constant 0 : i32
    return %arg0, %c0_i32 : i32, i32
  }
  func.func @transform_1(%arg0: i32) -> (i32, i32) {
    %c0_i32 = arith.constant 0 : i32
    %c0_i32_0 = arith.constant 0 : i32
    %c0_i32_1 = arith.constant 0 : i32
    return %c0_i32, %c0_i32_0 : i32, i32
  }
  func.func @transform_2(%arg0: i32) -> (i32, i32) {
    %c0_i32 = arith.constant 0 : i32
    %c0_i32_0 = arith.constant 0 : i32
    %c0_i32_1 = arith.constant 0 : i32
    return %c0_i32, %c0_i32_0 : i32, i32
  }
  func.func @transform_3(%arg0: i32) -> (i32, i32) {
    %c0_i32 = arith.constant 0 : i32
    %c0_i32_0 = arith.constant 0 : i32
    %c0_i32_1 = arith.constant 0 : i32
    return %c0_i32, %c0_i32_0 : i32, i32
  }
  func.func @transform_4(%arg0: i32) -> (i32, i32) {
    %c0_i32 = arith.constant 0 : i32
    %c0_i32_0 = arith.constant 0 : i32
    %c0_i32_1 = arith.constant 0 : i32
    return %c0_i32, %c0_i32_0 : i32, i32
  }
  func.func @transform_5(%arg0: i32) -> (i32, i32) {
    %c0_i32 = arith.constant 0 : i32
    %c0_i32_0 = arith.constant 0 : i32
    %c0_i32_1 = arith.constant 0 : i32
    return %c0_i32, %c0_i32_0 : i32, i32
  }
  func.func @transform_6(%arg0: i32) -> (i32, i32) {
    %c0_i32 = arith.constant 0 : i32
    %c0_i32_0 = arith.constant 0 : i32
    %c0_i32_1 = arith.constant 0 : i32
    return %c0_i32, %c0_i32_0 : i32, i32
  }
  func.func @transform_7(%arg0: i32) -> (i32, i32) {
    %c0_i32 = arith.constant 0 : i32
    %c0_i32_0 = arith.constant 0 : i32
    %c0_i32_1 = arith.constant 0 : i32
    return %c0_i32, %c0_i32_0 : i32, i32
  }
  func.func @transform_8(%arg0: i32) -> (i32, i32) {
    %c0_i32 = arith.constant 0 : i32
    %c0_i32_0 = arith.constant 0 : i32
    %c0_i32_1 = arith.constant 0 : i32
    return %c0_i32, %c0_i32_0 : i32, i32
  }
  func.func @transform_9(%arg0: i32) -> (i32, i32) {
    %c0_i32 = arith.constant 0 : i32
    %c0_i32_0 = arith.constant 0 : i32
    %c0_i32_1 = arith.constant 0 : i32
    return %c0_i32, %c0_i32_0 : i32, i32
  }
  func.func @transform_10(%arg0: i32) -> (i32, i32) {
    %c0_i32 = arith.constant 0 : i32
    %c0_i32_0 = arith.constant 0 : i32
    %c0_i32_1 = arith.constant 0 : i32
    return %c0_i32, %c0_i32_0 : i32, i32
  }
  func.func @transform_11(%arg0: i32) -> (i32, i32) {
    %c0_i32 = arith.constant 0 : i32
    %c0_i32_0 = arith.constant 0 : i32
    %c0_i32_1 = arith.constant 0 : i32
    return %c0_i32, %c0_i32_0 : i32, i32
  }
  func.func @transform_12(%arg0: i32) -> (i32, i32) {
    %c0_i32 = arith.constant 0 : i32
    %c0_i32_0 = arith.constant 0 : i32
    %c0_i32_1 = arith.constant 0 : i32
    return %c0_i32, %c0_i32_0 : i32, i32
  }
  func.func @transform_13(%arg0: i32) -> (i32, i32, i32) {
    %c0_i32 = arith.constant 0 : i32
    %c0_i32_0 = arith.constant 0 : i32
    %c0_i32_1 = arith.constant 0 : i32
    return %arg0, %c0_i32, %c0_i32_0 : i32, i32, i32
  }
}

</mosaic_0001>

<bundles_post_ra>
// kernel: net_forward.2
= control target key start
LH: loop header
LB: loop body
LE: loop exit
PB: predicated region body
PF: predicated region fallthrough
CT: control target
= control target key end

     0   :  { %s12897_s0 = inlined_call_operand.hbm [shape: bf16[640,1024], index: 0, kind: input, shape index: {}]   ;;  %s12898_s1 = inlined_call_operand.hbm [shape: f32[1,1024], index: 1, kind: input, shape index: {}]   ;;  %s12899_s2 = inlined_call_operand.hbm [shape: bf16[1024,512], index: 2, kind: input, shape index: {}]   ;;  %s12900_s3 = inlined_call_operand.hbm [shape: f32[1,512], index: 3, kind: input, shape index: {}]   ;;  %s12901_s4 = inlined_call_operand.hbm [shape: bf16[512,256], index: 4, kind: input, shape index: {}]   ;;  %s12902_s5 = inlined_call_operand.hbm [shape: f32[1,256], index: 5, kind: input, shape index: {}]   ;;  %s12903_s6 = inlined_call_operand.hbm [shape: bf16[256,128], index: 6, kind: input, shape index: {}]   ;;  %s12904_s7 = inlined_call_operand.hbm [shape: f32[1,128], index: 7, kind: input, shape index: {}]   ;;  %s12905_s8 = inlined_call_operand.hbm [shape: bf16[128,128], index: 8, kind: input, shape index: {}]   ;;  %s12906_s9 = inlined_call_operand.hbm [shape: f32[1,128], index: 9, kind: input, shape index: {}]   ;;  %s12907_s10 = inlined_call_operand.vmem [shape: f32[128,1], index: 10, kind: input, shape index: {}]   ;;  %s12908_s11 = inlined_call_operand.<no memory space> [shape: f32[1,1], index: 11, kind: input, shape index: {}]   ;;  %s12909_s12 = inlined_call_operand.vmem [shape: bf16[128,554], index: 12, kind: input, shape index: {}]   ;;  %s12910_s13 = inlined_call_operand.<no memory space> [shape: bf16[], index: 13, kind: input, shape index: {}]   ;;  %s12911_s14 = inlined_call_operand.hbm [shape: f32[1,1,128], index: 14, kind: output, shape index: {}]  }
   0x1   :  { %v19_v0 = vstv %s12910_s13  ;;  %v24_v1 = vstv %s12908_s11 }
   0x2   :  { %v11702_v2 = vunpack.i.l.bf16 %v19_v0  ;;  %25 = vst [vmem:[#allocation7] sm:$0x1] %v24_v1 }
   0x3   :  { %26 = vsyncpa [#allocation9], 0 }
   0x4   :  { %27 = vsyncpa [#allocation12], 0 }
   0x5   :  { %28 = vsyncpa [#allocation15], 0 }
   0x6   :  { %29 = vsyncpa [#allocation18], 0 }
   0x7   :  { %30 = vsyncpa [#allocation21], 0 }
   0x8   :  { %31 = vsyncpa [#allocation24], 0 }
   0x9   :  { %32 = vsyncpa [#allocation10], 0  ;;  %s11600_s17 = smov [#allocation11]   ;;  %s11601_s19 = smov [#allocation14]  }
   0xa   :  { %s53_s18 = sshll.u32 %s11600_s17, 4  ;;  %s75_s20 = sshll.u32 %s11601_s19, 4  ;;  %s54_s18 = int_to_ptr.vmem [resolvable:$true] %s53_s18  ;;  %s76_s20 = int_to_ptr.vmem [resolvable:$true] %s75_s20 }
   0xb   :  { %s11344_s11 = scalar_lea.hbm %s12898_s1, 128 }
   0xc   :  { %p11345_p0 = scmp.ne.s32.totalorder %s12898_s1, %s11344_s11  ;;  %p11348_p1 = scmp.lt.u32.totalorder %s11344_s11, %s12898_s1 }
   0xe   :  { %p11350_p2 = pnand %p11348_p1, %p11345_p0 }
  0x10   :  { %11353 = shalt.err (!%p11350_p2)
}
  0x11   :  { %s11354_s26 = scalar_lea.vmem %s54_s18, 128  ;;  %p11359_p4 = scmp.lt.s32.totalorder %s54_s18, %s54_s18 }
  0x12   :  { %p11355_p3 = scmp.ne.s32.totalorder %s54_s18, %s11354_s26  ;;  %p11360_p5 = scmp.lt.s32.totalorder %s11354_s26, %s11354_s26 }
  0x14   :  { %p11361_p6 = por %p11360_p5, %p11359_p4 }
  0x16   :  { %p11362_p7 = pnand %p11361_p6, %p11355_p3 }
  0x18   :  { %11365 = shalt.err (!%p11362_p7)
}
  0x19   :  { %56 = dma.hbm_to_vmem [thread:$0]  %s12898_s1, 128, %s54_s18, [#allocation12]  }
  0x1a   :  { %s11366_s15 = scalar_lea.hbm %s12900_s3, 64 }
  0x1b   :  { %p11367_p8 = scmp.ne.s32.totalorder %s12900_s3, %s11366_s15  ;;  %p11370_p9 = scmp.lt.u32.totalorder %s11366_s15, %s12900_s3 }
  0x1d   :  { %p11372_p10 = pnand %p11370_p9, %p11367_p8 }
  0x1f   :  { %11375 = shalt.err (!%p11372_p10)
}
  0x20   :  { %s11376_s21 = scalar_lea.vmem %s76_s20, 64  ;;  %p11381_p12 = scmp.lt.s32.totalorder %s76_s20, %s76_s20 }
  0x21   :  { %p11377_p11 = scmp.ne.s32.totalorder %s76_s20, %s11376_s21  ;;  %p11382_p13 = scmp.lt.s32.totalorder %s11376_s21, %s11376_s21 }
  0x23   :  { %p11383_p0 = por %p11382_p13, %p11381_p12 }
  0x25   :  { %p11384_p1 = pnand %p11383_p0, %p11377_p11 }
  0x27   :  { %11387 = shalt.err (!%p11384_p1)
}
  0x28   :  { %78 = dma.hbm_to_vmem [thread:$0]  %s12900_s3, 64, %s76_s20, [#allocation15]  }
  0x29   :  { %s11602_s11 = smov [#allocation17]   ;;  %s11603_s23 = smov [#allocation20]  }
  0x2a   :  { %s97_s22 = sshll.u32 %s11602_s11, 4  ;;  %s119_s24 = sshll.u32 %s11603_s23, 4  ;;  %s98_s22 = int_to_ptr.vmem [resolvable:$true] %s97_s22  ;;  %s120_s24 = int_to_ptr.vmem [resolvable:$true] %s119_s24 }
  0x2b   :  { %s11388_s27 = scalar_lea.hbm %s12902_s5, 32 }
  0x2c   :  { %p11389_p2 = scmp.ne.s32.totalorder %s12902_s5, %s11388_s27  ;;  %p11392_p3 = scmp.lt.u32.totalorder %s11388_s27, %s12902_s5 }
  0x2e   :  { %p11394_p4 = pnand %p11392_p3, %p11389_p2 }
  0x30   :  { %11397 = shalt.err (!%p11394_p4)
}
  0x31   :  { %s11398_s3 = scalar_lea.vmem %s98_s22, 32  ;;  %p11403_p6 = scmp.lt.s32.totalorder %s98_s22, %s98_s22 }
  0x32   :  { %p11399_p5 = scmp.ne.s32.totalorder %s98_s22, %s11398_s3  ;;  %p11404_p7 = scmp.lt.s32.totalorder %s11398_s3, %s11398_s3 }
  0x34   :  { %p11405_p8 = por %p11404_p7, %p11403_p6 }
  0x36   :  { %p11406_p9 = pnand %p11405_p8, %p11399_p5 }
  0x38   :  { %11409 = shalt.err (!%p11406_p9)
}
  0x39   :  { %100 = dma.hbm_to_vmem [thread:$0]  %s12902_s5, 32, %s98_s22, [#allocation18]  }
  0x3a   :  { %s11410_s13 = scalar_lea.hbm %s12904_s7, 16 }
  0x3b   :  { %p11411_p10 = scmp.ne.s32.totalorder %s12904_s7, %s11410_s13  ;;  %p11414_p11 = scmp.lt.u32.totalorder %s11410_s13, %s12904_s7 }
  0x3d   :  { %p11416_p12 = pnand %p11414_p11, %p11411_p10 }
  0x3f   :  { %11419 = shalt.err (!%p11416_p12)
}
  0x40   :  { %s11420_s23 = scalar_lea.vmem %s120_s24, 16  ;;  %s11424_s25 = scalar_lea.vmem %s120_s24, 32 }
  0x41   :  { %p11421_p13 = scmp.ne.s32.totalorder %s120_s24, %s11420_s23  ;;  %p11425_p0 = scmp.lt.s32.totalorder %s120_s24, %s120_s24 }
  0x42   :  { %p11426_p1 = scmp.lt.s32.totalorder %s11424_s25, %s11420_s23 }
  0x44   :  { %p11427_p2 = por %p11426_p1, %p11425_p0 }
  0x46   :  { %p11428_p3 = pnand %p11427_p2, %p11421_p13 }
  0x48   :  { %11431 = shalt.err (!%p11428_p3)
}
  0x49   :  { %122 = dma.hbm_to_vmem [thread:$0]  %s12904_s7, 16, %s120_s24, [#allocation21]  }
  0x4a   :  { %s11604_s26 = smov [#allocation8]   ;;  %s11432_s30 = scalar_lea.hbm %s12897_s0, 40960 }
  0x4b   :  { %s40_s27 = sshll.u32 %s11604_s26, 4  ;;  %p11433_p4 = scmp.ne.s32.totalorder %s12897_s0, %s11432_s30  ;;  %s41_s27 = int_to_ptr.vmem [resolvable:$true] %s40_s27 }
  0x4c   :  { %p11436_p5 = scmp.lt.u32.totalorder %s11432_s30, %s12897_s0 }
  0x4e   :  { %p11438_p6 = pnand %p11436_p5, %p11433_p4 }
  0x50   :  { %11441 = shalt.err (!%p11438_p6)
}
  0x51   :  { %s11442_s17 = scalar_lea.vmem %s41_s27, 40960  ;;  %p11447_p8 = scmp.lt.s32.totalorder %s41_s27, %s41_s27 }
  0x52   :  { %p11443_p7 = scmp.ne.s32.totalorder %s41_s27, %s11442_s17  ;;  %p11448_p9 = scmp.lt.s32.totalorder %s11442_s17, %s11442_s17 }
  0x54   :  { %p11449_p10 = por %p11448_p9, %p11447_p8 }
  0x56   :  { %p11450_p11 = pnand %p11449_p10, %p11443_p7 }
  0x58   :  { %11453 = shalt.err (!%p11450_p11)
}
  0x59   :  { %s11605_s7 = smov 512   ;;  %s11606_s24 = smov 32  }
  0x5a   :  { %46 = dma.hbm_to_vmem [thread:$0]  %s12897_s0, 40960, %s41_s27, [#allocation9], %s11605_s7, %s11605_s7, %s11606_s24  }
  0x5b   :  { %s11607_s21 = smov [#allocation13]   ;;  %s11454_s23 = scalar_lea.hbm %s12899_s2, 32768 }
  0x5c   :  { %s62_s1 = sshll.u32 %s11607_s21, 4  ;;  %p11455_p12 = scmp.ne.s32.totalorder %s12899_s2, %s11454_s23  ;;  %s63_s1 = int_to_ptr.vmem [resolvable:$true] %s62_s1 }
  0x5d   :  { %p11458_p13 = scmp.lt.u32.totalorder %s11454_s23, %s12899_s2 }
  0x5f   :  { %p11460_p0 = pnand %p11458_p13, %p11455_p12 }
  0x61   :  { %11463 = shalt.err (!%p11460_p0)
}
  0x62   :  { %s11464_s28 = scalar_lea.vmem %s63_s1, 32768  ;;  %p11469_p2 = scmp.lt.s32.totalorder %s63_s1, %s63_s1 }
  0x63   :  { %p11465_p1 = scmp.ne.s32.totalorder %s63_s1, %s11464_s28  ;;  %p11470_p3 = scmp.lt.s32.totalorder %s11464_s28, %s11464_s28 }
  0x65   :  { %p11471_p4 = por %p11470_p3, %p11469_p2 }
  0x67   :  { %p11472_p5 = pnand %p11471_p4, %p11465_p1 }
  0x69   :  { %11475 = shalt.err (!%p11472_p5)
}
  0x6a   :  { %s11608_s0 = smov 256   ;;  %s11609_s27 = smov 16  }
  0x6b   :  { %68 = dma.hbm_to_vmem [thread:$0]  %s12899_s2, 32768, %s63_s1, [#allocation12], %s11608_s0, %s11608_s0, %s11609_s27  }
  0x6c   :  { %s11610_s15 = smov [#allocation16]   ;;  %s11476_s17 = scalar_lea.hbm %s12901_s4, 8192 }
  0x6d   :  { %s84_s3 = sshll.u32 %s11610_s15, 4  ;;  %p11477_p6 = scmp.ne.s32.totalorder %s12901_s4, %s11476_s17  ;;  %s85_s3 = int_to_ptr.vmem [resolvable:$true] %s84_s3 }
  0x6e   :  { %p11480_p7 = scmp.lt.u32.totalorder %s11476_s17, %s12901_s4 }
  0x70   :  { %p11482_p8 = pnand %p11480_p7, %p11477_p6 }
  0x72   :  { %11485 = shalt.err (!%p11482_p8)
}
  0x73   :  { %s11486_s21 = scalar_lea.vmem %s85_s3, 8192  ;;  %p11491_p10 = scmp.lt.s32.totalorder %s85_s3, %s85_s3 }
  0x74   :  { %p11487_p9 = scmp.ne.s32.totalorder %s85_s3, %s11486_s21  ;;  %p11492_p11 = scmp.lt.s32.totalorder %s11486_s21, %s11486_s21 }
  0x76   :  { %p11493_p12 = por %p11492_p11, %p11491_p10 }
  0x78   :  { %p11494_p13 = pnand %p11493_p12, %p11487_p9 }
  0x7a   :  { %11497 = shalt.err (!%p11494_p13)
}
  0x7b   :  { %s11611_s2 = smov 128   ;;  %s11612_s1 = smov 8  }
  0x7c   :  { %90 = dma.hbm_to_vmem [thread:$0]  %s12901_s4, 8192, %s85_s3, [#allocation15], %s11611_s2, %s11611_s2, %s11612_s1  }
  0x7d   :  { %s11613_s23 = smov [#allocation19]   ;;  %s11498_s26 = scalar_lea.hbm %s12903_s6, 2048 }
  0x7e   :  { %s106_s25 = sshll.u32 %s11613_s23, 4  ;;  %p11499_p0 = scmp.ne.s32.totalorder %s12903_s6, %s11498_s26  ;;  %s107_s25 = int_to_ptr.vmem [resolvable:$true] %s106_s25 }
  0x7f   :  { %p11502_p1 = scmp.lt.u32.totalorder %s11498_s26, %s12903_s6 }
  0x81   :  { %p11504_p2 = pnand %p11502_p1, %p11499_p0 }
  0x83   :  { %11507 = shalt.err (!%p11504_p2)
}
  0x84   :  { %s11508_s30 = scalar_lea.vmem %s107_s25, 2048  ;;  %p11513_p4 = scmp.lt.s32.totalorder %s107_s25, %s107_s25 }
  0x85   :  { %p11509_p3 = scmp.ne.s32.totalorder %s107_s25, %s11508_s30  ;;  %p11514_p5 = scmp.lt.s32.totalorder %s11508_s30, %s11508_s30 }
  0x87   :  { %p11515_p6 = por %p11514_p5, %p11513_p4 }
  0x89   :  { %p11516_p7 = pnand %p11515_p6, %p11509_p3 }
  0x8b   :  { %11519 = shalt.err (!%p11516_p7)
}
  0x8c   :  { %s11614_s4 = smov 64   ;;  %s11615_s15 = smov 4  }
  0x8d   :  { %112 = dma.hbm_to_vmem [thread:$0]  %s12903_s6, 2048, %s107_s25, [#allocation18], %s11614_s4, %s11614_s4, %s11615_s15  }
  0x8e   :  { %s11616_s16 = smov [#allocation22]   ;;  %s11617_s7 = smov [#allocation23]  }
  0x8f   :  { %s128_s17 = sshll.u32 %s11616_s16, 4  ;;  %s141_s24 = sshll.u32 %s11617_s7, 4  ;;  %s129_s17 = int_to_ptr.vmem [resolvable:$true] %s128_s17  ;;  %s142_s24 = int_to_ptr.vmem [resolvable:$true] %s141_s24 }
  0x90   :  { %s11520_s21 = scalar_lea.hbm %s12905_s8, 1024 }
  0x91   :  { %p11521_p8 = scmp.ne.s32.totalorder %s12905_s8, %s11520_s21  ;;  %p11524_p9 = scmp.lt.u32.totalorder %s11520_s21, %s12905_s8 }
  0x93   :  { %p11526_p10 = pnand %p11524_p9, %p11521_p8 }
  0x95   :  { %11529 = shalt.err (!%p11526_p10)
}
  0x96   :  { %s11530_s6 = scalar_lea.vmem %s129_s17, 1024  ;;  %p11535_p12 = scmp.lt.s32.totalorder %s129_s17, %s129_s17 }
  0x97   :  { %p11531_p11 = scmp.ne.s32.totalorder %s129_s17, %s11530_s6  ;;  %p11536_p13 = scmp.lt.s32.totalorder %s11530_s6, %s11530_s6 }
  0x99   :  { %p11537_p0 = por %p11536_p13, %p11535_p12 }
  0x9b   :  { %p11538_p1 = pnand %p11537_p0, %p11531_p11 }
  0x9d   :  { %11541 = shalt.err (!%p11538_p1)
}
  0x9e   :  { %134 = dma.hbm_to_vmem [thread:$0]  %s12905_s8, 1024, %s129_s17, [#allocation21], %s11614_s4, %s11614_s4, %s11615_s15  }
  0x9f   :  { %s11542_s26 = scalar_lea.hbm %s12906_s9, 16 }
  0xa0   :  { %p11543_p2 = scmp.ne.s32.totalorder %s12906_s9, %s11542_s26  ;;  %p11546_p3 = scmp.lt.u32.totalorder %s11542_s26, %s12906_s9 }
  0xa2   :  { %p11548_p4 = pnand %p11546_p3, %p11543_p2 }
  0xa4   :  { %11551 = shalt.err (!%p11548_p4)
}
  0xa5   :  { %s11552_s30 = scalar_lea.vmem %s142_s24, 16  ;;  %s11556_s3 = scalar_lea.vmem %s142_s24, 32 }
  0xa6   :  { %p11553_p5 = scmp.ne.s32.totalorder %s142_s24, %s11552_s30  ;;  %p11557_p6 = scmp.lt.s32.totalorder %s142_s24, %s142_s24 }
  0xa7   :  { %p11558_p7 = scmp.lt.s32.totalorder %s11556_s3, %s11552_s30 }
  0xa9   :  { %p11559_p8 = por %p11558_p7, %p11557_p6 }
  0xab   :  { %p11560_p9 = pnand %p11559_p8, %p11553_p5 }
  0xad   :  { %11563 = shalt.err (!%p11560_p9)
}
  0xae   :  { %144 = dma.hbm_to_vmem [thread:$0]  %s12906_s9, 16, %s142_s24, [#allocation24]  }
  0xaf   :  { %11586 = dma.done.wait [#allocation9], 40960  }
  0xb0   :  { %11587 = vsyncadd [#allocation9], 4294926336 }
  0xb1   :  { %11588 = dma.done.wait [#allocation12], 32896  }
  0xb2   :  { %11589 = vsyncadd [#allocation12], 4294934400 }
  0xb3   :  { %11590 = dma.done.wait [#allocation15], 8256  }
  0xb4   :  { %11591 = vsyncadd [#allocation15], 4294959040 }
  0xb5   :  { %11592 = dma.done.wait [#allocation18], 2080  }
  0xb6   :  { %11593 = vsyncadd [#allocation18], 4294965216 }
  0xb7   :  { %11594 = dma.done.wait [#allocation21], 1040  }
  0xb8   :  { %11595 = vsyncadd [#allocation21], 4294966256 }
  0xb9   :  { %11596 = dma.done.wait [#allocation24], 16  }
  0xba   :  { %11597 = vsyncadd [#allocation24], 4294967280  ;;  %v1410_v3 = vld [vmem:[#allocation8] sm:$0xff]  ;;  %v1411_v5 = vld [vmem:[#allocation8 + $0x8] sm:$0xff]  ;;  %v242_v32 = vlaneseq }
  0xbb   :  { %v1414_v4 = vld [vmem:[#allocation8 + $0x20] sm:$0xff]  ;;  %v1415_v7 = vld [vmem:[#allocation8 + $0x28] sm:$0xff] }
  0xbc   :  { %v9113_v6 = vcombine.high %v1410_v3, %v1414_v4  ;;  %v9112_v8 = vcombine.low %v1410_v3, %v1414_v4  ;;  %v1418_v9 = vld [vmem:[#allocation8 + $0x40] sm:$0xff]  ;;  %v9115_v11 = vcombine.high %v1411_v5, %v1415_v7  ;;  %v9114_v12 = vcombine.low %v1411_v5, %v1415_v7  ;;  %v1419_v14 = vld [vmem:[#allocation8 + $0x48] sm:$0xff]  ;;  %v10795_v3 = vld [vmem:[%s12909_s12 + $0x18] sm:$0xff]  }
  0xbd   :  { %v1422_v10 = vld [vmem:[#allocation8 + $0x60] sm:$0xff]  ;;  %v1423_v15 = vld [vmem:[#allocation8 + $0x68] sm:$0xff]  ;;  %v243_v41 = vand.u32 127, %v242_v32  ;;  %9792 = vst [vmem:[#allocation26 + $0x18] sm:$0xff] %v10795_v3  }
  0xbe   :  { %v9121_v13 = vcombine.high %v1418_v9, %v1422_v10  ;;  %v1426_v16 = vld [vmem:[#allocation8 + $0x80] sm:$0xff]  ;;  %3580 = vmatprep.subr.bf16.mxu0 %v9113_v6  ;;  %v9123_v17 = vcombine.high %v1419_v14, %v1423_v15  ;;  %v1427_v19 = vld [vmem:[#allocation8 + $0x88] sm:$0xff]  ;;  %3919 = vmatprep.subr.bf16.mxu1 %v9115_v11  ;;  %v9120_v21 = vcombine.low %v1418_v9, %v1422_v10 }
  0xbf   :  { %v1430_v18 = vld [vmem:[#allocation8 + $0xa0] sm:$0xff]  ;;  %v1431_v20 = vld [vmem:[#allocation8 + $0xa8] sm:$0xff]  ;;  %3581 = vmatpush1.bf16.msra.mxu0 %v9112_v8  ;;  %3920 = vmatpush1.bf16.msra.mxu1 %v9114_v12  ;;  %v9122_v22 = vcombine.low %v1419_v14, %v1423_v15  ;;  %v11825_v50 = vadd.s32 512, %v243_v41 }
  0xc0   :  { %3582 = vmatprep.subr.bf16.mxu0 %v9121_v13  ;;  %v9129_v23 = vcombine.high %v1426_v16, %v1430_v18  ;;  %3921 = vmatprep.subr.bf16.mxu1 %v9123_v17  ;;  %v9131_v24 = vcombine.high %v1427_v19, %v1431_v20  ;;  %v1434_v25 = vld [vmem:[#allocation8 + $0xc0] sm:$0xff]  ;;  %v1435_v27 = vld [vmem:[#allocation8 + $0xc8] sm:$0xff]  ;;  %v9128_v29 = vcombine.low %v1426_v16, %v1430_v18  ;;  %v9006_v17 = vld [vmem:[%s12909_s12 + $0x38] sm:$0xff]  }
  0xc1   :  { %v1438_v26 = vld [vmem:[#allocation8 + $0xe0] sm:$0xff]  ;;  %v1439_v28 = vld [vmem:[#allocation8 + $0xe8] sm:$0xff]  ;;  %v9130_v30 = vcombine.low %v1427_v19, %v1431_v20  ;;  %vm245_vm0 = vcmp.lt.s32.totalorder %v11825_v50, 554  ;;  %v388_v18 = vunpack.c.l.bf16 %v9006_v17  ;;  %v9805_v19 = vunpack.c.h.bf16 %v9006_v17 }
  0xc2   :  { %v9137_v31 = vcombine.high %v1434_v25, %v1438_v26  ;;  %v9139_v33 = vcombine.high %v1435_v27, %v1439_v28  ;;  %v1442_v34 = vld [vmem:[#allocation8 + $0x100] sm:$0xff]  ;;  %v1443_v36 = vld [vmem:[#allocation8 + $0x108] sm:$0xff]  ;;  %v9136_v38 = vcombine.low %v1434_v25, %v1438_v26  ;;  %v9138_v39 = vcombine.low %v1435_v27, %v1439_v28 }
  0xc3   :  { %3583 = vmatpush1.bf16.msra.mxu0 %v9120_v21  ;;  %3922 = vmatpush1.bf16.msra.mxu1 %v9122_v22  ;;  %v1446_v35 = vld [vmem:[#allocation8 + $0x120] sm:$0xff]  ;;  %v1447_v37 = vld [vmem:[#allocation8 + $0x128] sm:$0xff]  ;;  %v394_v25 = vsel %vm245_vm0, %v388_v18, %v11702_v2 }
  0xc4   :  { %3584 = vmatprep.subr.bf16.mxu0 %v9129_v23  ;;  %3923 = vmatprep.subr.bf16.mxu1 %v9131_v24  ;;  %v9145_v40 = vcombine.high %v1442_v34, %v1446_v35  ;;  %v9147_v42 = vcombine.high %v1443_v36, %v1447_v37  ;;  %v1450_v43 = vld [vmem:[#allocation8 + $0x140] sm:$0xff]  ;;  %v1451_v45 = vld [vmem:[#allocation8 + $0x148] sm:$0xff]  ;;  %v9144_v47 = vcombine.low %v1442_v34, %v1446_v35 }
  0xc5   :  { %v1454_v44 = vld [vmem:[#allocation8 + $0x160] sm:$0xff]  ;;  %v1455_v46 = vld [vmem:[#allocation8 + $0x168] sm:$0xff]  ;;  %v9146_v48 = vcombine.low %v1443_v36, %v1447_v37 }
  0xc6   :  { %v9153_v49 = vcombine.high %v1450_v43, %v1454_v44  ;;  %v9155_v51 = vcombine.high %v1451_v45, %v1455_v46  ;;  %v1458_v52 = vld [vmem:[#allocation8 + $0x180] sm:$0xff]  ;;  %v1459_v54 = vld [vmem:[#allocation8 + $0x188] sm:$0xff]  ;;  %v9152_v56 = vcombine.low %v1450_v43, %v1454_v44  ;;  %v9154_v58 = vcombine.low %v1451_v45, %v1455_v46 }
  0xc7   :  { %3585 = vmatpush1.bf16.msra.mxu0 %v9128_v29  ;;  %3924 = vmatpush1.bf16.msra.mxu1 %v9130_v30  ;;  %v1462_v53 = vld [vmem:[#allocation8 + $0x1a0] sm:$0xff]  ;;  %v1463_v55 = vld [vmem:[#allocation8 + $0x1a8] sm:$0xff]  ;;  %v9806_v30 = vpack.c.bf16 %v9805_v19, %v394_v25 }
  0xc8   :  { %3586 = vmatprep.subr.bf16.mxu0 %v9137_v31  ;;  %3925 = vmatprep.subr.bf16.mxu1 %v9139_v33  ;;  %v1466_v57 = vld [vmem:[#allocation8 + $0x1c0] sm:$0xff]  ;;  %v9161_v59 = vcombine.high %v1458_v52, %v1462_v53  ;;  %v8996_v62 = vld [vmem:[%s12909_s12 + $0x10] sm:$0xff]   ;;  %v9163_v63 = vcombine.high %v1459_v54, %v1463_v55  ;;  %v9160_v6 = vcombine.low %v1458_v52, %v1462_v53 }
  0xc9   :  { %v1470_v60 = vld [vmem:[#allocation8 + $0x1e0] sm:$0xff]  ;;  %v240_v0 = vunpack.c.l.bf16 %v8996_v62  ;;  %v9785_v1 = vunpack.c.h.bf16 %v8996_v62  ;;  %v1467_v4 = vld [vmem:[#allocation8 + $0x1c8] sm:$0xff]  ;;  %v9162_v10 = vcombine.low %v1459_v54, %v1463_v55  ;;  %9807 = vst [vmem:[#allocation26 + $0x38] sm:$0xff] %v9806_v30   ;;  %v11871_v54 = vld [vmem:[%s12909_s12 + $0x78] sm:$0xff]  }
  0xca   :  { %v179_v61 = vld [vmem:[%s12909_s12] sm:$0xff]   ;;  %v1471_v5 = vld [vmem:[#allocation8 + $0x1e8] sm:$0xff]  ;;  %v9169_v11 = vcombine.high %v1466_v57, %v1470_v60  ;;  %v9168_v21 = vcombine.low %v1466_v57, %v1470_v60 }
  0xcb   :  { %3587 = vmatpush1.bf16.msra.mxu0 %v9136_v38  ;;  %3926 = vmatpush1.bf16.msra.mxu1 %v9138_v39  ;;  %189 = vst [vmem:[#allocation26] sm:$0xff] %v179_v61   ;;  %v1474_v7 = vld [vmem:[#allocation8 + $0x200] sm:$0xff]  ;;  %v246_v9 = vsel %vm245_vm0, %v240_v0, %v11702_v2  ;;  %v1475_v12 = vld [vmem:[#allocation8 + $0x208] sm:$0xff]  ;;  %v9171_v15 = vcombine.high %v1467_v4, %v1471_v5 }
  0xcc   :  { %3588 = vmatprep.subr.bf16.mxu0 %v9145_v40  ;;  %3927 = vmatprep.subr.bf16.mxu1 %v9147_v42  ;;  %v1478_v8 = vld [vmem:[#allocation8 + $0x220] sm:$0xff]  ;;  %v1479_v13 = vld [vmem:[#allocation8 + $0x228] sm:$0xff]  ;;  %v9786_v14 = vpack.c.bf16 %v9785_v1, %v246_v9  ;;  %v9170_v22 = vcombine.low %v1467_v4, %v1471_v5 }
  0xcd   :  { %v11843_v16 = vld [vmem:[%s12909_s12 + $0x28] sm:$0xff]   ;;  %v10800_v20 = vld [vmem:[%s12909_s12 + $0x40] sm:$0xff]   ;;  %v9177_v23 = vcombine.high %v1474_v7, %v1478_v8  ;;  %v9179_v26 = vcombine.high %v1475_v12, %v1479_v13  ;;  %v11857_v31 = vld [vmem:[%s12909_s12 + $0x50] sm:$0xff]   ;;  %v9176_v33 = vcombine.low %v1474_v7, %v1478_v8  ;;  %v9178_v35 = vcombine.low %v1475_v12, %v1479_v13 }
  0xce   :  { %9787 = vst [vmem:[#allocation26 + $0x10] sm:$0xff] %v9786_v14   ;;  %v1482_v24 = vld [vmem:[#allocation8 + $0x240] sm:$0xff]  ;;  %9812 = vst [vmem:[#allocation26 + $0x40] sm:$0xff] %v10800_v20   ;;  %v1483_v28 = vld [vmem:[#allocation8 + $0x248] sm:$0xff] }
  0xcf   :  { %3589 = vmatpush1.bf16.msra.mxu0 %v9144_v47  ;;  %3928 = vmatpush1.bf16.msra.mxu1 %v9146_v48  ;;  %v1486_v27 = vld [vmem:[#allocation8 + $0x260] sm:$0xff]  ;;  %v1487_v29 = vld [vmem:[#allocation8 + $0x268] sm:$0xff]  ;;  %v10806_v14 = vld [vmem:[%s12909_s12 + $0xb8] sm:$0xff]  }
  0xd0   :  { %3590 = vmatprep.subr.bf16.mxu0 %v9153_v49  ;;  %3929 = vmatprep.subr.bf16.mxu1 %v9155_v51  ;;  %v9016_v34 = vld [vmem:[%s12909_s12 + $0x60] sm:$0xff]   ;;  %v9185_v36 = vcombine.high %v1482_v24, %v1486_v27  ;;  %v10802_v40 = vld [vmem:[%s12909_s12 + $0x68] sm:$0xff]   ;;  %v9187_v41 = vcombine.high %v1483_v28, %v1487_v29  ;;  %v9184_v47 = vcombine.low %v1482_v24, %v1486_v27  ;;  %v10804_v61 = vld [vmem:[%s12909_s12 + $0x90] sm:$0xff]  }
  0xd1   :  { %v1490_v37 = vld [vmem:[#allocation8 + $0x280] sm:$0xff]  ;;  %v536_v38 = vunpack.c.l.bf16 %v9016_v34  ;;  %v9825_v39 = vunpack.c.h.bf16 %v9016_v34  ;;  %v1491_v44 = vld [vmem:[#allocation8 + $0x288] sm:$0xff]  ;;  %9832 = vst [vmem:[#allocation26 + $0x68] sm:$0xff] %v10802_v40   ;;  %v9186_v52 = vcombine.low %v1483_v28, %v1487_v29  ;;  %9852 = vst [vmem:[#allocation26 + $0x90] sm:$0xff] %v10804_v61  }
  0xd2   :  { %v1494_v42 = vld [vmem:[#allocation8 + $0x2a0] sm:$0xff]  ;;  %v10796_v43 = vld [vmem:[#allocation26 + $0x4] ss:$20 sps:$4 sm:$0xff]   ;;  %9872 = vst [vmem:[#allocation26 + $0xb8] sm:$0xff] %v10806_v14  }
  0xd3   :  { %3591 = vmatpush1.bf16.msra.mxu0 %v9152_v56  ;;  %3930 = vmatpush1.bf16.msra.mxu1 %v9154_v58  ;;  %v1495_v45 = vld [vmem:[#allocation8 + $0x2a8] sm:$0xff]  ;;  %v542_v46 = vsel %vm245_vm0, %v536_v38, %v11702_v2  ;;  %v1498_v48 = vld [vmem:[#allocation8 + $0x2c0] sm:$0xff]  ;;  %v9193_v53 = vcombine.high %v1490_v37, %v1494_v42  ;;  %v9192_v62 = vcombine.low %v1490_v37, %v1494_v42  ;;  %v9046_v27 = vld [vmem:[%s12909_s12 + $0xd8] sm:$0xff]  }
  0xd4   :  { %3592 = vmatprep.subr.bf16.mxu0 %v9161_v59  ;;  %3931 = vmatprep.subr.bf16.mxu1 %v9163_v63  ;;  %v1502_v49 = vld [vmem:[#allocation8 + $0x2e0] sm:$0xff]  ;;  %v9826_v51 = vpack.c.bf16 %v9825_v39, %v542_v46  ;;  %v9195_v55 = vcombine.high %v1491_v44, %v1495_v45  ;;  %v1499_v57 = vld [vmem:[#allocation8 + $0x2c8] sm:$0xff]  ;;  %v9194_v63 = vcombine.low %v1491_v44, %v1495_v45  ;;  %v980_v30 = vunpack.c.l.bf16 %v9046_v27 }
  0xd5   :  { %3612 = vmatprep.mubr.bf16.mxu0 %v10796_v43  ;;  %3951 = vmatprep.mubr.bf16.mxu1 %v10796_v43  ;;  %v9026_v56 = vld [vmem:[%s12909_s12 + $0x88] sm:$0xff]   ;;  %v9201_v0 = vcombine.high %v1498_v48, %v1502_v49  ;;  %v11885_v9 = vld [vmem:[%s12909_s12 + $0xa0] sm:$0xff]  }
  0xd6   :  { %9827 = vst [vmem:[#allocation26 + $0x60] sm:$0xff] %v9826_v51   ;;  %v1503_v58 = vld [vmem:[#allocation8 + $0x2e8] sm:$0xff]  ;;  %v684_v59 = vunpack.c.l.bf16 %v9026_v56  ;;  %v9845_v60 = vunpack.c.h.bf16 %v9026_v56  ;;  %v1506_v1 = vld [vmem:[#allocation8 + $0x300] sm:$0xff]  ;;  %v986_v40 = vsel %vm245_vm0, %v980_v30, %v11702_v2 }
  0xd7   :  { %3593 = vmatpush1.bf16.msra.mxu0 %v9160_v6  ;;  %3932 = vmatpush1.bf16.msra.mxu1 %v9162_v10  ;;  %v1510_v3 = vld [vmem:[#allocation8 + $0x320] sm:$0xff]  ;;  %v1507_v4 = vld [vmem:[#allocation8 + $0x308] sm:$0xff]  ;;  %v9203_v6 = vcombine.high %v1499_v57, %v1503_v58 }
  0xd8   :  { %3594 = vmatprep.subr.bf16.mxu0 %v9169_v11  ;;  %3933 = vmatprep.subr.bf16.mxu1 %v9171_v15  ;;  %v690_v5 = vsel %vm245_vm0, %v684_v59, %v11702_v2  ;;  %v1511_v7 = vld [vmem:[#allocation8 + $0x328] sm:$0xff]  ;;  %v9200_v11 = vcombine.low %v1498_v48, %v1502_v49  ;;  %v9202_v15 = vcombine.low %v1499_v57, %v1503_v58  ;;  %v1514_v19 = vld [vmem:[#allocation8 + $0x340] sm:$0xff] }
  0xd9   :  { %v9846_v8 = vpack.c.bf16 %v9845_v60, %v690_v5  ;;  %v9036_v10 = vld [vmem:[%s12909_s12 + $0xb0] sm:$0xff]   ;;  %v9209_v17 = vcombine.high %v1506_v1, %v1510_v3  ;;  %v9211_v18 = vcombine.high %v1507_v4, %v1511_v7  ;;  %v1518_v20 = vld [vmem:[#allocation8 + $0x360] sm:$0xff]  ;;  %v9208_v25 = vcombine.low %v1506_v1, %v1510_v3 }
  0xda   :  { %v832_v12 = vunpack.c.l.bf16 %v9036_v10  ;;  %v9865_v13 = vunpack.c.h.bf16 %v9036_v10  ;;  %v9210_v28 = vcombine.low %v1507_v4, %v1511_v7  ;;  %v9217_v29 = vcombine.high %v1514_v19, %v1518_v20  ;;  %v10808_v34 = vld [vmem:[%s12909_s12 + $0xe0] sm:$0xff]   ;;  %v1523_v38 = vld [vmem:[#allocation8 + $0x388] sm:$0xff]  ;;  %v11927_v4 = vld [vmem:[%s12909_s12 + $0x118] sm:$0xff]  }
  0xdb   :  { %3595 = vmatpush1.bf16.msra.mxu0 %v9168_v21  ;;  %3934 = vmatpush1.bf16.msra.mxu1 %v9170_v22  ;;  %9847 = vst [vmem:[#allocation26 + $0x88] sm:$0xff] %v9846_v8   ;;  %v1515_v22 = vld [vmem:[#allocation8 + $0x348] sm:$0xff]  ;;  %v1526_v37 = vld [vmem:[#allocation8 + $0x3a0] sm:$0xff]  ;;  %9892 = vst [vmem:[#allocation26 + $0xe0] sm:$0xff] %v10808_v34  }
  0xdc   :  { %3596 = vmatprep.subr.bf16.mxu0 %v9177_v23  ;;  %3935 = vmatprep.subr.bf16.mxu1 %v9179_v26  ;;  %v838_v21 = vsel %vm245_vm0, %v832_v12, %v11702_v2  ;;  %v1519_v23 = vld [vmem:[#allocation8 + $0x368] sm:$0xff]  ;;  %v1530_v42 = vld [vmem:[#allocation8 + $0x3c0] sm:$0xff] }
  0xdd   :  { %v9866_v24 = vpack.c.bf16 %v9865_v13, %v838_v21  ;;  %v11899_v26 = vld [vmem:[%s12909_s12 + $0xc8] sm:$0xff]   ;;  %v9218_v45 = vcombine.low %v1515_v22, %v1519_v23  ;;  %v9056_v49 = vld [vmem:[%s12909_s12 + $0x100] sm:$0xff]   ;;  %v10812_v10 = vld [vmem:[%s12909_s12 + $0x130] sm:$0xff]  }
  0xde   :  { %v1527_v39 = vld [vmem:[#allocation8 + $0x3a8] sm:$0xff]  ;;  %v1534_v43 = vld [vmem:[#allocation8 + $0x3e0] sm:$0xff]  ;;  %9932 = vst [vmem:[#allocation26 + $0x130] sm:$0xff] %v10812_v10   ;;  %v1371_v21 = vld [vmem:[#allocation26 + $0x3c] sm:$0xff] }
  0xdf   :  { %3597 = vmatpush1.bf16.msra.mxu0 %v9176_v33  ;;  %3936 = vmatpush1.bf16.msra.mxu1 %v9178_v35  ;;  %9867 = vst [vmem:[#allocation26 + $0xb0] sm:$0xff] %v9866_v24   ;;  %v9885_v33 = vunpack.c.h.bf16 %v9046_v27  ;;  %v9219_v35 = vcombine.high %v1515_v22, %v1519_v23  ;;  %v9227_v48 = vcombine.high %v1523_v38, %v1527_v39  ;;  %v1531_v51 = vld [vmem:[#allocation8 + $0x3c8] sm:$0xff]  ;;  %v1538_v60 = vld [vmem:[#allocation8 + $0x400] sm:$0xff]  ;;  %v11618_v23 = vmov 0  }
  0xe0   :  { %3598 = vmatprep.subr.bf16.mxu0 %v9185_v36  ;;  %3937 = vmatprep.subr.bf16.mxu1 %v9187_v41  ;;  %v1522_v36 = vld [vmem:[#allocation8 + $0x380] sm:$0xff]  ;;  %v9216_v41 = vcombine.low %v1514_v19, %v1518_v20  ;;  %v9226_v58 = vcombine.low %v1523_v38, %v1527_v39  ;;  %v9233_v59 = vcombine.high %v1530_v42, %v1534_v43  ;;  %v1543_v1 = vld [vmem:[#allocation8 + $0x428] sm:$0xff] }
  0xe1   :  { %v9886_v44 = vpack.c.bf16 %v9885_v33, %v986_v40  ;;  %v9225_v46 = vcombine.high %v1522_v36, %v1526_v37  ;;  %v10810_v56 = vld [vmem:[%s12909_s12 + $0x108] sm:$0xff]   ;;  %v9224_v57 = vcombine.low %v1522_v36, %v1526_v37  ;;  %10793 = vset.pattern.permute.xlu1 %v11618_v23  ;;  %v9000_v27 = vld [vmem:[%s12909_s12 + $0x20] sm:$0xf]  ;;  %v11953_v36 = vld [vmem:[%s12909_s12 + $0x30] sm:$0xff]  }
  0xe2   :  { %v1542_v61 = vld [vmem:[#allocation8 + $0x420] sm:$0xff]  ;;  %9912 = vst [vmem:[#allocation26 + $0x108] sm:$0xff] %v10810_v56   ;;  %v10798_v20 = vld [vmem:[#allocation26] ss:$20 sps:$4 sm:$0xff]   ;;  %302 = vst [vmem:[#allocation26 + $0x20] sm:$0xf] %v9000_v27 }
  0xe3   :  { %3599 = vmatpush1.bf16.msra.mxu0 %v9184_v47  ;;  %3938 = vmatpush1.bf16.msra.mxu1 %v9186_v52  ;;  %v11913_v47 = vld [vmem:[%s12909_s12 + $0xf0] sm:$0xff]   ;;  %9887 = vst [vmem:[#allocation26 + $0xd8] sm:$0xff] %v9886_v44   ;;  %v9066_v5 = vld [vmem:[%s12909_s12 + $0x128] sm:$0xff]   ;;  %v9241_v12 = vcombine.high %v1538_v60, %v1542_v61  ;;  %v9240_v24 = vcombine.low %v1538_v60, %v1542_v61  ;;  %v9030_v56 = vld [vmem:[%s12909_s12 + $0x98] sm:$0xf] }
  0xe4   :  { %3600 = vmatprep.subr.bf16.mxu0 %v9193_v53  ;;  %3939 = vmatprep.subr.bf16.mxu1 %v9195_v55  ;;  %v1535_v52 = vld [vmem:[#allocation8 + $0x3e8] sm:$0xff]  ;;  %v1128_v53 = vunpack.c.l.bf16 %v9056_v49  ;;  %v9905_v55 = vunpack.c.h.bf16 %v9056_v49  ;;  %v1276_v7 = vunpack.c.l.bf16 %v9066_v5  ;;  %v9925_v8 = vunpack.c.h.bf16 %v9066_v5  ;;  %v1546_v13 = vld [vmem:[#allocation8 + $0x440] sm:$0xff]  ;;  %746 = vst [vmem:[#allocation26 + $0x98] sm:$0xf] %v9030_v56 }
  0xe5   :  { %v1554_v30 = vld [vmem:[#allocation8 + $0x480] sm:$0xff]  ;;  %v1555_v38 = vld [vmem:[#allocation8 + $0x488] sm:$0xff] }
  0xe6   :  { %v1282_v19 = vsel %vm245_vm0, %v1276_v7, %v11702_v2  ;;  %v1558_v33 = vld [vmem:[#allocation8 + $0x4a0] sm:$0xff]  ;;  %v1559_v39 = vld [vmem:[#allocation8 + $0x4a8] sm:$0xff] }
  0xe7   :  { %3601 = vmatpush1.bf16.msra.mxu0 %v9192_v62  ;;  %3940 = vmatpush1.bf16.msra.mxu1 %v9194_v63  ;;  %v1539_v62 = vld [vmem:[#allocation8 + $0x408] sm:$0xff]  ;;  %v1134_v63 = vsel %vm245_vm0, %v1128_v53, %v11702_v2  ;;  %v9926_v22 = vpack.c.bf16 %v9925_v8, %v1282_v19  ;;  %v9257_v44 = vcombine.high %v1554_v30, %v1558_v33  ;;  %v1658_v50 = vld [vmem:[#allocation8 + $0x7c0] sm:$0xff] }
  0xe8   :  { %3602 = vmatprep.subr.bf16.mxu0 %v9201_v0  ;;  %3941 = vmatprep.subr.bf16.mxu1 %v9203_v6  ;;  %v9235_v0 = vcombine.high %v1531_v51, %v1535_v52  ;;  %v9906_v3 = vpack.c.bf16 %v9905_v55, %v1134_v63  ;;  %v9232_v6 = vcombine.low %v1530_v42, %v1534_v43  ;;  %v9010_v37 = vld [vmem:[%s12909_s12 + $0x48] sm:$0xf]  ;;  %v11961_v42 = vld [vmem:[%s12909_s12 + $0x58] sm:$0xff]   ;;  %v11995_v8 = vld [vmem:[%s12909_s12 + $0xd0] sm:$0xff]  }
  0xe9   :  { %v9243_v14 = vcombine.high %v1539_v62, %v1543_v1  ;;  %9927 = vst [vmem:[#allocation26 + $0x128] sm:$0xff] %v9926_v22   ;;  %450 = vst [vmem:[#allocation26 + $0x48] sm:$0xf] %v9010_v37  ;;  %v9259_v49 = vcombine.high %v1555_v38, %v1559_v39  ;;  %v1567_v53 = vld [vmem:[#allocation8 + $0x4e8] sm:$0xff]  ;;  %v1377_v55 = vld [vmem:[#allocation26 + $0x64] sm:$0xff] }
  0xea   :  { %9907 = vst [vmem:[#allocation26 + $0x100] sm:$0xff] %v9906_v3   ;;  %v11982_v60 = vld [vmem:[%s12909_s12 + $0xa8] sm:$0xff]   ;;  %v12008_v22 = vld [vmem:[%s12909_s12 + $0xf8] sm:$0xff]   ;;  %v12021_v37 = vld [vmem:[%s12909_s12 + $0x120] sm:$0xff]  }
  0xeb   :  { %3603 = vmatpush1.bf16.msra.mxu0 %v9200_v11  ;;  %3942 = vmatpush1.bf16.msra.mxu1 %v9202_v15  ;;  %v9234_v11 = vcombine.low %v1531_v51, %v1535_v52  ;;  %v1550_v15 = vld [vmem:[#allocation8 + $0x460] sm:$0xff]  ;;  %v11974_v52 = vcombine.low %v11843_v16, %v1371_v21  ;;  %v1575_v3 = vld [vmem:[#allocation8 + $0x528] sm:$0xff] }
  0xec   :  { %3604 = vmatprep.subr.bf16.mxu0 %v9209_v17  ;;  %3943 = vmatprep.subr.bf16.mxu1 %v9211_v18  ;;  %v1547_v17 = vld [vmem:[#allocation8 + $0x448] sm:$0xff]  ;;  %v9248_v40 = vcombine.low %v1546_v13, %v1550_v15  ;;  %v11970_v51 = vld [vmem:[%s12909_s12 + $0x80] sm:$0xff]  }
  0xed   :  { %v1551_v18 = vld [vmem:[#allocation8 + $0x468] sm:$0xff]  ;;  %v1570_v63 = vld [vmem:[#allocation8 + $0x500] sm:$0xff] }
  0xee   :  { %v9251_v34 = vcombine.high %v1547_v17, %v1551_v18  ;;  %v9250_v43 = vcombine.low %v1547_v17, %v1551_v18  ;;  %v9050_v10 = vld [vmem:[%s12909_s12 + $0xe8] sm:$0xf] }
  0xef   :  { %3605 = vmatpush1.bf16.msra.mxu0 %v9208_v25  ;;  %3944 = vmatpush1.bf16.msra.mxu1 %v9210_v28  ;;  %v11942_v25 = vld [vmem:[%s12909_s12 + $0x8] sm:$0xff]   ;;  %v9242_v28 = vcombine.low %v1539_v62, %v1543_v1  ;;  %v11988_v62 = vcombine.high %v11857_v31, %v1377_v55  ;;  %1042 = vst [vmem:[#allocation26 + $0xe8] sm:$0xf] %v9050_v10 }
  0xf0   :  { %3606 = vmatprep.subr.bf16.mxu0 %v9217_v29  ;;  %3945 = vmatprep.subr.bf16.mxu1 %v9219_v35  ;;  %v9249_v29 = vcombine.high %v1546_v13, %v1550_v15  ;;  %v11948_v35 = vcombine.high %v11843_v16, %v1371_v21  ;;  %v9040_v16 = vld [vmem:[%s12909_s12 + $0xc0] sm:$0xf]  ;;  %v1571_v1 = vld [vmem:[#allocation8 + $0x508] sm:$0xff] }
  0xf1   :  { %894 = vst [vmem:[#allocation26 + $0xc0] sm:$0xf] %v9040_v16  ;;  %v1582_v13 = vld [vmem:[#allocation8 + $0x560] sm:$0xff]  ;;  %v1579_v15 = vld [vmem:[#allocation8 + $0x548] sm:$0xff] }
  0xf2   :  { %v1583_v17 = vld [vmem:[#allocation8 + $0x568] sm:$0xff]  ;;  %v1383_v18 = vld [vmem:[#allocation26 + $0x8c] sm:$0xff] }
  0xf3   :  { %3607 = vmatpush1.bf16.msra.mxu0 %v9216_v41  ;;  %3946 = vmatpush1.bf16.msra.mxu1 %v9218_v45  ;;  %v1562_v41 = vld [vmem:[#allocation8 + $0x4c0] sm:$0xff]  ;;  %v12014_v27 = vcombine.high %v11871_v54, %v1383_v18 }
  0xf4   :  { %3608 = vmatprep.subr.bf16.mxu0 %v9225_v46  ;;  %3947 = vmatprep.subr.bf16.mxu1 %v9227_v48  ;;  %v1566_v45 = vld [vmem:[#allocation8 + $0x4e0] sm:$0xff]  ;;  %v1563_v46 = vld [vmem:[#allocation8 + $0x4c8] sm:$0xff] }
  0xf5   :  { %v9020_v48 = vld [vmem:[%s12909_s12 + $0x70] sm:$0xf]  ;;  %v9267_v61 = vcombine.high %v1563_v46, %v1567_v53  ;;  %v9264_v5 = vcombine.low %v1562_v41, %v1566_v45 }
  0xf6   :  { %598 = vst [vmem:[#allocation26 + $0x70] sm:$0xf] %v9020_v48  ;;  %v1599_v48 = vld [vmem:[#allocation8 + $0x5e8] sm:$0xff] }
  0xf7   :  { %3609 = vmatpush1.bf16.msra.mxu0 %v9224_v57  ;;  %3948 = vmatpush1.bf16.msra.mxu1 %v9226_v58  ;;  %v9256_v57 = vcombine.low %v1554_v30, %v1558_v33  ;;  %v9258_v58 = vcombine.low %v1555_v38, %v1559_v39  ;;  %v1587_v30 = vld [vmem:[#allocation8 + $0x588] sm:$0xff]  ;;  %v9282_v38 = vcombine.low %v1579_v15, %v1583_v17 }
  0xf8   :  { %3610 = vmatprep.subr.bf16.mxu0 %v9233_v59  ;;  %3949 = vmatprep.subr.bf16.mxu1 %v9235_v0  ;;  %v9265_v59 = vcombine.high %v1562_v41, %v1566_v45  ;;  %v1574_v0 = vld [vmem:[#allocation8 + $0x520] sm:$0xff]  ;;  %v1591_v33 = vld [vmem:[#allocation8 + $0x5a8] sm:$0xff] }
  0xf9   :  { %v9273_v7 = vcombine.high %v1570_v63, %v1574_v0  ;;  %v9272_v19 = vcombine.low %v1570_v63, %v1574_v0  ;;  %v9291_v41 = vcombine.high %v1587_v30, %v1591_v33  ;;  %v1595_v45 = vld [vmem:[#allocation8 + $0x5c8] sm:$0xff]  ;;  %v1606_v63 = vld [vmem:[#allocation8 + $0x620] sm:$0xff] }
  0xfa   :  { %v9299_v16 = vcombine.high %v1595_v45, %v1599_v48 }
  0xfb   :  { %3611 = vmatpush1.bf16.msra.mxu0 %v9232_v6  ;;  %3950 = vmatpush1.bf16.msra.mxu1 %v9234_v11  ;;  %v9266_v6 = vcombine.low %v1563_v46, %v1567_v53  ;;  %v9275_v11 = vcombine.high %v1571_v1, %v1575_v3  ;;  %v12029_v46 = vcombine.low %v11871_v54, %v1383_v18  ;;  %v9001_v53 = vld [vmem:[%s12909_s12 + $0x24] ss:$40 sps:$4 sm:$0xff]  }
  0xfc   :  { %3693 = vmatprep.subr.bf16.mxu0 %v9241_v12  ;;  %4032 = vmatprep.subr.bf16.mxu1 %v9243_v14  ;;  %v1578_v12 = vld [vmem:[#allocation8 + $0x540] sm:$0xff]  ;;  %v12003_v14 = vcombine.low %v11857_v31, %v1377_v55  ;;  %v9283_v31 = vcombine.high %v1579_v15, %v1583_v17  ;;  %v314_v56 = vunpack.c.l.bf16 %v9001_v53 }
  0xfd   :  { %v9281_v21 = vcombine.high %v1578_v12, %v1582_v13  ;;  %v1602_v54 = vld [vmem:[#allocation8 + $0x600] sm:$0xff] }
  0xfe   :  { %3613 = vmatmul.mubr.bf16.vlgmr.msra.gmra.mrb[0].mxu0 %v10798_v20  ;;  %3952 = vmatmul.mubr.bf16.vlgmr.msra.gmra.mrb[0].mxu1 %v10798_v20  ;;  %v9274_v20 = vcombine.low %v1571_v1, %v1575_v3  ;;  %v320_v0 = vsel %vm245_vm0, %v314_v56, %v11702_v2  ;;  %v1603_v1 = vld [vmem:[#allocation8 + $0x608] sm:$0xff]  ;;  %v1614_v18 = vld [vmem:[#allocation8 + $0x660] sm:$0xff] }
  0xff   :  { %3694 = vmatpush1.bf16.msra.mxu0 %v9240_v24  ;;  %4033 = vmatpush1.bf16.msra.mxu1 %v9242_v28  ;;  %v9060_v24 = vld [vmem:[%s12909_s12 + $0x110] sm:$0xf]  ;;  %v1586_v28 = vld [vmem:[#allocation8 + $0x580] sm:$0xff] }
 0x100   :  { %3695 = vmatprep.subr.bf16.mxu0 %v9249_v29  ;;  %4034 = vmatprep.subr.bf16.mxu1 %v9251_v34  ;;  %v1590_v29 = vld [vmem:[#allocation8 + $0x5a0] sm:$0xff]  ;;  %1190 = vst [vmem:[#allocation26 + $0x110] sm:$0xf] %v9060_v24  ;;  %v9280_v34 = vcombine.low %v1578_v12, %v1582_v13  ;;  %v1607_v3 = vld [vmem:[#allocation8 + $0x628] sm:$0xff]  ;;  %v9305_v12 = vcombine.high %v1602_v54, %v1606_v63 }
 0x101   :  { %3622 = vmatprep.mubr.bf16.mxu0 %v11948_v35  ;;  %3961 = vmatprep.mubr.bf16.mxu1 %v11948_v35  ;;  %v9289_v39 = vcombine.high %v1586_v28, %v1590_v29  ;;  %v9288_v55 = vcombine.low %v1586_v28, %v1590_v29  ;;  %v1610_v13 = vld [vmem:[#allocation8 + $0x640] sm:$0xff]  ;;  %v9307_v17 = vcombine.high %v1603_v1, %v1607_v3  ;;  %v1615_v24 = vld [vmem:[#allocation8 + $0x668] sm:$0xff] }
 0x102   :  { %v9304_v28 = vcombine.low %v1602_v54, %v1606_v63 }
 0x103   :  { %3696 = vmatpush1.bf16.msra.mxu0 %v9248_v40  ;;  %4035 = vmatpush1.bf16.msra.mxu1 %v9250_v43  ;;  %v9070_v40 = vld [vmem:[%s12909_s12 + $0x138] sm:$0xf]  ;;  %v1594_v43 = vld [vmem:[#allocation8 + $0x5c0] sm:$0xff] }
 0x104   :  { %3697 = vmatprep.subr.bf16.mxu0 %v9257_v44  ;;  %4036 = vmatprep.subr.bf16.mxu1 %v9259_v49  ;;  %v1598_v44 = vld [vmem:[#allocation8 + $0x5e0] sm:$0xff]  ;;  %1338 = vst [vmem:[#allocation26 + $0x138] sm:$0xf] %v9070_v40  ;;  %v1389_v49 = vld [vmem:[#allocation26 + $0xb4] sm:$0xff] }
 0x105   :  { %v1618_v40 = vld [vmem:[#allocation8 + $0x680] sm:$0xff] }
 0x106   :  { %3623 = vmatmul.mubr.bf16.gmra.mrb[4].mxu0 %v11974_v52  ;;  %3962 = vmatmul.mubr.bf16.gmra.mrb[4].mxu1 %v11974_v52 }
 0x107   :  { %3698 = vmatpush1.bf16.msra.mxu0 %v9256_v57  ;;  %4037 = vmatpush1.bf16.msra.mxu1 %v9258_v58  ;;  %v462_v57 = vunpack.c.h.bf16 %v9001_v53  ;;  %v9290_v58 = vcombine.low %v1587_v30, %v1591_v33  ;;  %v9306_v30 = vcombine.low %v1603_v1, %v1607_v3  ;;  %v9313_v33 = vcombine.high %v1610_v13, %v1614_v18  ;;  %v1627_v1 = vld [vmem:[#allocation8 + $0x6c8] sm:$0xff] }
 0x108   :  { %3699 = vmatprep.subr.bf16.mxu0 %v9265_v59  ;;  %4038 = vmatprep.subr.bf16.mxu1 %v9267_v61  ;;  %v9297_v59 = vcombine.high %v1594_v43, %v1598_v44  ;;  %v12035_v61 = vcombine.high %v11885_v9, %v1389_v49  ;;  %v1631_v3 = vld [vmem:[#allocation8 + $0x6e8] sm:$0xff] }
 0x109   :  { %3632 = vmatprep.mubr.bf16.mxu0 %v11988_v62  ;;  %3971 = vmatprep.mubr.bf16.mxu1 %v11988_v62  ;;  %v468_v10 = vsel %vm245_vm0, %v462_v57, %v11702_v2  ;;  %v1626_v57 = vld [vmem:[#allocation8 + $0x6c0] sm:$0xff] }
 0x10b   :  { %3700 = vmatpush1.bf16.msra.mxu0 %v9264_v5  ;;  %4039 = vmatpush1.bf16.msra.mxu1 %v9266_v6  ;;  %v11619_v5 = vmov 0.0  }
 0x10c   :  { %3701 = vmatprep.subr.bf16.mxu0 %v9273_v7  ;;  %4040 = vmatprep.subr.bf16.mxu1 %v9275_v11  ;;  %v322_v6 = vpack.c.bf16 %v11619_v5, %v320_v0  ;;  %v9296_v7 = vcombine.low %v1594_v43, %v1598_v44  ;;  %v9298_v11 = vcombine.low %v1595_v45, %v1599_v48  ;;  %v1619_v43 = vld [vmem:[#allocation8 + $0x688] sm:$0xff] }
 0x10d   :  { %v470_v15 = vpack.c.bf16 %v11619_v5, %v468_v10  ;;  %v1623_v44 = vld [vmem:[#allocation8 + $0x6a8] sm:$0xff] }
 0x10e   :  { %3633 = vmatmul.mubr.bf16.gmra.mrb[8].mxu0 %v12003_v14  ;;  %3972 = vmatmul.mubr.bf16.gmra.mrb[8].mxu1 %v12003_v14  ;;  %324 = vst [vmem:[#allocation26 + $0x24] sm:$0xf] %v322_v6  ;;  %v1401_v6 = vld [vmem:[#allocation26 + $0x104] sm:$0xff] }
 0x10f   :  { %3702 = vmatpush1.bf16.msra.mxu0 %v9272_v19  ;;  %4041 = vmatpush1.bf16.msra.mxu1 %v9274_v20  ;;  %v1611_v19 = vld [vmem:[#allocation8 + $0x648] sm:$0xff]  ;;  %v9021_v20 = vld [vmem:[%s12909_s12 + $0x74] ss:$40 sps:$4 sm:$0xff]   ;;  %472 = vst [vmem:[#allocation26 + $0x4c] sm:$0xf] %v470_v15  ;;  %v9331_v15 = vcombine.high %v1627_v1, %v1631_v3 }
 0x110   :  { %3703 = vmatprep.subr.bf16.mxu0 %v9281_v21  ;;  %4042 = vmatprep.subr.bf16.mxu1 %v9283_v31  ;;  %v12053_v21 = vcombine.low %v11885_v9, %v1389_v49  ;;  %v1395_v31 = vld [vmem:[#allocation26 + $0xdc] sm:$0xff]  ;;  %v610_v29 = vunpack.c.l.bf16 %v9021_v20  ;;  %v9312_v49 = vcombine.low %v1610_v13, %v1614_v18  ;;  %v1634_v18 = vld [vmem:[#allocation8 + $0x700] sm:$0xff] }
 0x111   :  { %3642 = vmatprep.mubr.bf16.mxu0 %v12014_v27  ;;  %3981 = vmatprep.mubr.bf16.mxu1 %v12014_v27  ;;  %v12074_v0 = vcombine.low %v11899_v26, %v1395_v31 }
 0x112   :  { %v616_v9 = vsel %vm245_vm0, %v610_v29, %v11702_v2 }
 0x113   :  { %3704 = vmatpush1.bf16.msra.mxu0 %v9280_v34  ;;  %4043 = vmatpush1.bf16.msra.mxu1 %v9282_v38  ;;  %v758_v34 = vunpack.c.h.bf16 %v9021_v20  ;;  %v9315_v38 = vcombine.high %v1611_v19, %v1615_v24  ;;  %v618_v45 = vpack.c.bf16 %v11619_v5, %v616_v9  ;;  %v1635_v20 = vld [vmem:[#allocation8 + $0x708] sm:$0xff] }
 0x114   :  { %3705 = vmatprep.subr.bf16.mxu0 %v9289_v39  ;;  %4044 = vmatprep.subr.bf16.mxu1 %v9291_v41  ;;  %v12056_v39 = vcombine.high %v11899_v26, %v1395_v31  ;;  %v1622_v41 = vld [vmem:[#allocation8 + $0x6a0] sm:$0xff]  ;;  %v1643_v9 = vld [vmem:[#allocation8 + $0x748] sm:$0xff] }
 0x115   :  { %v764_v48 = vsel %vm245_vm0, %v758_v34, %v11702_v2  ;;  %v9321_v56 = vcombine.high %v1618_v40, %v1622_v41  ;;  %620 = vst [vmem:[#allocation26 + $0x74] sm:$0xf] %v618_v45 }
 0x116   :  { %3643 = vmatmul.mubr.bf16.gmra.mrb[12].mxu0 %v12029_v46  ;;  %3982 = vmatmul.mubr.bf16.gmra.mrb[12].mxu1 %v12029_v46  ;;  %v766_v53 = vpack.c.bf16 %v11619_v5, %v764_v48 }
 0x117   :  { %3706 = vmatpush1.bf16.msra.mxu0 %v9288_v55  ;;  %4045 = vmatpush1.bf16.msra.mxu1 %v9290_v58  ;;  %v9314_v55 = vcombine.low %v1611_v19, %v1615_v24  ;;  %v9041_v58 = vld [vmem:[%s12909_s12 + $0xc4] ss:$40 sps:$4 sm:$0xff]  }
 0x118   :  { %3707 = vmatprep.subr.bf16.mxu0 %v9297_v59  ;;  %4046 = vmatprep.subr.bf16.mxu1 %v9299_v16  ;;  %v9323_v59 = vcombine.high %v1619_v43, %v1623_v44  ;;  %v1630_v16 = vld [vmem:[#allocation8 + $0x6e0] sm:$0xff]  ;;  %768 = vst [vmem:[#allocation26 + $0x9c] sm:$0xf] %v766_v53  ;;  %v906_v54 = vunpack.c.l.bf16 %v9041_v58  ;;  %v1054_v63 = vunpack.c.h.bf16 %v9041_v58  ;;  %v1639_v24 = vld [vmem:[#allocation8 + $0x728] sm:$0xff] }
 0x119   :  { %3652 = vmatprep.mubr.bf16.mxu0 %v12035_v61  ;;  %3991 = vmatprep.mubr.bf16.mxu1 %v12035_v61  ;;  %v9329_v13 = vcombine.high %v1626_v57, %v1630_v16  ;;  %v1638_v19 = vld [vmem:[#allocation8 + $0x720] sm:$0xff]  ;;  %v9328_v29 = vcombine.low %v1626_v57, %v1630_v16  ;;  %v9338_v57 = vcombine.low %v1635_v20, %v1639_v24 }
 0x11a   :  { %v912_v10 = vsel %vm245_vm0, %v906_v54, %v11702_v2  ;;  %v9337_v34 = vcombine.high %v1634_v18, %v1638_v19  ;;  %v9336_v53 = vcombine.low %v1634_v18, %v1638_v19  ;;  %v1654_v16 = vld [vmem:[#allocation8 + $0x7a0] sm:$0xff] }
 0x11b   :  { %3708 = vmatpush1.bf16.msra.mxu0 %v9296_v7  ;;  %4047 = vmatpush1.bf16.msra.mxu1 %v9298_v11  ;;  %v9320_v7 = vcombine.low %v1618_v40, %v1622_v41  ;;  %v1060_v11 = vsel %vm245_vm0, %v1054_v63, %v11702_v2  ;;  %v914_v26 = vpack.c.bf16 %v11619_v5, %v912_v10  ;;  %v1646_v40 = vld [vmem:[#allocation8 + $0x760] sm:$0xff]  ;;  %v1659_v10 = vld [vmem:[#allocation8 + $0x7c8] sm:$0xff] }
 0x11c   :  { %3709 = vmatprep.subr.bf16.mxu0 %v9305_v12  ;;  %4048 = vmatprep.subr.bf16.mxu1 %v9307_v17  ;;  %v9322_v12 = vcombine.low %v1619_v43, %v1623_v44  ;;  %v12084_v17 = vcombine.high %v11913_v47, %v1401_v6  ;;  %v1062_v31 = vpack.c.bf16 %v11619_v5, %v1060_v11  ;;  %v1647_v43 = vld [vmem:[#allocation8 + $0x768] sm:$0xff]  ;;  %v1407_v44 = vld [vmem:[#allocation26 + $0x12c] sm:$0xff] }
 0x11d   :  { %916 = vst [vmem:[#allocation26 + $0xc4] sm:$0xf] %v914_v26  ;;  %v9339_v41 = vcombine.high %v1635_v20, %v1639_v24  ;;  %v9347_v63 = vcombine.high %v1643_v9, %v1647_v43  ;;  %v1663_v11 = vld [vmem:[#allocation8 + $0x7e8] sm:$0xff]  ;;  %v12113_v26 = vcombine.low %v11927_v4, %v1407_v44 }
 0x11e   :  { %3653 = vmatmul.mubr.bf16.gmra.mrb[16].mxu0 %v12053_v21  ;;  %3992 = vmatmul.mubr.bf16.gmra.mrb[16].mxu1 %v12053_v21  ;;  %1064 = vst [vmem:[#allocation26 + $0xec] sm:$0xf] %v1062_v31  ;;  %v9363_v20 = vcombine.high %v1659_v10, %v1663_v11  ;;  %v1666_v31 = vld [vmem:[#allocation8 + $0x800] sm:$0xff] }
 0x11f   :  { %3710 = vmatpush1.bf16.msra.mxu0 %v9304_v28  ;;  %4049 = vmatpush1.bf16.msra.mxu1 %v9306_v30  ;;  %v9061_v28 = vld [vmem:[%s12909_s12 + $0x114] ss:$40 sps:$4 sm:$0xff]  }
 0x120   :  { %3711 = vmatprep.subr.bf16.mxu0 %v9313_v33  ;;  %4050 = vmatprep.subr.bf16.mxu1 %v9315_v38  ;;  %v1202_v30 = vunpack.c.l.bf16 %v9061_v28  ;;  %v9330_v33 = vcombine.low %v1627_v1, %v1631_v3  ;;  %v1642_v38 = vld [vmem:[#allocation8 + $0x740] sm:$0xff]  ;;  %v1350_v48 = vunpack.c.h.bf16 %v9061_v28  ;;  %v1651_v1 = vld [vmem:[#allocation8 + $0x788] sm:$0xff] }
 0x121   :  { %3662 = vmatprep.mubr.bf16.mxu0 %v12056_v39  ;;  %4001 = vmatprep.mubr.bf16.mxu1 %v12056_v39  ;;  %v9345_v58 = vcombine.high %v1642_v38, %v1646_v40  ;;  %v1655_v3 = vld [vmem:[#allocation8 + $0x7a8] sm:$0xff]  ;;  %v1670_v28 = vld [vmem:[#allocation8 + $0x820] sm:$0xff] }
 0x122   :  { %v1208_v45 = vsel %vm245_vm0, %v1202_v30, %v11702_v2  ;;  %v9354_v18 = vcombine.low %v1651_v1, %v1655_v3  ;;  %v1671_v30 = vld [vmem:[#allocation8 + $0x828] sm:$0xff] }
 0x123   :  { %3712 = vmatpush1.bf16.msra.mxu0 %v9312_v49  ;;  %4051 = vmatpush1.bf16.msra.mxu1 %v9314_v55  ;;  %v12098_v49 = vcombine.low %v11913_v47, %v1401_v6  ;;  %v1210_v55 = vpack.c.bf16 %v11619_v5, %v1208_v45  ;;  %v12106_v47 = vcombine.high %v11927_v4, %v1407_v44  ;;  %v1679_v44 = vld [vmem:[#allocation8 + $0x868] sm:$0xff] }
 0x124   :  { %3713 = vmatprep.subr.bf16.mxu0 %v9321_v56  ;;  %4052 = vmatprep.subr.bf16.mxu1 %v9323_v59  ;;  %v1356_v56 = vsel %vm245_vm0, %v1350_v48, %v11702_v2  ;;  %v1650_v59 = vld [vmem:[#allocation8 + $0x780] sm:$0xff]  ;;  %v9344_v2 = vcombine.low %v1642_v38, %v1646_v40  ;;  %v9346_v6 = vcombine.low %v1643_v9, %v1647_v43  ;;  %v1372_v38 = vld [vmem:[#allocation26 + $0x44] sm:$0xff]  ;;  %v1675_v43 = vld [vmem:[#allocation8 + $0x848] sm:$0xff] }
 0x125   :  { %v1358_v54 = vpack.c.bf16 %v11619_v5, %v1356_v56  ;;  %1212 = vst [vmem:[#allocation26 + $0x114] sm:$0xf] %v1210_v55  ;;  %v9353_v5 = vcombine.high %v1650_v59, %v1654_v16  ;;  %v1674_v40 = vld [vmem:[#allocation8 + $0x840] sm:$0xff]  ;;  %v9368_v48 = vcombine.low %v1666_v31, %v1670_v28 }
 0x126   :  { %3663 = vmatmul.mubr.bf16.gmra.mrb[20].mxu0 %v12074_v0  ;;  %4002 = vmatmul.mubr.bf16.gmra.mrb[20].mxu1 %v12074_v0  ;;  %v1682_v55 = vld [vmem:[#allocation8 + $0x880] sm:$0xff] }
 0x127   :  { %3714 = vmatpush1.bf16.msra.mxu0 %v9320_v7  ;;  %4053 = vmatpush1.bf16.msra.mxu1 %v9322_v12  ;;  %1360 = vst [vmem:[#allocation26 + $0x13c] sm:$0xf] %v1358_v54  ;;  %v1662_v7 = vld [vmem:[#allocation8 + $0x7e0] sm:$0xff]  ;;  %v9355_v12 = vcombine.high %v1651_v1, %v1655_v3 }
 0x128   :  { %3715 = vmatprep.subr.bf16.mxu0 %v9329_v13  ;;  %4054 = vmatprep.subr.bf16.mxu1 %v9331_v15  ;;  %v1366_v13 = vld [vmem:[#allocation26 + $0x1c] sm:$0xff]  ;;  %v9352_v15 = vcombine.low %v1650_v59, %v1654_v16  ;;  %v9361_v19 = vcombine.high %v1658_v50, %v1662_v7  ;;  %v9360_v4 = vcombine.low %v1658_v50, %v1662_v7  ;;  %v1686_v56 = vld [vmem:[#allocation8 + $0x8a0] sm:$0xff]  ;;  %v1683_v59 = vld [vmem:[#allocation8 + $0x888] sm:$0xff] }
 0x129   :  { %3672 = vmatprep.mubr.bf16.mxu0 %v12084_v17  ;;  %4011 = vmatprep.mubr.bf16.mxu1 %v12084_v17  ;;  %v12116_v24 = vcombine.high %v11942_v25, %v1366_v13  ;;  %v12122_v45 = vcombine.low %v11942_v25, %v1366_v13  ;;  %v1687_v16 = vld [vmem:[#allocation8 + $0x8a8] sm:$0xff]  ;;  %v9379_v25 = vcombine.high %v1675_v43, %v1679_v44  ;;  %v1690_v3 = vld [vmem:[#allocation8 + $0x8c0] sm:$0xff] }
 0x12a   :  { %v9385_v1 = vcombine.high %v1682_v55, %v1686_v56  ;;  %v9378_v50 = vcombine.low %v1675_v43, %v1679_v44  ;;  %v12133_v7 = vcombine.low %v11953_v36, %v1372_v38  ;;  %v1698_v13 = vld [vmem:[#allocation8 + $0x900] sm:$0xff] }
 0x12b   :  { %3716 = vmatpush1.bf16.msra.mxu0 %v9328_v29  ;;  %4055 = vmatpush1.bf16.msra.mxu1 %v9330_v33  ;;  %v1667_v29 = vld [vmem:[#allocation8 + $0x808] sm:$0xff]  ;;  %v9362_v33 = vcombine.low %v1659_v10, %v1663_v11  ;;  %v9387_v10 = vcombine.high %v1683_v59, %v1687_v16 }
 0x12c   :  { %3717 = vmatprep.subr.bf16.mxu0 %v9337_v34  ;;  %4056 = vmatprep.subr.bf16.mxu1 %v9339_v41  ;;  %v9369_v34 = vcombine.high %v1666_v31, %v1670_v28  ;;  %v1678_v41 = vld [vmem:[#allocation8 + $0x860] sm:$0xff]  ;;  %v9371_v9 = vcombine.high %v1667_v29, %v1671_v30  ;;  %v1703_v31 = vld [vmem:[#allocation8 + $0x928] sm:$0xff] }
 0x12d   :  { %v9376_v54 = vcombine.low %v1674_v40, %v1678_v41  ;;  %v1384_v28 = vld [vmem:[#allocation26 + $0x94] sm:$0xff] }
 0x12e   :  { %3673 = vmatmul.mubr.bf16.gmra.mrb[24].mxu0 %v12098_v49  ;;  %4012 = vmatmul.mubr.bf16.gmra.mrb[24].mxu1 %v12098_v49  ;;  %v12146_v43 = vcombine.high %v11970_v51, %v1384_v28 }
 0x12f   :  { %3718 = vmatpush1.bf16.msra.mxu0 %v9336_v53  ;;  %4057 = vmatpush1.bf16.msra.mxu1 %v9338_v57  ;;  %v12126_v53 = vcombine.high %v11953_v36, %v1372_v38  ;;  %v9377_v57 = vcombine.high %v1674_v40, %v1678_v41  ;;  %v1707_v38 = vld [vmem:[#allocation8 + $0x948] sm:$0xff] }
 0x130   :  { %3719 = vmatprep.subr.bf16.mxu0 %v9345_v58  ;;  %4058 = vmatprep.subr.bf16.mxu1 %v9347_v63  ;;  %v9370_v58 = vcombine.low %v1667_v29, %v1671_v30  ;;  %v1378_v63 = vld [vmem:[#allocation26 + $0x6c] sm:$0xff]  ;;  %v1711_v40 = vld [vmem:[#allocation8 + $0x968] sm:$0xff] }
 0x131   :  { %3682 = vmatprep.mubr.bf16.mxu0 %v12106_v47  ;;  %4021 = vmatprep.mubr.bf16.mxu1 %v12106_v47  ;;  %v12136_v11 = vcombine.high %v11961_v42, %v1378_v63  ;;  %v1706_v30 = vld [vmem:[#allocation8 + $0x940] sm:$0xff]  ;;  %v12143_v41 = vcombine.low %v11961_v42, %v1378_v63  ;;  %v9411_v42 = vcombine.high %v1707_v38, %v1711_v40 }
 0x132   :  { %v1726_v63 = vld [vmem:[#allocation8 + $0x9e0] sm:$0xff] }
 0x133   :  { %3720 = vmatpush1.bf16.msra.mxu0 %v9344_v2  ;;  %4059 = vmatpush1.bf16.msra.mxu1 %v9346_v6  ;;  %v1694_v2 = vld [vmem:[#allocation8 + $0x8e0] sm:$0xff]  ;;  %v1691_v6 = vld [vmem:[#allocation8 + $0x8c8] sm:$0xff] }
 0x134   :  { %3721 = vmatprep.subr.bf16.mxu0 %v9353_v5  ;;  %4060 = vmatprep.subr.bf16.mxu1 %v9355_v12  ;;  %v1695_v5 = vld [vmem:[#allocation8 + $0x8e8] sm:$0xff]  ;;  %v9384_v12 = vcombine.low %v1682_v55, %v1686_v56  ;;  %v9392_v29 = vcombine.low %v1690_v3, %v1694_v2  ;;  %v1718_v55 = vld [vmem:[#allocation8 + $0x9a0] sm:$0xff] }
 0x135   :  { %v9395_v36 = vcombine.high %v1691_v6, %v1695_v5 }
 0x136   :  { %3683 = vmatmul.mubr.bf16.gmra.mrb[28].mxu0 %v12113_v26  ;;  %4022 = vmatmul.mubr.bf16.gmra.mrb[28].mxu1 %v12113_v26 }
 0x137   :  { %3722 = vmatpush1.bf16.msra.mxu0 %v9352_v15  ;;  %4061 = vmatpush1.bf16.msra.mxu1 %v9354_v18  ;;  %v1702_v15 = vld [vmem:[#allocation8 + $0x920] sm:$0xff]  ;;  %v9393_v18 = vcombine.high %v1690_v3, %v1694_v2  ;;  %v9410_v3 = vcombine.low %v1707_v38, %v1711_v40  ;;  %v1723_v2 = vld [vmem:[#allocation8 + $0x9c8] sm:$0xff] }
 0x138   :  { %3723 = vmatprep.subr.bf16.mxu0 %v9361_v19  ;;  %4062 = vmatprep.subr.bf16.mxu1 %v9363_v20  ;;  %v9386_v19 = vcombine.low %v1683_v59, %v1687_v16  ;;  %v1699_v20 = vld [vmem:[#allocation8 + $0x908] sm:$0xff]  ;;  %v9400_v44 = vcombine.low %v1698_v13, %v1702_v15  ;;  %v1390_v16 = vld [vmem:[#allocation26 + $0xbc] sm:$0xff] }
 0x139   :  { %3725 = vmatprep.mubr.bf16.mxu0 %v12116_v24  ;;  %4064 = vmatprep.mubr.bf16.mxu1 %v12116_v24  ;;  %v1719_v59 = vld [vmem:[#allocation8 + $0x9a8] sm:$0xff] }
 0x13b   :  { %3724 = vmatpush1.bf16.msra.mxu0 %v9360_v4  ;;  %4063 = vmatpush1.bf16.msra.mxu1 %v9362_v33  ;;  %v1710_v4 = vld [vmem:[#allocation8 + $0x960] sm:$0xff]  ;;  %v9401_v33 = vcombine.high %v1698_v13, %v1702_v15  ;;  %v12158_v13 = vld [vmem:[#allocation8 + $0x10] sm:$0xff] }
 0x13c   :  { %3806 = vmatprep.subr.bf16.mxu0 %v9369_v34  ;;  %4145 = vmatprep.subr.bf16.mxu1 %v9371_v9  ;;  %v9394_v34 = vcombine.low %v1691_v6, %v1695_v5  ;;  %v9403_v9 = vcombine.high %v1699_v20, %v1703_v31  ;;  %v9409_v56 = vcombine.high %v1706_v30, %v1710_v4  ;;  %v12160_v15 = vld [vmem:[#allocation8 + $0x30] sm:$0xff] }
 0x13d   :  { %v12153_v6 = vcombine.low %v11970_v51, %v1384_v28 }
 0x13e   :  { %3726 = vmatmul.mubr.bf16.vlgmr.msra.gmra.mrb[0].mxu0 %v12122_v45  ;;  %4065 = vmatmul.mubr.bf16.vlgmr.msra.gmra.mrb[0].mxu1 %v12122_v45 }
 0x13f   :  { %3807 = vmatpush1.bf16.msra.mxu0 %v9368_v48  ;;  %3735 = vmatprep.mubr.bf16.mxu0 %v12126_v53  ;;  %v1714_v48 = vld [vmem:[#allocation8 + $0x980] sm:$0xff] }
 0x140   :  { %4074 = vmatprep.mubr.bf16.mxu1 %v12126_v53  ;;  %3808 = vmatprep.subr.bf16.mxu0 %v9377_v57  ;;  %v9402_v57 = vcombine.low %v1699_v20, %v1703_v31  ;;  %v12162_v20 = vld [vmem:[#allocation8 + $0x18] sm:$0xff] }
 0x141   :  { %4146 = vmatpush1.bf16.msra.mxu1 %v9370_v58  ;;  %v1715_v58 = vld [vmem:[#allocation8 + $0x988] sm:$0xff]  ;;  %v12164_v31 = vld [vmem:[#allocation8 + $0x38] sm:$0xff] }
 0x142   :  { %4147 = vmatprep.subr.bf16.mxu1 %v9379_v25  ;;  %v9408_v25 = vcombine.low %v1706_v30, %v1710_v4  ;;  %v9419_v5 = vcombine.high %v1715_v58, %v1719_v59  ;;  %v9117_v30 = vcombine.high %v12158_v13, %v12160_v15  ;;  %v12173_v4 = vcombine.low %v11982_v60, %v1390_v16 }
 0x143   :  { %3809 = vmatpush1.bf16.msra.mxu0 %v9376_v54  ;;  %v1722_v54 = vld [vmem:[#allocation8 + $0x9c0] sm:$0xff] }
 0x144   :  { %3810 = vmatprep.subr.bf16.mxu0 %v9385_v1  ;;  %v9417_v1 = vcombine.high %v1714_v48, %v1718_v55  ;;  %v9424_v28 = vcombine.low %v1722_v54, %v1726_v63 }
 0x145   :  { %4148 = vmatpush1.bf16.msra.mxu1 %v9378_v50  ;;  %v1727_v50 = vld [vmem:[#allocation8 + $0x9e8] sm:$0xff] }
 0x146   :  { %3736 = vmatmul.mubr.bf16.gmra.mrb[4].mxu0 %v12133_v7  ;;  %4149 = vmatprep.subr.bf16.mxu1 %v9387_v10  ;;  %v12156_v10 = vcombine.high %v11982_v60, %v1390_v16  ;;  %v9427_v51 = vcombine.high %v1723_v2, %v1727_v50  ;;  %v1402_v60 = vld [vmem:[#allocation26 + $0x10c] sm:$0xff]  ;;  %v1432_v16 = vld [vmem:[#allocation8 + $0xb0] sm:$0xff] }
 0x147   :  { %4075 = vmatmul.mubr.bf16.gmra.mrb[4].mxu1 %v12133_v7  ;;  %3745 = vmatprep.mubr.bf16.mxu0 %v12136_v11  ;;  %v12188_v40 = vcombine.high %v12008_v22, %v1402_v60 }
 0x148   :  { %4084 = vmatprep.mubr.bf16.mxu1 %v12136_v11  ;;  %3811 = vmatpush1.bf16.msra.mxu0 %v9384_v12  ;;  %v9416_v12 = vcombine.low %v1714_v48, %v1718_v55  ;;  %v1424_v55 = vld [vmem:[#allocation8 + $0x70] sm:$0xff] }
 0x149   :  { %3812 = vmatprep.subr.bf16.mxu0 %v9393_v18  ;;  %4150 = vmatpush1.bf16.msra.mxu1 %v9386_v19  ;;  %v9425_v18 = vcombine.high %v1722_v54, %v1726_v63  ;;  %v9418_v19 = vcombine.low %v1715_v58, %v1719_v59  ;;  %v10821_v58 = vld [vmem:[#allocation26 + $0x10] ss:$20 sps:$4 sm:$0xff]   ;;  %v9116_v59 = vcombine.low %v12158_v13, %v12160_v15 }
 0x14a   :  { %4151 = vmatprep.subr.bf16.mxu1 %v9395_v36  ;;  %v1396_v36 = vld [vmem:[#allocation26 + $0xe4] sm:$0xff] }
 0x14b   :  { %v12185_v38 = vcombine.low %v11995_v8, %v1396_v36  ;;  %v1429_v63 = vld [vmem:[#allocation8 + $0x98] sm:$0xff] }
 0x14c   :  { %3813 = vmatpush1.bf16.msra.mxu0 %v9392_v29  ;;  %v9426_v29 = vcombine.low %v1723_v2, %v1727_v50  ;;  %v1436_v2 = vld [vmem:[#allocation8 + $0xd0] sm:$0xff]  ;;  %v1437_v15 = vld [vmem:[#allocation8 + $0xd8] sm:$0xff] }
 0x14d   :  { %3814 = vmatprep.subr.bf16.mxu0 %v9401_v33  ;;  %4152 = vmatpush1.bf16.msra.mxu1 %v9394_v34  ;;  %v9119_v33 = vcombine.high %v12162_v20, %v12164_v31  ;;  %v12178_v34 = vcombine.high %v11995_v8, %v1396_v36  ;;  %v1440_v50 = vld [vmem:[#allocation8 + $0xf0] sm:$0xff] }
 0x14e   :  { %3746 = vmatmul.mubr.bf16.gmra.mrb[8].mxu0 %v12143_v41  ;;  %4153 = vmatprep.subr.bf16.mxu1 %v9403_v9  ;;  %v1408_v9 = vld [vmem:[#allocation26 + $0x134] sm:$0xff] }
 0x14f   :  { %4085 = vmatmul.mubr.bf16.gmra.mrb[8].mxu1 %v12143_v41  ;;  %3755 = vmatprep.mubr.bf16.mxu0 %v12146_v43  ;;  %v12198_v48 = vcombine.high %v12021_v37, %v1408_v9  ;;  %v12205_v8 = vcombine.low %v12021_v37, %v1408_v9  ;;  %v9118_v37 = vcombine.low %v12162_v20, %v12164_v31  ;;  %v1444_v31 = vld [vmem:[#allocation8 + $0x110] sm:$0xff] }
 0x150   :  { %4094 = vmatprep.mubr.bf16.mxu1 %v12146_v43  ;;  %3815 = vmatpush1.bf16.msra.mxu0 %v9400_v44  ;;  %v12195_v44 = vcombine.low %v12008_v22, %v1402_v60  ;;  %v1420_v22 = vld [vmem:[#allocation8 + $0x50] sm:$0xff]  ;;  %v9140_v60 = vcombine.low %v1436_v2, %v1440_v50 }
 0x151   :  { %3816 = vmatprep.subr.bf16.mxu0 %v9409_v56  ;;  %4154 = vmatpush1.bf16.msra.mxu1 %v9402_v57  ;;  %v1421_v56 = vld [vmem:[#allocation8 + $0x58] sm:$0xff]  ;;  %v1452_v9 = vld [vmem:[#allocation8 + $0x150] sm:$0xff] }
 0x152   :  { %4155 = vmatprep.subr.bf16.mxu1 %v9411_v42  ;;  %v1425_v57 = vld [vmem:[#allocation8 + $0x78] sm:$0xff]  ;;  %v1428_v42 = vld [vmem:[#allocation8 + $0x90] sm:$0xff] }
 0x153   :  { %v9127_v54 = vcombine.high %v1421_v56, %v1425_v57  ;;  %v9133_v13 = vcombine.high %v1428_v42, %v1432_v16  ;;  %v9132_v20 = vcombine.low %v1428_v42, %v1432_v16 }
 0x154   :  { %3817 = vmatpush1.bf16.msra.mxu0 %v9408_v25  ;;  %v9125_v25 = vcombine.high %v1420_v22, %v1424_v55 }
 0x155   :  { %3818 = vmatprep.subr.bf16.mxu0 %v9417_v1  ;;  %4156 = vmatpush1.bf16.msra.mxu1 %v9410_v3  ;;  %v1433_v1 = vld [vmem:[#allocation8 + $0xb8] sm:$0xff]  ;;  %v9124_v3 = vcombine.low %v1420_v22, %v1424_v55  ;;  %v1456_v22 = vld [vmem:[#allocation8 + $0x170] sm:$0xff] }
 0x156   :  { %3756 = vmatmul.mubr.bf16.gmra.mrb[12].mxu0 %v12153_v6  ;;  %4157 = vmatprep.subr.bf16.mxu1 %v9419_v5  ;;  %v9126_v5 = vcombine.low %v1421_v56, %v1425_v57  ;;  %v9134_v36 = vcombine.low %v1429_v63, %v1433_v1  ;;  %v10823_v56 = vld [vmem:[#allocation26 + $0x60] ss:$20 sps:$4 sm:$0xff]  }
 0x157   :  { %4095 = vmatmul.mubr.bf16.gmra.mrb[12].mxu1 %v12153_v6  ;;  %3765 = vmatprep.mubr.bf16.mxu0 %v12156_v10 }
 0x158   :  { %4104 = vmatprep.mubr.bf16.mxu1 %v12156_v10  ;;  %3819 = vmatpush1.bf16.msra.mxu0 %v9416_v12  ;;  %v10822_v12 = vld [vmem:[#allocation26 + $0x38] ss:$20 sps:$4 sm:$0xff]  }
 0x159   :  { %3820 = vmatprep.subr.bf16.mxu0 %v9425_v18  ;;  %4158 = vmatpush1.bf16.msra.mxu1 %v9418_v19  ;;  %v1441_v18 = vld [vmem:[#allocation8 + $0xf8] sm:$0xff]  ;;  %v9135_v19 = vcombine.high %v1429_v63, %v1433_v1  ;;  %v9157_v63 = vcombine.high %v1452_v9, %v1456_v22 }
 0x15a   :  { %4159 = vmatprep.subr.bf16.mxu1 %v9427_v51  ;;  %v1448_v51 = vld [vmem:[#allocation8 + $0x130] sm:$0xff]  ;;  %v9142_v55 = vcombine.low %v1437_v15, %v1441_v18 }
 0x15b   :  { %v9149_v57 = vcombine.high %v1444_v31, %v1448_v51  ;;  %v9148_v16 = vcombine.low %v1444_v31, %v1448_v51 }
 0x15c   :  { %3821 = vmatpush1.bf16.msra.mxu0 %v9424_v28  ;;  %v9141_v28 = vcombine.high %v1436_v2, %v1440_v50  ;;  %v1465_v2 = vld [vmem:[#allocation8 + $0x1b8] sm:$0xff]  ;;  %v9156_v50 = vcombine.low %v1452_v9, %v1456_v22 }
 0x15d   :  { %4160 = vmatpush1.bf16.msra.mxu1 %v9426_v29  ;;  %4258 = vmatprep.subr.bf16.mxu0 %v9117_v30  ;;  %v9143_v29 = vcombine.high %v1437_v15, %v1441_v18  ;;  %v1445_v30 = vld [vmem:[#allocation8 + $0x118] sm:$0xff] }
 0x15e   :  { %3766 = vmatmul.mubr.bf16.gmra.mrb[16].mxu0 %v12173_v4  ;;  %4597 = vmatprep.subr.bf16.mxu1 %v9119_v33  ;;  %v1449_v33 = vld [vmem:[#allocation8 + $0x138] sm:$0xff] }
 0x15f   :  { %4105 = vmatmul.mubr.bf16.gmra.mrb[16].mxu1 %v12173_v4  ;;  %3775 = vmatprep.mubr.bf16.mxu0 %v12178_v34  ;;  %v9151_v42 = vcombine.high %v1445_v30, %v1449_v33  ;;  %v10824_v15 = vld [vmem:[#allocation26 + $0x88] ss:$20 sps:$4 sm:$0xff]  }
 0x160   :  { %4114 = vmatprep.mubr.bf16.mxu1 %v12178_v34  ;;  %v1481_v9 = vld [vmem:[#allocation8 + $0x238] sm:$0xff] }
 0x166   :  { %3776 = vmatmul.mubr.bf16.gmra.mrb[20].mxu0 %v12185_v38 }
 0x167   :  { %4115 = vmatmul.mubr.bf16.gmra.mrb[20].mxu1 %v12185_v38  ;;  %3785 = vmatprep.mubr.bf16.mxu0 %v12188_v40 }
 0x168   :  { %4124 = vmatprep.mubr.bf16.mxu1 %v12188_v40 }
 0x16e   :  { %3786 = vmatmul.mubr.bf16.gmra.mrb[24].mxu0 %v12195_v44 }
 0x16f   :  { %4125 = vmatmul.mubr.bf16.gmra.mrb[24].mxu1 %v12195_v44  ;;  %3795 = vmatprep.mubr.bf16.mxu0 %v12198_v48 }
 0x170   :  { %4134 = vmatprep.mubr.bf16.mxu1 %v12198_v48 }
 0x176   :  { %3796 = vmatmul.mubr.bf16.gmra.mrb[28].mxu0 %v12205_v8 }
 0x177   :  { %4135 = vmatmul.mubr.bf16.gmra.mrb[28].mxu1 %v12205_v8  ;;  %3838 = vmatprep.mubr.bf16.mxu0 %v11618_v23 }
 0x178   :  { %4177 = vmatprep.mubr.bf16.mxu1 %v11618_v23 }
 0x17e   :  { %3839 = vmatmul.mubr.bf16.vlgmr.msra.gmra.mrb[0].mxu0 %v10821_v58 }
 0x17f   :  { %4178 = vmatmul.mubr.bf16.vlgmr.msra.gmra.mrb[0].mxu1 %v10821_v58  ;;  %4259 = vmatpush1.bf16.msra.mxu0 %v9116_v59  ;;  %v1453_v58 = vld [vmem:[#allocation8 + $0x158] sm:$0xff] }
 0x180   :  { %4598 = vmatpush1.bf16.msra.mxu1 %v9118_v37  ;;  %4260 = vmatprep.subr.bf16.mxu0 %v9125_v25  ;;  %v1457_v59 = vld [vmem:[#allocation8 + $0x178] sm:$0xff]  ;;  %v1460_v37 = vld [vmem:[#allocation8 + $0x190] sm:$0xff] }
 0x181   :  { %4599 = vmatprep.subr.bf16.mxu1 %v9127_v54  ;;  %3848 = vmatprep.mubr.bf16.mxu0 %v11618_v23  ;;  %v1464_v25 = vld [vmem:[#allocation8 + $0x1b0] sm:$0xff]  ;;  %v9150_v54 = vcombine.low %v1445_v30, %v1449_v33  ;;  %v9159_v1 = vcombine.high %v1453_v58, %v1457_v59 }
 0x182   :  { %4187 = vmatprep.mubr.bf16.mxu1 %v11618_v23  ;;  %v9165_v18 = vcombine.high %v1460_v37, %v1464_v25  ;;  %v9164_v51 = vcombine.low %v1460_v37, %v1464_v25 }
 0x183   :  { %4261 = vmatpush1.bf16.msra.mxu0 %v9124_v3  ;;  %v1461_v3 = vld [vmem:[#allocation8 + $0x198] sm:$0xff] }
 0x184   :  { %4600 = vmatpush1.bf16.msra.mxu1 %v9126_v5  ;;  %4262 = vmatprep.subr.bf16.mxu0 %v9133_v13  ;;  %v1468_v5 = vld [vmem:[#allocation8 + $0x1d0] sm:$0xff]  ;;  %v9158_v13 = vcombine.low %v1453_v58, %v1457_v59  ;;  %v9167_v31 = vcombine.high %v1461_v3, %v1465_v2  ;;  %v10825_v58 = vld [vmem:[#allocation26 + $0xb0] ss:$20 sps:$4 sm:$0xff]  }
 0x185   :  { %4601 = vmatprep.subr.bf16.mxu1 %v9135_v19  ;;  %v1469_v19 = vld [vmem:[#allocation8 + $0x1d8] sm:$0xff] }
 0x186   :  { %3849 = vmatmul.mubr.bf16.gmra.mrb[4].mxu0 %v10822_v12 }
 0x187   :  { %4188 = vmatmul.mubr.bf16.gmra.mrb[4].mxu1 %v10822_v12  ;;  %4263 = vmatpush1.bf16.msra.mxu0 %v9132_v20  ;;  %v1472_v12 = vld [vmem:[#allocation8 + $0x1f0] sm:$0xff]  ;;  %v1473_v20 = vld [vmem:[#allocation8 + $0x1f8] sm:$0xff] }
 0x188   :  { %4602 = vmatpush1.bf16.msra.mxu1 %v9134_v36  ;;  %4264 = vmatprep.subr.bf16.mxu0 %v9141_v28  ;;  %v1476_v36 = vld [vmem:[#allocation8 + $0x210] sm:$0xff]  ;;  %v9173_v30 = vcombine.high %v1468_v5, %v1472_v12  ;;  %v9175_v33 = vcombine.high %v1469_v19, %v1473_v20  ;;  %v9172_v22 = vcombine.low %v1468_v5, %v1472_v12  ;;  %v1497_v5 = vld [vmem:[#allocation8 + $0x2b8] sm:$0xff] }
 0x189   :  { %4603 = vmatprep.subr.bf16.mxu1 %v9143_v29  ;;  %3858 = vmatprep.mubr.bf16.mxu0 %v11618_v23  ;;  %v1480_v28 = vld [vmem:[#allocation8 + $0x230] sm:$0xff]  ;;  %v9166_v29 = vcombine.low %v1461_v3, %v1465_v2 }
 0x18a   :  { %4197 = vmatprep.mubr.bf16.mxu1 %v11618_v23  ;;  %v9181_v59 = vcombine.high %v1476_v36, %v1480_v28  ;;  %v9180_v25 = vcombine.low %v1476_v36, %v1480_v28  ;;  %v1496_v3 = vld [vmem:[#allocation8 + $0x2b0] sm:$0xff] }
 0x18b   :  { %4265 = vmatpush1.bf16.msra.mxu0 %v9140_v60  ;;  %v1477_v60 = vld [vmem:[#allocation8 + $0x218] sm:$0xff] }
 0x18c   :  { %4604 = vmatpush1.bf16.msra.mxu1 %v9142_v55  ;;  %4266 = vmatprep.subr.bf16.mxu0 %v9149_v57  ;;  %v1484_v55 = vld [vmem:[#allocation8 + $0x250] sm:$0xff]  ;;  %v9174_v57 = vcombine.low %v1469_v19, %v1473_v20  ;;  %v9183_v37 = vcombine.high %v1477_v60, %v1481_v9  ;;  %v10826_v19 = vld [vmem:[#allocation26 + $0xd8] ss:$20 sps:$4 sm:$0xff]  }
 0x18d   :  { %4605 = vmatprep.subr.bf16.mxu1 %v9151_v42  ;;  %v1485_v42 = vld [vmem:[#allocation8 + $0x258] sm:$0xff] }
 0x18e   :  { %3859 = vmatmul.mubr.bf16.gmra.mrb[8].mxu0 %v10823_v56 }
 0x18f   :  { %4198 = vmatmul.mubr.bf16.gmra.mrb[8].mxu1 %v10823_v56  ;;  %4267 = vmatpush1.bf16.msra.mxu0 %v9148_v16  ;;  %v1488_v56 = vld [vmem:[#allocation8 + $0x270] sm:$0xff]  ;;  %v1489_v16 = vld [vmem:[#allocation8 + $0x278] sm:$0xff] }
 0x190   :  { %4606 = vmatpush1.bf16.msra.mxu1 %v9150_v54  ;;  %4268 = vmatprep.subr.bf16.mxu0 %v9157_v63  ;;  %v9182_v54 = vcombine.low %v1477_v60, %v1481_v9  ;;  %v9189_v63 = vcombine.high %v1484_v55, %v1488_v56  ;;  %v9191_v2 = vcombine.high %v1485_v42, %v1489_v16  ;;  %v1512_v60 = vld [vmem:[#allocation8 + $0x330] sm:$0xff] }
 0x191   :  { %4607 = vmatprep.subr.bf16.mxu1 %v9159_v1  ;;  %3868 = vmatprep.mubr.bf16.mxu0 %v11618_v23  ;;  %v1492_v1 = vld [vmem:[#allocation8 + $0x290] sm:$0xff]  ;;  %v9188_v12 = vcombine.low %v1484_v55, %v1488_v56  ;;  %v1513_v55 = vld [vmem:[#allocation8 + $0x338] sm:$0xff] }
 0x192   :  { %4207 = vmatprep.mubr.bf16.mxu1 %v11618_v23  ;;  %v9197_v20 = vcombine.high %v1492_v1, %v1496_v3  ;;  %v9196_v28 = vcombine.low %v1492_v1, %v1496_v3 }
 0x193   :  { %4269 = vmatpush1.bf16.msra.mxu0 %v9156_v50  ;;  %v1493_v50 = vld [vmem:[#allocation8 + $0x298] sm:$0xff] }
 0x194   :  { %4608 = vmatpush1.bf16.msra.mxu1 %v9158_v13  ;;  %4270 = vmatprep.subr.bf16.mxu0 %v9165_v18  ;;  %v1500_v13 = vld [vmem:[#allocation8 + $0x2d0] sm:$0xff]  ;;  %v9190_v18 = vcombine.low %v1485_v42, %v1489_v16  ;;  %v9199_v36 = vcombine.high %v1493_v50, %v1497_v5 }
 0x195   :  { %4609 = vmatprep.subr.bf16.mxu1 %v9167_v31  ;;  %v1501_v31 = vld [vmem:[#allocation8 + $0x2d8] sm:$0xff]  ;;  %v10827_v42 = vld [vmem:[#allocation26 + $0x100] ss:$20 sps:$4 sm:$0xff]  }
 0x196   :  { %3869 = vmatmul.mubr.bf16.gmra.mrb[12].mxu0 %v10824_v15 }
 0x197   :  { %4208 = vmatmul.mubr.bf16.gmra.mrb[12].mxu1 %v10824_v15  ;;  %4271 = vmatpush1.bf16.msra.mxu0 %v9164_v51  ;;  %v1504_v15 = vld [vmem:[#allocation8 + $0x2f0] sm:$0xff]  ;;  %v1505_v51 = vld [vmem:[#allocation8 + $0x2f8] sm:$0xff] }
 0x198   :  { %4610 = vmatpush1.bf16.msra.mxu1 %v9166_v29  ;;  %4272 = vmatprep.subr.bf16.mxu0 %v9173_v30  ;;  %v9198_v29 = vcombine.low %v1493_v50, %v1497_v5  ;;  %v9205_v30 = vcombine.high %v1500_v13, %v1504_v15  ;;  %v9207_v9 = vcombine.high %v1501_v31, %v1505_v51  ;;  %v1528_v50 = vld [vmem:[#allocation8 + $0x3b0] sm:$0xff] }
 0x199   :  { %4611 = vmatprep.subr.bf16.mxu1 %v9175_v33  ;;  %3878 = vmatprep.mubr.bf16.mxu0 %v11618_v23  ;;  %v1508_v33 = vld [vmem:[#allocation8 + $0x310] sm:$0xff]  ;;  %v9204_v56 = vcombine.low %v1500_v13, %v1504_v15  ;;  %v1529_v13 = vld [vmem:[#allocation8 + $0x3b8] sm:$0xff] }
 0x19a   :  { %4217 = vmatprep.mubr.bf16.mxu1 %v11618_v23  ;;  %v9213_v16 = vcombine.high %v1508_v33, %v1512_v60 }
 0x19b   :  { %4273 = vmatpush1.bf16.msra.mxu0 %v9172_v22  ;;  %v1509_v22 = vld [vmem:[#allocation8 + $0x318] sm:$0xff] }
 0x19c   :  { %4612 = vmatpush1.bf16.msra.mxu1 %v9174_v57  ;;  %4274 = vmatprep.subr.bf16.mxu0 %v9181_v59  ;;  %v1516_v57 = vld [vmem:[#allocation8 + $0x350] sm:$0xff]  ;;  %v9206_v59 = vcombine.low %v1501_v31, %v1505_v51  ;;  %v9214_v1 = vcombine.low %v1509_v22, %v1513_v55 }
 0x19d   :  { %4613 = vmatprep.subr.bf16.mxu1 %v9183_v37  ;;  %v1517_v37 = vld [vmem:[#allocation8 + $0x358] sm:$0xff] }
 0x19e   :  { %3879 = vmatmul.mubr.bf16.gmra.mrb[16].mxu0 %v10825_v58  ;;  %v10828_v31 = vld [vmem:[#allocation26 + $0x128] ss:$20 sps:$4 sm:$0xff]  }
 0x19f   :  { %4218 = vmatmul.mubr.bf16.gmra.mrb[16].mxu1 %v10825_v58  ;;  %4275 = vmatpush1.bf16.msra.mxu0 %v9180_v25  ;;  %v1520_v58 = vld [vmem:[#allocation8 + $0x370] sm:$0xff]  ;;  %v1521_v25 = vld [vmem:[#allocation8 + $0x378] sm:$0xff] }
 0x1a0   :  { %4614 = vmatpush1.bf16.msra.mxu1 %v9182_v54  ;;  %4276 = vmatprep.subr.bf16.mxu0 %v9189_v63  ;;  %v9215_v54 = vcombine.high %v1509_v22, %v1513_v55  ;;  %v9212_v63 = vcombine.low %v1508_v33, %v1512_v60  ;;  %v9221_v3 = vcombine.high %v1516_v57, %v1520_v58  ;;  %v1544_v22 = vld [vmem:[#allocation8 + $0x430] sm:$0xff] }
 0x1a1   :  { %4615 = vmatprep.subr.bf16.mxu1 %v9191_v2  ;;  %3888 = vmatprep.mubr.bf16.mxu0 %v11618_v23  ;;  %v1524_v2 = vld [vmem:[#allocation8 + $0x390] sm:$0xff]  ;;  %v9223_v5 = vcombine.high %v1517_v37, %v1521_v25  ;;  %v9220_v15 = vcombine.low %v1516_v57, %v1520_v58  ;;  %v1545_v57 = vld [vmem:[#allocation8 + $0x438] sm:$0xff] }
 0x1a2   :  { %4227 = vmatprep.mubr.bf16.mxu1 %v11618_v23  ;;  %v9229_v51 = vcombine.high %v1524_v2, %v1528_v50 }
 0x1a3   :  { %4277 = vmatpush1.bf16.msra.mxu0 %v9188_v12  ;;  %v1525_v12 = vld [vmem:[#allocation8 + $0x398] sm:$0xff] }
 0x1a4   :  { %4616 = vmatpush1.bf16.msra.mxu1 %v9190_v18  ;;  %4278 = vmatprep.subr.bf16.mxu0 %v9197_v20  ;;  %v1532_v18 = vld [vmem:[#allocation8 + $0x3d0] sm:$0xff]  ;;  %v9222_v20 = vcombine.low %v1517_v37, %v1521_v25  ;;  %v9230_v33 = vcombine.low %v1525_v12, %v1529_v13  ;;  %v1549_v25 = vld [vmem:[#allocation8 + $0x458] sm:$0xff] }
 0x1a5   :  { %4617 = vmatprep.subr.bf16.mxu1 %v9199_v36  ;;  %v1533_v36 = vld [vmem:[#allocation8 + $0x3d8] sm:$0xff] }
 0x1a6   :  { %3889 = vmatmul.mubr.bf16.gmra.mrb[20].mxu0 %v10826_v19 }
 0x1a7   :  { %4228 = vmatmul.mubr.bf16.gmra.mrb[20].mxu1 %v10826_v19  ;;  %4279 = vmatpush1.bf16.msra.mxu0 %v9196_v28  ;;  %v1536_v19 = vld [vmem:[#allocation8 + $0x3f0] sm:$0xff]  ;;  %v1537_v28 = vld [vmem:[#allocation8 + $0x3f8] sm:$0xff] }
 0x1a8   :  { %4618 = vmatpush1.bf16.msra.mxu1 %v9198_v29  ;;  %4280 = vmatprep.subr.bf16.mxu0 %v9205_v30  ;;  %v9231_v29 = vcombine.high %v1525_v12, %v1529_v13  ;;  %v9228_v30 = vcombine.low %v1524_v2, %v1528_v50  ;;  %v9237_v60 = vcombine.high %v1532_v18, %v1536_v19  ;;  %v1556_v12 = vld [vmem:[#allocation8 + $0x490] sm:$0xff] }
 0x1a9   :  { %4619 = vmatprep.subr.bf16.mxu1 %v9207_v9  ;;  %3898 = vmatprep.mubr.bf16.mxu0 %v11618_v23  ;;  %v1540_v9 = vld [vmem:[#allocation8 + $0x410] sm:$0xff]  ;;  %v9239_v55 = vcombine.high %v1533_v36, %v1537_v28  ;;  %v9236_v58 = vcombine.low %v1532_v18, %v1536_v19  ;;  %v1557_v18 = vld [vmem:[#allocation8 + $0x498] sm:$0xff] }
 0x1aa   :  { %4237 = vmatprep.mubr.bf16.mxu1 %v11618_v23  ;;  %v9245_v37 = vcombine.high %v1540_v9, %v1544_v22  ;;  %v1560_v13 = vld [vmem:[#allocation8 + $0x4b0] sm:$0xff]  ;;  %v1561_v19 = vld [vmem:[#allocation8 + $0x4b8] sm:$0xff] }
 0x1ab   :  { %4281 = vmatpush1.bf16.msra.mxu0 %v9204_v56  ;;  %v1541_v56 = vld [vmem:[#allocation8 + $0x418] sm:$0xff] }
 0x1ac   :  { %4620 = vmatpush1.bf16.msra.mxu1 %v9206_v59  ;;  %4282 = vmatprep.subr.bf16.mxu0 %v9213_v16  ;;  %v1548_v59 = vld [vmem:[#allocation8 + $0x450] sm:$0xff]  ;;  %v9238_v16 = vcombine.low %v1533_v36, %v1537_v28  ;;  %v9246_v2 = vcombine.low %v1541_v56, %v1545_v57 }
 0x1ad   :  { %4621 = vmatprep.subr.bf16.mxu1 %v9215_v54  ;;  %v1553_v54 = vld [vmem:[#allocation8 + $0x478] sm:$0xff]  ;;  %v1564_v36 = vld [vmem:[#allocation8 + $0x4d0] sm:$0xff] }
 0x1ae   :  { %3899 = vmatmul.mubr.bf16.gmra.mrb[24].mxu0 %v10827_v42  ;;  %v1568_v28 = vld [vmem:[#allocation8 + $0x4f0] sm:$0xff] }
 0x1af   :  { %4238 = vmatmul.mubr.bf16.gmra.mrb[24].mxu1 %v10827_v42  ;;  %4283 = vmatpush1.bf16.msra.mxu0 %v9212_v63  ;;  %v1552_v42 = vld [vmem:[#allocation8 + $0x470] sm:$0xff]  ;;  %v11333_v63 = vld [vmem:[#allocation26 + $0x4] ss:$20 sps:$4 sm:$0xff]  }
 0x1b0   :  { %4622 = vmatpush1.bf16.msra.mxu1 %v9214_v1  ;;  %4284 = vmatprep.subr.bf16.mxu0 %v9221_v3  ;;  %v9247_v1 = vcombine.high %v1541_v56, %v1545_v57  ;;  %v9244_v3 = vcombine.low %v1540_v9, %v1544_v22  ;;  %v9253_v50 = vcombine.high %v1548_v59, %v1552_v42  ;;  %v1572_v56 = vld [vmem:[#allocation8 + $0x510] sm:$0xff] }
 0x1b1   :  { %4623 = vmatprep.subr.bf16.mxu1 %v9223_v5  ;;  %3908 = vmatprep.mubr.bf16.mxu0 %v11618_v23  ;;  %v9255_v5 = vcombine.high %v1549_v25, %v1553_v54  ;;  %v9262_v9 = vcombine.low %v1557_v18, %v1561_v19  ;;  %v9269_v22 = vcombine.high %v1564_v36, %v1568_v28  ;;  %v1576_v57 = vld [vmem:[#allocation8 + $0x530] sm:$0xff] }
 0x1b2   :  { %4247 = vmatprep.mubr.bf16.mxu1 %v11618_v23 }
 0x1b3   :  { %4285 = vmatpush1.bf16.msra.mxu0 %v9220_v15  ;;  %v11334_v15 = vld [vmem:[#allocation26] ss:$20 sps:$4 sm:$0xff]  }
 0x1b4   :  { %4624 = vmatpush1.bf16.msra.mxu1 %v9222_v20  ;;  %4286 = vmatprep.subr.bf16.mxu0 %v9229_v51  ;;  %v9252_v20 = vcombine.low %v1548_v59, %v1552_v42  ;;  %v9261_v51 = vcombine.high %v1556_v12, %v1560_v13  ;;  %v1577_v59 = vld [vmem:[#allocation8 + $0x538] sm:$0xff]  ;;  %v9268_v42 = vcombine.low %v1564_v36, %v1568_v28 }
 0x1b5   :  { %4625 = vmatprep.subr.bf16.mxu1 %v9231_v29  ;;  %v1565_v29 = vld [vmem:[#allocation8 + $0x4d8] sm:$0xff] }
 0x1b6   :  { %3909 = vmatmul.mubr.bf16.gmra.mrb[28].mxu0 %v10828_v31  ;;  %v1597_v36 = vld [vmem:[#allocation8 + $0x5d8] sm:$0xff] }
 0x1b7   :  { %4248 = vmatmul.mubr.bf16.gmra.mrb[28].mxu1 %v10828_v31  ;;  %4287 = vmatpush1.bf16.msra.mxu0 %v9228_v30  ;;  %v9254_v31 = vcombine.low %v1549_v25, %v1553_v54  ;;  %v9263_v30 = vcombine.high %v1557_v18, %v1561_v19  ;;  %v1584_v25 = vld [vmem:[#allocation8 + $0x570] sm:$0xff]  ;;  %v1581_v54 = vld [vmem:[#allocation8 + $0x558] sm:$0xff] }
 0x1b8   :  { %4626 = vmatpush1.bf16.msra.mxu1 %v9230_v33  ;;  %4288 = vmatprep.subr.bf16.mxu0 %v9237_v60  ;;  %v1569_v33 = vld [vmem:[#allocation8 + $0x4f8] sm:$0xff]  ;;  %v9260_v60 = vcombine.low %v1556_v12, %v1560_v13  ;;  %v1592_v12 = vld [vmem:[#allocation8 + $0x5b0] sm:$0xff] }
 0x1b9   :  { %4627 = vmatprep.subr.bf16.mxu1 %v9239_v55  ;;  %4290 = vmatprep.mubr.bf16.mxu0 %v11333_v63  ;;  %v9271_v55 = vcombine.high %v1565_v29, %v1569_v33  ;;  %v1589_v13 = vld [vmem:[#allocation8 + $0x598] sm:$0xff] }
 0x1ba   :  { %4629 = vmatprep.mubr.bf16.mxu1 %v11333_v63  ;;  %v1601_v28 = vld [vmem:[#allocation8 + $0x5f8] sm:$0xff] }
 0x1bb   :  { %4289 = vmatpush1.bf16.msra.mxu0 %v9236_v58  ;;  %v1573_v58 = vld [vmem:[#allocation8 + $0x518] sm:$0xff] }
 0x1bc   :  { %4628 = vmatpush1.bf16.msra.mxu1 %v9238_v16  ;;  %4371 = vmatprep.subr.bf16.mxu0 %v9245_v37  ;;  %v9277_v16 = vcombine.high %v1572_v56, %v1576_v57  ;;  %v1580_v37 = vld [vmem:[#allocation8 + $0x550] sm:$0xff]  ;;  %v9279_v63 = vcombine.high %v1573_v58, %v1577_v59 }
 0x1bd   :  { %4710 = vmatprep.subr.bf16.mxu1 %v9247_v1  ;;  %v1585_v1 = vld [vmem:[#allocation8 + $0x578] sm:$0xff]  ;;  %v9284_v18 = vcombine.low %v1580_v37, %v1584_v25 }
 0x1be   :  { %4291 = vmatmul.mubr.bf16.vlgmr.msra.gmra.mrb[32].mxu0 %v11334_v15 }
 0x1bf   :  { %4630 = vmatmul.mubr.bf16.vlgmr.msra.gmra.mrb[32].mxu1 %v11334_v15  ;;  %4372 = vmatpush1.bf16.msra.mxu0 %v9244_v3  ;;  %v9276_v3 = vcombine.low %v1572_v56, %v1576_v57  ;;  %v1593_v15 = vld [vmem:[#allocation8 + $0x5b8] sm:$0xff]  ;;  %v9302_v56 = vcombine.low %v1597_v36, %v1601_v28 }
 0x1c0   :  { %4711 = vmatpush1.bf16.msra.mxu1 %v9246_v2  ;;  %4373 = vmatprep.subr.bf16.mxu0 %v9253_v50  ;;  %v9285_v2 = vcombine.high %v1580_v37, %v1584_v25  ;;  %v9287_v50 = vcombine.high %v1581_v54, %v1585_v1 }
 0x1c1   :  { %4712 = vmatprep.subr.bf16.mxu1 %v9255_v5  ;;  %4300 = vmatprep.mubr.bf16.mxu0 %v11948_v35  ;;  %v1588_v5 = vld [vmem:[#allocation8 + $0x590] sm:$0xff] }
 0x1c2   :  { %4639 = vmatprep.mubr.bf16.mxu1 %v11948_v35  ;;  %v9270_v35 = vcombine.low %v1565_v29, %v1569_v33  ;;  %v9293_v19 = vcombine.high %v1588_v5, %v1592_v12  ;;  %v9292_v29 = vcombine.low %v1588_v5, %v1592_v12  ;;  %v9303_v33 = vcombine.high %v1597_v36, %v1601_v28  ;;  %v1628_v12 = vld [vmem:[#allocation8 + $0x6d0] sm:$0xff]  ;;  %v1637_v36 = vld [vmem:[#allocation8 + $0x718] sm:$0xff] }
 0x1c3   :  { %4374 = vmatpush1.bf16.msra.mxu0 %v9252_v20  ;;  %v9295_v20 = vcombine.high %v1589_v13, %v1593_v15  ;;  %v1641_v28 = vld [vmem:[#allocation8 + $0x738] sm:$0xff] }
 0x1c4   :  { %4713 = vmatpush1.bf16.msra.mxu1 %v9254_v31  ;;  %4375 = vmatprep.subr.bf16.mxu0 %v9261_v51  ;;  %v1596_v31 = vld [vmem:[#allocation8 + $0x5d0] sm:$0xff] }
 0x1c5   :  { %4714 = vmatprep.subr.bf16.mxu1 %v9263_v30  ;;  %v1600_v51 = vld [vmem:[#allocation8 + $0x5f0] sm:$0xff] }
 0x1c6   :  { %4301 = vmatmul.mubr.bf16.gmra.mrb[36].mxu0 %v11974_v52  ;;  %v9301_v30 = vcombine.high %v1596_v31, %v1600_v51 }
 0x1c7   :  { %4640 = vmatmul.mubr.bf16.gmra.mrb[36].mxu1 %v11974_v52  ;;  %4376 = vmatpush1.bf16.msra.mxu0 %v9260_v60  ;;  %v9278_v52 = vcombine.low %v1573_v58, %v1577_v59  ;;  %v1604_v60 = vld [vmem:[#allocation8 + $0x610] sm:$0xff] }
 0x1c8   :  { %4715 = vmatpush1.bf16.msra.mxu1 %v9262_v9  ;;  %4377 = vmatprep.subr.bf16.mxu0 %v9269_v22  ;;  %v1608_v9 = vld [vmem:[#allocation8 + $0x630] sm:$0xff]  ;;  %v1605_v22 = vld [vmem:[#allocation8 + $0x618] sm:$0xff] }
 0x1c9   :  { %4716 = vmatprep.subr.bf16.mxu1 %v9271_v55  ;;  %4310 = vmatprep.mubr.bf16.mxu0 %v11988_v62  ;;  %v1609_v55 = vld [vmem:[#allocation8 + $0x638] sm:$0xff]  ;;  %v9309_v57 = vcombine.high %v1604_v60, %v1608_v9  ;;  %v1612_v59 = vld [vmem:[#allocation8 + $0x650] sm:$0xff]  ;;  %v9308_v37 = vcombine.low %v1604_v60, %v1608_v9 }
 0x1ca   :  { %4649 = vmatprep.mubr.bf16.mxu1 %v11988_v62  ;;  %v9286_v62 = vcombine.low %v1581_v54, %v1585_v1  ;;  %v9311_v58 = vcombine.high %v1605_v22, %v1609_v55  ;;  %v1624_v1 = vld [vmem:[#allocation8 + $0x6b0] sm:$0xff]  ;;  %v1645_v9 = vld [vmem:[#allocation8 + $0x758] sm:$0xff] }
 0x1cb   :  { %4378 = vmatpush1.bf16.msra.mxu0 %v9268_v42  ;;  %v1616_v42 = vld [vmem:[#allocation8 + $0x670] sm:$0xff] }
 0x1cc   :  { %4717 = vmatpush1.bf16.msra.mxu1 %v9270_v35  ;;  %4379 = vmatprep.subr.bf16.mxu0 %v9277_v16  ;;  %v1613_v35 = vld [vmem:[#allocation8 + $0x658] sm:$0xff]  ;;  %v9317_v25 = vcombine.high %v1612_v59, %v1616_v42  ;;  %v1648_v60 = vld [vmem:[#allocation8 + $0x770] sm:$0xff] }
 0x1cd   :  { %4718 = vmatprep.subr.bf16.mxu1 %v9279_v63  ;;  %v1617_v16 = vld [vmem:[#allocation8 + $0x678] sm:$0xff]  ;;  %v1620_v63 = vld [vmem:[#allocation8 + $0x690] sm:$0xff] }
 0x1ce   :  { %4311 = vmatmul.mubr.bf16.gmra.mrb[40].mxu0 %v12003_v14  ;;  %v9319_v54 = vcombine.high %v1613_v35, %v1617_v16 }
 0x1cf   :  { %4650 = vmatmul.mubr.bf16.gmra.mrb[40].mxu1 %v12003_v14  ;;  %4380 = vmatpush1.bf16.msra.mxu0 %v9276_v3  ;;  %v9294_v14 = vcombine.low %v1589_v13, %v1593_v15  ;;  %v1621_v3 = vld [vmem:[#allocation8 + $0x698] sm:$0xff]  ;;  %v1632_v13 = vld [vmem:[#allocation8 + $0x6f0] sm:$0xff] }
 0x1d0   :  { %4719 = vmatpush1.bf16.msra.mxu1 %v9278_v52  ;;  %4381 = vmatprep.subr.bf16.mxu0 %v9285_v2  ;;  %v1625_v52 = vld [vmem:[#allocation8 + $0x6b8] sm:$0xff]  ;;  %v9318_v2 = vcombine.low %v1613_v35, %v1617_v16 }
 0x1d1   :  { %4720 = vmatprep.subr.bf16.mxu1 %v9287_v50  ;;  %4320 = vmatprep.mubr.bf16.mxu0 %v12014_v27  ;;  %v9325_v50 = vcombine.high %v1620_v63, %v1624_v1  ;;  %v9327_v5 = vcombine.high %v1621_v3, %v1625_v52  ;;  %v1629_v15 = vld [vmem:[#allocation8 + $0x6d8] sm:$0xff] }
 0x1d2   :  { %4659 = vmatprep.mubr.bf16.mxu1 %v12014_v27  ;;  %v9300_v27 = vcombine.low %v1596_v31, %v1600_v51  ;;  %v1636_v31 = vld [vmem:[#allocation8 + $0x710] sm:$0xff] }
 0x1d3   :  { %4382 = vmatpush1.bf16.msra.mxu0 %v9284_v18  ;;  %v1633_v18 = vld [vmem:[#allocation8 + $0x6f8] sm:$0xff]  ;;  %v1640_v51 = vld [vmem:[#allocation8 + $0x730] sm:$0xff] }
 0x1d4   :  { %4721 = vmatpush1.bf16.msra.mxu1 %v9286_v62  ;;  %4383 = vmatprep.subr.bf16.mxu0 %v9293_v19  ;;  %v9324_v62 = vcombine.low %v1620_v63, %v1624_v1  ;;  %v9333_v19 = vcombine.high %v1628_v12, %v1632_v13  ;;  %v1665_v63 = vld [vmem:[#allocation8 + $0x7f8] sm:$0xff] }
 0x1d5   :  { %4722 = vmatprep.subr.bf16.mxu1 %v9295_v20  ;;  %v9335_v20 = vcombine.high %v1629_v15, %v1633_v18 }
 0x1d6   :  { %4321 = vmatmul.mubr.bf16.gmra.mrb[44].mxu0 %v12029_v46 }
 0x1d7   :  { %4660 = vmatmul.mubr.bf16.gmra.mrb[44].mxu1 %v12029_v46  ;;  %4384 = vmatpush1.bf16.msra.mxu0 %v9292_v29  ;;  %v9310_v46 = vcombine.low %v1605_v22, %v1609_v55  ;;  %v9334_v29 = vcombine.low %v1629_v15, %v1633_v18  ;;  %v1649_v22 = vld [vmem:[#allocation8 + $0x778] sm:$0xff]  ;;  %v9340_v55 = vcombine.low %v1636_v31, %v1640_v51  ;;  %v1676_v18 = vld [vmem:[#allocation8 + $0x850] sm:$0xff] }
 0x1d8   :  { %4723 = vmatpush1.bf16.msra.mxu1 %v9294_v14  ;;  %4385 = vmatprep.subr.bf16.mxu0 %v9301_v30  ;;  %v9341_v14 = vcombine.high %v1636_v31, %v1640_v51  ;;  %v9343_v30 = vcombine.high %v1637_v36, %v1641_v28  ;;  %v9350_v35 = vcombine.low %v1645_v9, %v1649_v22  ;;  %v1684_v31 = vld [vmem:[#allocation8 + $0x890] sm:$0xff] }
 0x1d9   :  { %4724 = vmatprep.subr.bf16.mxu1 %v9303_v33  ;;  %4330 = vmatprep.mubr.bf16.mxu0 %v12035_v61  ;;  %v1644_v33 = vld [vmem:[#allocation8 + $0x750] sm:$0xff] }
 0x1da   :  { %4669 = vmatprep.mubr.bf16.mxu1 %v12035_v61  ;;  %v9316_v61 = vcombine.low %v1612_v59, %v1616_v42  ;;  %v1653_v59 = vld [vmem:[#allocation8 + $0x798] sm:$0xff]  ;;  %v1688_v51 = vld [vmem:[#allocation8 + $0x8b0] sm:$0xff] }
 0x1db   :  { %4386 = vmatpush1.bf16.msra.mxu0 %v9300_v27  ;;  %v9349_v27 = vcombine.high %v1644_v33, %v1648_v60  ;;  %v1657_v42 = vld [vmem:[#allocation8 + $0x7b8] sm:$0xff] }
 0x1dc   :  { %4725 = vmatpush1.bf16.msra.mxu1 %v9302_v56  ;;  %4387 = vmatprep.subr.bf16.mxu0 %v9309_v57  ;;  %v9351_v56 = vcombine.high %v1645_v9, %v1649_v22  ;;  %v1652_v57 = vld [vmem:[#allocation8 + $0x790] sm:$0xff]  ;;  %v1693_v22 = vld [vmem:[#allocation8 + $0x8d8] sm:$0xff] }
 0x1dd   :  { %4726 = vmatprep.subr.bf16.mxu1 %v9311_v58  ;;  %v1656_v58 = vld [vmem:[#allocation8 + $0x7b0] sm:$0xff] }
 0x1de   :  { %4331 = vmatmul.mubr.bf16.gmra.mrb[48].mxu0 %v12053_v21  ;;  %v9357_v16 = vcombine.high %v1652_v57, %v1656_v58  ;;  %v9356_v1 = vcombine.low %v1652_v57, %v1656_v58  ;;  %v1701_v58 = vld [vmem:[#allocation8 + $0x918] sm:$0xff] }
 0x1df   :  { %4670 = vmatmul.mubr.bf16.gmra.mrb[48].mxu1 %v12053_v21  ;;  %4388 = vmatpush1.bf16.msra.mxu0 %v9308_v37  ;;  %v9326_v21 = vcombine.low %v1621_v3, %v1625_v52  ;;  %v9359_v37 = vcombine.high %v1653_v59, %v1657_v42 }
 0x1e0   :  { %4727 = vmatpush1.bf16.msra.mxu1 %v9310_v46  ;;  %4389 = vmatprep.subr.bf16.mxu0 %v9317_v25  ;;  %v1660_v46 = vld [vmem:[#allocation8 + $0x7d0] sm:$0xff] }
 0x1e1   :  { %4728 = vmatprep.subr.bf16.mxu1 %v9319_v54  ;;  %4340 = vmatprep.mubr.bf16.mxu0 %v12056_v39  ;;  %v1664_v25 = vld [vmem:[#allocation8 + $0x7f0] sm:$0xff]  ;;  %v1661_v54 = vld [vmem:[#allocation8 + $0x7d8] sm:$0xff] }
 0x1e2   :  { %4679 = vmatprep.mubr.bf16.mxu1 %v12056_v39  ;;  %v9332_v39 = vcombine.low %v1628_v12, %v1632_v13  ;;  %v9365_v3 = vcombine.high %v1660_v46, %v1664_v25  ;;  %v9367_v52 = vcombine.high %v1661_v54, %v1665_v63  ;;  %v9366_v12 = vcombine.low %v1661_v54, %v1665_v63  ;;  %v1713_v54 = vld [vmem:[#allocation8 + $0x978] sm:$0xff] }
 0x1e3   :  { %4390 = vmatpush1.bf16.msra.mxu0 %v9316_v61  ;;  %v1668_v61 = vld [vmem:[#allocation8 + $0x810] sm:$0xff] }
 0x1e4   :  { %4729 = vmatpush1.bf16.msra.mxu1 %v9318_v2  ;;  %4391 = vmatprep.subr.bf16.mxu0 %v9325_v50  ;;  %v1672_v2 = vld [vmem:[#allocation8 + $0x830] sm:$0xff]  ;;  %v1669_v50 = vld [vmem:[#allocation8 + $0x818] sm:$0xff] }
 0x1e5   :  { %4730 = vmatprep.subr.bf16.mxu1 %v9327_v5  ;;  %v1673_v5 = vld [vmem:[#allocation8 + $0x838] sm:$0xff]  ;;  %v9373_v13 = vcombine.high %v1668_v61, %v1672_v2 }
 0x1e6   :  { %4341 = vmatmul.mubr.bf16.gmra.mrb[52].mxu0 %v12074_v0  ;;  %v9375_v15 = vcombine.high %v1669_v50, %v1673_v5 }
 0x1e7   :  { %4680 = vmatmul.mubr.bf16.gmra.mrb[52].mxu1 %v12074_v0  ;;  %4392 = vmatpush1.bf16.msra.mxu0 %v9324_v62  ;;  %v9342_v0 = vcombine.low %v1637_v36, %v1641_v28  ;;  %v1680_v62 = vld [vmem:[#allocation8 + $0x870] sm:$0xff]  ;;  %v9374_v36 = vcombine.low %v1669_v50, %v1673_v5 }
 0x1e8   :  { %4731 = vmatpush1.bf16.msra.mxu1 %v9326_v21  ;;  %4393 = vmatprep.subr.bf16.mxu0 %v9333_v19  ;;  %v9372_v21 = vcombine.low %v1668_v61, %v1672_v2  ;;  %v1677_v19 = vld [vmem:[#allocation8 + $0x858] sm:$0xff] }
 0x1e9   :  { %4732 = vmatprep.subr.bf16.mxu1 %v9335_v20  ;;  %4350 = vmatprep.mubr.bf16.mxu0 %v12084_v17  ;;  %v1681_v20 = vld [vmem:[#allocation8 + $0x878] sm:$0xff] }
 0x1ea   :  { %4689 = vmatprep.mubr.bf16.mxu1 %v12084_v17  ;;  %v9348_v17 = vcombine.low %v1644_v33, %v1648_v60  ;;  %v9383_v28 = vcombine.high %v1677_v19, %v1681_v20  ;;  %v1692_v33 = vld [vmem:[#allocation8 + $0x8d0] sm:$0xff]  ;;  %v1721_v61 = vld [vmem:[#allocation8 + $0x9b8] sm:$0xff] }
 0x1eb   :  { %4394 = vmatpush1.bf16.msra.mxu0 %v9332_v39  ;;  %v1685_v39 = vld [vmem:[#allocation8 + $0x898] sm:$0xff]  ;;  %v1696_v60 = vld [vmem:[#allocation8 + $0x8f0] sm:$0xff] }
 0x1ec   :  { %4733 = vmatpush1.bf16.msra.mxu1 %v9334_v29  ;;  %4395 = vmatprep.subr.bf16.mxu0 %v9341_v14  ;;  %v1689_v29 = vld [vmem:[#allocation8 + $0x8b8] sm:$0xff]  ;;  %v9389_v14 = vcombine.high %v1684_v31, %v1688_v51 }
 0x1ed   :  { %4734 = vmatprep.subr.bf16.mxu1 %v9343_v30  ;;  %v9382_v30 = vcombine.low %v1677_v19, %v1681_v20  ;;  %v9391_v9 = vcombine.high %v1685_v39, %v1689_v29 }
 0x1ee   :  { %4351 = vmatmul.mubr.bf16.gmra.mrb[56].mxu0 %v12098_v49 }
 0x1ef   :  { %4690 = vmatmul.mubr.bf16.gmra.mrb[56].mxu1 %v12098_v49  ;;  %4396 = vmatpush1.bf16.msra.mxu0 %v9340_v55  ;;  %v9358_v49 = vcombine.low %v1653_v59, %v1657_v42  ;;  %v1697_v55 = vld [vmem:[#allocation8 + $0x8f8] sm:$0xff]  ;;  %v9396_v42 = vcombine.low %v1692_v33, %v1696_v60 }
 0x1f0   :  { %4735 = vmatpush1.bf16.msra.mxu1 %v9342_v0  ;;  %4397 = vmatprep.subr.bf16.mxu0 %v9349_v27  ;;  %v9397_v0 = vcombine.high %v1692_v33, %v1696_v60  ;;  %v9390_v27 = vcombine.low %v1685_v39, %v1689_v29  ;;  %v9399_v57 = vcombine.high %v1693_v22, %v1697_v55  ;;  %v1705_v59 = vld [vmem:[#allocation8 + $0x938] sm:$0xff]  ;;  %v12294_v39 = vshrl.u32 %v242_v32, 7  ;;  %v11336_v29 = vld [vmem:[#allocation26 + $0x38] ss:$20 sps:$4 sm:$0xff]   ;;  %v10858_v60 = vld [vmem:[#allocation13 + $0x8c] ss:$16 sps:$4 sm:$0xff]  }
 0x1f1   :  { %4736 = vmatprep.subr.bf16.mxu1 %v9351_v56  ;;  %4360 = vmatprep.mubr.bf16.mxu0 %v12106_v47  ;;  %v1700_v56 = vld [vmem:[#allocation8 + $0x910] sm:$0xff]  ;;  %v10855_v33 = vld [vmem:[#allocation13 + $0x84] ss:$16 sps:$4 sm:$0xff]   ;;  %v10853_v32 = vld [vmem:[#allocation13 + $0x80] ss:$16 sps:$4 sm:$0xff]  }
 0x1f2   :  { %4699 = vmatprep.mubr.bf16.mxu1 %v12106_v47  ;;  %v9364_v47 = vcombine.low %v1660_v46, %v1664_v25  ;;  %v9407_v46 = vcombine.high %v1701_v58, %v1705_v59  ;;  %v1709_v25 = vld [vmem:[#allocation8 + $0x958] sm:$0xff] }
 0x1f3   :  { %4398 = vmatpush1.bf16.msra.mxu0 %v9348_v17  ;;  %v9414_v5 = vcombine.low %v1709_v25, %v1713_v54 }
 0x1f4   :  { %4737 = vmatpush1.bf16.msra.mxu1 %v9350_v35  ;;  %4399 = vmatprep.subr.bf16.mxu0 %v9357_v16  ;;  %v9398_v35 = vcombine.low %v1693_v22, %v1697_v55  ;;  %v1708_v16 = vld [vmem:[#allocation8 + $0x950] sm:$0xff]  ;;  %v1730_v22 = vld [vmem:[#allocation11] sm:$0xff]  ;;  %v1742_v55 = vsub.s32 2, %v12294_v39 }
 0x1f5   :  { %4738 = vmatprep.subr.bf16.mxu1 %v9359_v37  ;;  %v1712_v37 = vld [vmem:[#allocation8 + $0x970] sm:$0xff] }
 0x1f6   :  { %4361 = vmatmul.mubr.bf16.gmra.mrb[60].mxu0 %v12113_v26  ;;  %v9413_v63 = vcombine.high %v1708_v16, %v1712_v37  ;;  %v9412_v2 = vcombine.low %v1708_v16, %v1712_v37  ;;  %v10862_v16 = vld [vmem:[#allocation13 + $0xa8] ss:$16 sps:$4 sm:$0xff]   ;;  %v10867_v37 = vld [vmem:[#allocation13 + $0xc4] ss:$16 sps:$4 sm:$0xff]  }
 0x1f7   :  { %4700 = vmatmul.mubr.bf16.gmra.mrb[60].mxu1 %v12113_v26  ;;  %4400 = vmatpush1.bf16.msra.mxu0 %v9356_v1  ;;  %v9381_v26 = vcombine.high %v1676_v18, %v1680_v62  ;;  %v9406_v1 = vcombine.low %v1701_v58, %v1705_v59  ;;  %v12311_v59 = vrot.slane %v1730_v22, %v1742_v55 }
 0x1f8   :  { %4739 = vmatpush1.bf16.msra.mxu1 %v9358_v49  ;;  %4401 = vmatprep.subr.bf16.mxu0 %v9365_v3  ;;  %v1720_v49 = vld [vmem:[#allocation8 + $0x9b0] sm:$0xff]  ;;  %v9415_v3 = vcombine.high %v1709_v25, %v1713_v54 }
 0x1f9   :  { %4740 = vmatprep.subr.bf16.mxu1 %v9367_v52  ;;  %4403 = vmatprep.mubr.bf16.mxu0 %v12116_v24  ;;  %v1717_v52 = vld [vmem:[#allocation8 + $0x998] sm:$0xff]  ;;  %v10870_v25 = vld [vmem:[#allocation13 + $0xcc] ss:$16 sps:$4 sm:$0xff]  }
 0x1fa   :  { %4742 = vmatprep.mubr.bf16.mxu1 %v12116_v24  ;;  %v9380_v24 = vcombine.low %v1676_v18, %v1680_v62  ;;  %v1729_v18 = vld [vmem:[#allocation8 + $0x9f8] sm:$0xff] }
 0x1fb   :  { %4402 = vmatpush1.bf16.msra.mxu0 %v9364_v47  ;;  %v1724_v47 = vld [vmem:[#allocation8 + $0x9d0] sm:$0xff] }
 0x1fc   :  { %4741 = vmatpush1.bf16.msra.mxu1 %v9366_v12  ;;  %4484 = vmatprep.subr.bf16.mxu0 %v9373_v13  ;;  %v1728_v12 = vld [vmem:[#allocation8 + $0x9f0] sm:$0xff]  ;;  %v9423_v13 = vcombine.high %v1717_v52, %v1721_v61 }
 0x1fd   :  { %4823 = vmatprep.subr.bf16.mxu1 %v9375_v15  ;;  %v1725_v15 = vld [vmem:[#allocation8 + $0x9d8] sm:$0xff]  ;;  %v9429_v62 = vcombine.high %v1724_v47, %v1728_v12  ;;  %v9428_v19 = vcombine.low %v1724_v47, %v1728_v12  ;;  %v10868_v47 = vld [vmem:[#allocation13 + $0xc8] ss:$16 sps:$4 sm:$0xff]  }
 0x1fe   :  { %4404 = vmatmul.mubr.bf16.vlgmr.msra.gmra.mrb[32].mxu0 %v12122_v45  ;;  %v9430_v20 = vcombine.low %v1725_v15, %v1729_v18  ;;  %v10873_v12 = vld [vmem:[#allocation13 + $0xe4] ss:$16 sps:$4 sm:$0xff]  }
 0x1ff   :  { %4743 = vmatmul.mubr.bf16.vlgmr.msra.gmra.mrb[32].mxu1 %v12122_v45  ;;  %4485 = vmatpush1.bf16.msra.mxu0 %v9372_v21  ;;  %v9388_v45 = vcombine.low %v1684_v31, %v1688_v51  ;;  %v9422_v21 = vcombine.low %v1717_v52, %v1721_v61  ;;  %v10834_v31 = vld [vmem:[#allocation13 + $0xc] ss:$16 sps:$4 sm:$0xff]   ;;  %v10841_v51 = vld [vmem:[#allocation13 + $0x40] ss:$16 sps:$4 sm:$0xff]  }
 0x200   :  { %4413 = vmatprep.mubr.bf16.mxu0 %v12126_v53  ;;  %4752 = vmatprep.mubr.bf16.mxu1 %v12126_v53  ;;  %v1704_v53 = vld [vmem:[#allocation8 + $0x930] sm:$0xff]  ;;  %v10865_v52 = vld [vmem:[#allocation13 + $0xc0] ss:$16 sps:$4 sm:$0xff]  }
 0x201   :  { %4486 = vmatprep.subr.bf16.mxu0 %v9381_v26  ;;  %4824 = vmatpush1.bf16.msra.mxu1 %v9374_v36  ;;  %v9405_v17 = vcombine.high %v1700_v56, %v1704_v53  ;;  %v10831_v26 = vld [vmem:[#allocation13 + $0x4] ss:$16 sps:$4 sm:$0xff]   ;;  %v10844_v36 = vld [vmem:[#allocation13 + $0x48] ss:$16 sps:$4 sm:$0xff]  }
 0x202   :  { %4825 = vmatprep.subr.bf16.mxu1 %v9383_v28  ;;  %v10849_v28 = vld [vmem:[#allocation13 + $0x64] ss:$16 sps:$4 sm:$0xff]  }
 0x203   :  { %4487 = vmatpush1.bf16.msra.mxu0 %v9380_v24  ;;  %v10852_v24 = vld [vmem:[#allocation13 + $0x6c] ss:$16 sps:$4 sm:$0xff]  }
 0x204   :  { %4488 = vmatprep.subr.bf16.mxu0 %v9389_v14  ;;  %v10847_v14 = vld [vmem:[#allocation13 + $0x60] ss:$16 sps:$4 sm:$0xff]  }
 0x205   :  { %4826 = vmatpush1.bf16.msra.mxu1 %v9382_v30  ;;  %v10850_v30 = vld [vmem:[#allocation13 + $0x68] ss:$16 sps:$4 sm:$0xff]  }
 0x206   :  { %4414 = vmatmul.mubr.bf16.gmra.mrb[36].mxu0 %v12133_v7  ;;  %4827 = vmatprep.subr.bf16.mxu1 %v9391_v9  ;;  %v12299_v9 = vsub.s32 0, %v12294_v39 }
 0x207   :  { %4753 = vmatmul.mubr.bf16.gmra.mrb[36].mxu1 %v12133_v7  ;;  %4423 = vmatprep.mubr.bf16.mxu0 %v12136_v11  ;;  %v9404_v7 = vcombine.low %v1700_v56, %v1704_v53  ;;  %v10861_v56 = vld [vmem:[#allocation13 + $0xa4] ss:$16 sps:$4 sm:$0xff]   ;;  %v10864_v53 = vld [vmem:[#allocation13 + $0xac] ss:$16 sps:$4 sm:$0xff]  }
 0x208   :  { %4762 = vmatprep.mubr.bf16.mxu1 %v12136_v11  ;;  %4489 = vmatpush1.bf16.msra.mxu0 %v9388_v45  ;;  %v1716_v11 = vld [vmem:[#allocation8 + $0x990] sm:$0xff]  ;;  %v12303_v45 = vsub.s32 1, %v12294_v39  ;;  %v12307_v58 = vrot.slane %v1730_v22, %v12299_v9 }
 0x209   :  { %4490 = vmatprep.subr.bf16.mxu0 %v9397_v0  ;;  %4828 = vmatpush1.bf16.msra.mxu1 %v9390_v27  ;;  %v9421_v50 = vcombine.high %v1716_v11, %v1720_v49  ;;  %v10856_v0 = vld [vmem:[#allocation13 + $0x88] ss:$16 sps:$4 sm:$0xff]   ;;  %v1746_v27 = vsub.s32 3, %v12294_v39 }
 0x20a   :  { %4829 = vmatprep.subr.bf16.mxu1 %v9399_v57  ;;  %v11337_v57 = vld [vmem:[#allocation26 + $0x60] ss:$20 sps:$4 sm:$0xff]  }
 0x20c   :  { %4491 = vmatpush1.bf16.msra.mxu0 %v9396_v42  ;;  %v12314_v42 = vrot.slane %v1730_v22, %v12303_v45 }
 0x20d   :  { %4492 = vmatprep.subr.bf16.mxu0 %v9405_v17  ;;  %4830 = vmatpush1.bf16.msra.mxu1 %v9398_v35  ;;  %v10859_v17 = vld [vmem:[#allocation13 + $0xa0] ss:$16 sps:$4 sm:$0xff]   ;;  %v12318_v35 = vrot.slane %v1730_v22, %v1746_v27 }
 0x20e   :  { %4424 = vmatmul.mubr.bf16.gmra.mrb[40].mxu0 %v12143_v41  ;;  %4831 = vmatprep.subr.bf16.mxu1 %v9407_v46  ;;  %v10877_v22 = vld [vmem:[#allocation13 + $0x100] ss:$16 sps:$4 sm:$0xff]  }
 0x20f   :  { %4763 = vmatmul.mubr.bf16.gmra.mrb[40].mxu1 %v12143_v41  ;;  %4433 = vmatprep.mubr.bf16.mxu0 %v12146_v43  ;;  %v9420_v41 = vcombine.low %v1716_v11, %v1720_v49 }
 0x210   :  { %4772 = vmatprep.mubr.bf16.mxu1 %v12146_v43  ;;  %4493 = vmatpush1.bf16.msra.mxu0 %v9404_v7  ;;  %v9431_v43 = vcombine.high %v1725_v15, %v1729_v18 }
 0x211   :  { %4494 = vmatprep.subr.bf16.mxu0 %v9413_v63  ;;  %4832 = vmatpush1.bf16.msra.mxu1 %v9406_v1 }
 0x212   :  { %4833 = vmatprep.subr.bf16.mxu1 %v9415_v3 }
 0x214   :  { %4495 = vmatpush1.bf16.msra.mxu0 %v9412_v2 }
 0x215   :  { %4496 = vmatprep.subr.bf16.mxu0 %v9421_v50  ;;  %4834 = vmatpush1.bf16.msra.mxu1 %v9414_v5 }
 0x216   :  { %4434 = vmatmul.mubr.bf16.gmra.mrb[44].mxu0 %v12153_v6  ;;  %4835 = vmatprep.subr.bf16.mxu1 %v9423_v13 }
 0x217   :  { %4773 = vmatmul.mubr.bf16.gmra.mrb[44].mxu1 %v12153_v6  ;;  %4443 = vmatprep.mubr.bf16.mxu0 %v12156_v10  ;;  %v10829_v6 = vld [vmem:[#allocation13] ss:$16 sps:$4 sm:$0xff]  }
 0x218   :  { %4782 = vmatprep.mubr.bf16.mxu1 %v12156_v10  ;;  %4497 = vmatpush1.bf16.msra.mxu0 %v9420_v41  ;;  %v10832_v10 = vld [vmem:[#allocation13 + $0x8] ss:$16 sps:$4 sm:$0xff]   ;;  %v10876_v41 = vld [vmem:[#allocation13 + $0xec] ss:$16 sps:$4 sm:$0xff]  }
 0x219   :  { %4498 = vmatprep.subr.bf16.mxu0 %v9429_v62  ;;  %4836 = vmatpush1.bf16.msra.mxu1 %v9422_v21 }
 0x21a   :  { %4837 = vmatprep.subr.bf16.mxu1 %v9431_v43 }
 0x21c   :  { %4499 = vmatpush1.bf16.msra.mxu0 %v9428_v19  ;;  %v11338_v19 = vld [vmem:[#allocation26 + $0x88] ss:$20 sps:$4 sm:$0xff]  }
 0x21d   :  { %4838 = vmatpush1.bf16.msra.mxu1 %v9430_v20  ;;  %6686 = vmatprep.subr.bf16.mxu0 %v10831_v26 }
 0x21e   :  { %4444 = vmatmul.mubr.bf16.gmra.mrb[48].mxu0 %v12173_v4  ;;  %7138 = vmatprep.subr.bf16.mxu1 %v10834_v31 }
 0x21f   :  { %4783 = vmatmul.mubr.bf16.gmra.mrb[48].mxu1 %v12173_v4  ;;  %4453 = vmatprep.mubr.bf16.mxu0 %v12178_v34  ;;  %v10837_v4 = vld [vmem:[#allocation13 + $0x24] ss:$16 sps:$4 sm:$0xff]  }
 0x220   :  { %4792 = vmatprep.mubr.bf16.mxu1 %v12178_v34  ;;  %v10840_v34 = vld [vmem:[#allocation13 + $0x2c] ss:$16 sps:$4 sm:$0xff]  }
 0x226   :  { %4454 = vmatmul.mubr.bf16.gmra.mrb[52].mxu0 %v12185_v38 }
 0x227   :  { %4793 = vmatmul.mubr.bf16.gmra.mrb[52].mxu1 %v12185_v38  ;;  %4463 = vmatprep.mubr.bf16.mxu0 %v12188_v40  ;;  %v11335_v38 = vld [vmem:[#allocation26 + $0x10] ss:$20 sps:$4 sm:$0xff]  }
 0x228   :  { %4802 = vmatprep.mubr.bf16.mxu1 %v12188_v40  ;;  %v10835_v40 = vld [vmem:[#allocation13 + $0x20] ss:$16 sps:$4 sm:$0xff]  }
 0x22e   :  { %4464 = vmatmul.mubr.bf16.gmra.mrb[56].mxu0 %v12195_v44 }
 0x22f   :  { %4803 = vmatmul.mubr.bf16.gmra.mrb[56].mxu1 %v12195_v44  ;;  %4473 = vmatprep.mubr.bf16.mxu0 %v12198_v48  ;;  %v10838_v44 = vld [vmem:[#allocation13 + $0x28] ss:$16 sps:$4 sm:$0xff]  }
 0x230   :  { %4812 = vmatprep.mubr.bf16.mxu1 %v12198_v48  ;;  %v10843_v48 = vld [vmem:[#allocation13 + $0x44] ss:$16 sps:$4 sm:$0xff]  }
 0x236   :  { %4474 = vmatmul.mubr.bf16.gmra.mrb[60].mxu0 %v12205_v8 }
 0x237   :  { %4813 = vmatmul.mubr.bf16.gmra.mrb[60].mxu1 %v12205_v8  ;;  %4516 = vmatprep.mubr.bf16.mxu0 %v11618_v23  ;;  %v10846_v8 = vld [vmem:[#allocation13 + $0x4c] ss:$16 sps:$4 sm:$0xff]  }
 0x238   :  { %4855 = vmatprep.mubr.bf16.mxu1 %v11618_v23 }
 0x23e   :  { %4517 = vmatmul.mubr.bf16.vlgmr.msra.gmra.mrb[32].mxu0 %v11335_v38 }
 0x23f   :  { %4856 = vmatmul.mubr.bf16.vlgmr.msra.gmra.mrb[32].mxu1 %v11335_v38  ;;  %6687 = vmatpush1.bf16.msra.mxu0 %v10829_v6 }
 0x240   :  { %7139 = vmatpush1.bf16.msra.mxu1 %v10832_v10  ;;  %6688 = vmatprep.subr.bf16.mxu0 %v10837_v4  ;;  %v10871_v10 = vld [vmem:[#allocation13 + $0xe0] ss:$16 sps:$4 sm:$0xff]  }
 0x241   :  { %7140 = vmatprep.subr.bf16.mxu1 %v10840_v34  ;;  %4526 = vmatprep.mubr.bf16.mxu0 %v11618_v23 }
 0x242   :  { %4865 = vmatprep.mubr.bf16.mxu1 %v11618_v23 }
 0x243   :  { %6689 = vmatpush1.bf16.msra.mxu0 %v10835_v40  ;;  %v10874_v40 = vld [vmem:[#allocation13 + $0xe8] ss:$16 sps:$4 sm:$0xff]  }
 0x244   :  { %7141 = vmatpush1.bf16.msra.mxu1 %v10838_v44  ;;  %6690 = vmatprep.subr.bf16.mxu0 %v10843_v48  ;;  %v10879_v44 = vld [vmem:[#allocation13 + $0x104] ss:$16 sps:$4 sm:$0xff]  }
 0x245   :  { %7142 = vmatprep.subr.bf16.mxu1 %v10846_v8 }
 0x246   :  { %4527 = vmatmul.mubr.bf16.gmra.mrb[36].mxu0 %v11336_v29 }
 0x247   :  { %4866 = vmatmul.mubr.bf16.gmra.mrb[36].mxu1 %v11336_v29  ;;  %6691 = vmatpush1.bf16.msra.mxu0 %v10841_v51 }
 0x248   :  { %7143 = vmatpush1.bf16.msra.mxu1 %v10844_v36  ;;  %6692 = vmatprep.subr.bf16.mxu0 %v10849_v28  ;;  %v10882_v36 = vld [vmem:[#allocation13 + $0x10c] ss:$16 sps:$4 sm:$0xff]  }
 0x249   :  { %7144 = vmatprep.subr.bf16.mxu1 %v10852_v24  ;;  %4536 = vmatprep.mubr.bf16.mxu0 %v11618_v23 }
 0x24a   :  { %4875 = vmatprep.mubr.bf16.mxu1 %v11618_v23 }
 0x24b   :  { %6693 = vmatpush1.bf16.msra.mxu0 %v10847_v14 }
 0x24c   :  { %7145 = vmatpush1.bf16.msra.mxu1 %v10850_v30  ;;  %6694 = vmatprep.subr.bf16.mxu0 %v10855_v33 }
 0x24d   :  { %7146 = vmatprep.subr.bf16.mxu1 %v10858_v60 }
 0x24e   :  { %4537 = vmatmul.mubr.bf16.gmra.mrb[40].mxu0 %v11337_v57 }
 0x24f   :  { %4876 = vmatmul.mubr.bf16.gmra.mrb[40].mxu1 %v11337_v57  ;;  %6695 = vmatpush1.bf16.msra.mxu0 %v10853_v32 }
 0x250   :  { %7147 = vmatpush1.bf16.msra.mxu1 %v10856_v0  ;;  %6696 = vmatprep.subr.bf16.mxu0 %v10861_v56 }
 0x251   :  { %v3840_v46 = vpop.f32.mrb[0].mxu0  ;;  %7148 = vmatprep.subr.bf16.mxu1 %v10864_v53  ;;  %4546 = vmatprep.mubr.bf16.mxu0 %v11618_v23 }
 0x252   :  { %v10068_v54 = vadd.f32 %v3840_v46, %v12307_v58  ;;  %v4179_v7 = vpop.f32.mrb[0].mxu1  ;;  %v3842_v63 = vpop.f32.mrb[1].mxu0  ;;  %4885 = vmatprep.mubr.bf16.mxu1 %v11618_v23 }
 0x253   :  { %v10100_v1 = vadd.f32 %v4179_v7, %v12311_v59  ;;  %v10069_v11 = vadd.f32 %v3842_v63, %v12314_v42  ;;  %v4181_v49 = vpop.f32.mrb[1].mxu1  ;;  %v3844_v3 = vpop.f32.mrb[2].mxu0  ;;  %6697 = vmatpush1.bf16.msra.mxu0 %v10859_v17  ;;  %v10880_v17 = vld [vmem:[#allocation13 + $0x108] ss:$16 sps:$4 sm:$0xff]  }
 0x254   :  { %v10101_v61 = vadd.f32 %v4181_v49, %v12318_v35  ;;  %v10070_v2 = vadd.f32 %v3844_v3, %v12307_v58  ;;  %v4183_v50 = vpop.f32.mrb[2].mxu1  ;;  %7149 = vmatpush1.bf16.msra.mxu1 %v10862_v16  ;;  %v3846_v5 = vpop.f32.mrb[3].mxu0  ;;  %6698 = vmatprep.subr.bf16.mxu0 %v10867_v37  ;;  %v4936_v62 = vmax.f32 %v10068_v54, 0.0  ;;  %v10885_v16 = vld [vmem:[#allocation13 + $0x124] ss:$16 sps:$4 sm:$0xff]  }
 0x255   :  { %v10102_v13 = vadd.f32 %v4183_v50, %v12311_v59  ;;  %v10071_v15 = vadd.f32 %v3846_v5, %v12314_v42  ;;  %v4185_v18 = vpop.f32.mrb[3].mxu1  ;;  %7150 = vmatprep.subr.bf16.mxu1 %v10870_v25  ;;  %v4938_v20 = vmax.f32 %v10100_v1, 0.0  ;;  %v4937_v26 = vmax.f32 %v10069_v11, 0.0  ;;  %v10888_v54 = vld [vmem:[#allocation13 + $0x12c] ss:$16 sps:$4 sm:$0xff]  }
 0x256   :  { %v4944_v21 = vmax.f32 %v10070_v2, 0.0  ;;  %v10103_v43 = vadd.f32 %v4185_v18, %v12318_v35  ;;  %4547 = vmatmul.mubr.bf16.gmra.mrb[44].mxu0 %v11338_v19  ;;  %v4939_v4 = vmax.f32 %v10101_v61, 0.0  ;;  %v11339_v11 = vld [vmem:[#allocation26 + $0xb0] ss:$20 sps:$4 sm:$0xff]  }
 0x257   :  { %v4946_v31 = vmax.f32 %v10102_v13, 0.0  ;;  %v4945_v6 = vmax.f32 %v10071_v15, 0.0  ;;  %4886 = vmatmul.mubr.bf16.gmra.mrb[44].mxu1 %v11338_v19  ;;  %6699 = vmatpush1.bf16.msra.mxu0 %v10865_v52  ;;  %v10883_v2 = vld [vmem:[#allocation13 + $0x120] ss:$16 sps:$4 sm:$0xff]   ;;  %v10891_v13 = vld [vmem:[#allocation13 + $0x144] ss:$16 sps:$4 sm:$0xff]  }
 0x258   :  { %v12330_v34 = vpack.c.bf16 %v4944_v21, %v4936_v62  ;;  %v4947_v38 = vmax.f32 %v10103_v43, 0.0  ;;  %7151 = vmatpush1.bf16.msra.mxu1 %v10868_v47  ;;  %6700 = vmatprep.subr.bf16.mxu0 %v10873_v12  ;;  %v10886_v12 = vld [vmem:[#allocation13 + $0x128] ss:$16 sps:$4 sm:$0xff]   ;;  %v10894_v62 = vld [vmem:[#allocation13 + $0x14c] ss:$16 sps:$4 sm:$0xff]  }
 0x259   :  { %v12332_v48 = vpack.c.bf16 %v4946_v31, %v4938_v20  ;;  %v12334_v8 = vpack.c.bf16 %v4945_v6, %v4937_v26  ;;  %v3850_v51 = vpop.f32.mrb[4].mxu0  ;;  %7152 = vmatprep.subr.bf16.mxu1 %v10876_v41  ;;  %4556 = vmatprep.mubr.bf16.mxu0 %v11618_v23 }
 0x25a   :  { %v12337_v28 = vpack.c.bf16 %v4947_v38, %v4939_v4  ;;  %v10072_v24 = vadd.f32 %v3850_v51, %v12307_v58  ;;  %v4189_v29 = vpop.f32.mrb[4].mxu1  ;;  %v3852_v14 = vpop.f32.mrb[5].mxu0  ;;  %4895 = vmatprep.mubr.bf16.mxu1 %v11618_v23  ;;  %v10889_v4 = vld [vmem:[#allocation13 + $0x140] ss:$16 sps:$4 sm:$0xff]  }
 0x25b   :  { %v10104_v30 = vadd.f32 %v4189_v29, %v12311_v59  ;;  %v10073_v33 = vadd.f32 %v3852_v14, %v12314_v42  ;;  %v4191_v60 = vpop.f32.mrb[5].mxu1  ;;  %v3854_v32 = vpop.f32.mrb[6].mxu0  ;;  %6701 = vmatpush1.bf16.msra.mxu0 %v10871_v10 }
 0x25c   :  { %v10105_v0 = vadd.f32 %v4191_v60, %v12318_v35  ;;  %v10074_v56 = vadd.f32 %v3854_v32, %v12307_v58  ;;  %v4193_v53 = vpop.f32.mrb[6].mxu1  ;;  %7153 = vmatpush1.bf16.msra.mxu1 %v10874_v40  ;;  %v3856_v57 = vpop.f32.mrb[7].mxu0  ;;  %6702 = vmatprep.subr.bf16.mxu0 %v10879_v44  ;;  %v4952_v7 = vmax.f32 %v10072_v24, 0.0  ;;  %v10897_v24 = vld [vmem:[#allocation13 + $0x164] ss:$16 sps:$4 sm:$0xff]  }
 0x25d   :  { %v10106_v37 = vadd.f32 %v4193_v53, %v12311_v59  ;;  %v10075_v46 = vadd.f32 %v3856_v57, %v12314_v42  ;;  %v4195_v25 = vpop.f32.mrb[7].mxu1  ;;  %7154 = vmatprep.subr.bf16.mxu1 %v10882_v36  ;;  %v4954_v49 = vmax.f32 %v10104_v30, 0.0  ;;  %v4953_v3 = vmax.f32 %v10073_v33, 0.0  ;;  %v10892_v36 = vld [vmem:[#allocation13 + $0x148] ss:$16 sps:$4 sm:$0xff]  }
 0x25e   :  { %v4960_v63 = vmax.f32 %v10074_v56, 0.0  ;;  %v10107_v1 = vadd.f32 %v4195_v25, %v12318_v35  ;;  %4557 = vmatmul.mubr.bf16.gmra.mrb[48].mxu0 %v11339_v11  ;;  %v4955_v50 = vmax.f32 %v10105_v0, 0.0  ;;  %v10900_v33 = vld [vmem:[#allocation13 + $0x16c] ss:$16 sps:$4 sm:$0xff]   ;;  %v11340_v0 = vld [vmem:[#allocation26 + $0xd8] ss:$20 sps:$4 sm:$0xff]  }
 0x25f   :  { %v4962_v52 = vmax.f32 %v10106_v37, 0.0  ;;  %v4961_v61 = vmax.f32 %v10075_v46, 0.0  ;;  %4896 = vmatmul.mubr.bf16.gmra.mrb[48].mxu1 %v11339_v11  ;;  %6703 = vmatpush1.bf16.msra.mxu0 %v10877_v22 }
 0x260   :  { %v12348_v5 = vpack.c.bf16 %v4960_v63, %v4952_v7  ;;  %v4963_v47 = vmax.f32 %v10107_v1, 0.0  ;;  %7155 = vmatpush1.bf16.msra.mxu1 %v10880_v17  ;;  %6704 = vmatprep.subr.bf16.mxu0 %v10885_v16  ;;  %v10895_v16 = vld [vmem:[#allocation13 + $0x160] ss:$16 sps:$4 sm:$0xff]   ;;  %v10903_v7 = vld [vmem:[#allocation13 + $0x184] ss:$16 sps:$4 sm:$0xff]  }
 0x261   :  { %v12350_v15 = vpack.c.bf16 %v4962_v52, %v4954_v49  ;;  %v12352_v18 = vpack.c.bf16 %v4961_v61, %v4953_v3  ;;  %v3860_v41 = vpop.f32.mrb[8].mxu0  ;;  %7156 = vmatprep.subr.bf16.mxu1 %v10888_v54  ;;  %4566 = vmatprep.mubr.bf16.mxu0 %v11618_v23  ;;  %v10898_v54 = vld [vmem:[#allocation13 + $0x168] ss:$16 sps:$4 sm:$0xff]   ;;  %v10906_v49 = vld [vmem:[#allocation13 + $0x18c] ss:$16 sps:$4 sm:$0xff]  }
 0x262   :  { %v12355_v21 = vpack.c.bf16 %v4963_v47, %v4955_v50  ;;  %v10076_v43 = vadd.f32 %v3860_v41, %v12307_v58  ;;  %v4199_v19 = vpop.f32.mrb[8].mxu1  ;;  %v3862_v20 = vpop.f32.mrb[9].mxu0  ;;  %4905 = vmatprep.mubr.bf16.mxu1 %v11618_v23  ;;  %v10901_v41 = vld [vmem:[#allocation13 + $0x180] ss:$16 sps:$4 sm:$0xff]  }
 0x263   :  { %v10108_v26 = vadd.f32 %v4199_v19, %v12311_v59  ;;  %v10077_v31 = vadd.f32 %v3862_v20, %v12314_v42  ;;  %v4201_v6 = vpop.f32.mrb[9].mxu1  ;;  %v3864_v10 = vpop.f32.mrb[10].mxu0  ;;  %6705 = vmatpush1.bf16.msra.mxu0 %v10883_v2 }
 0x264   :  { %v10109_v38 = vadd.f32 %v4201_v6, %v12318_v35  ;;  %v10078_v40 = vadd.f32 %v3864_v10, %v12307_v58  ;;  %v4203_v44 = vpop.f32.mrb[10].mxu1  ;;  %7157 = vmatpush1.bf16.msra.mxu1 %v10886_v12  ;;  %v3866_v51 = vpop.f32.mrb[11].mxu0  ;;  %6706 = vmatprep.subr.bf16.mxu0 %v10891_v13  ;;  %v4968_v60 = vmax.f32 %v10076_v43, 0.0 }
 0x265   :  { %v10110_v29 = vadd.f32 %v4203_v44, %v12311_v59  ;;  %v10079_v14 = vadd.f32 %v3866_v51, %v12314_v42  ;;  %v4205_v30 = vpop.f32.mrb[11].mxu1  ;;  %7158 = vmatprep.subr.bf16.mxu1 %v10894_v62  ;;  %v4970_v56 = vmax.f32 %v10108_v26, 0.0  ;;  %v4969_v53 = vmax.f32 %v10077_v31, 0.0  ;;  %v10904_v26 = vld [vmem:[#allocation13 + $0x188] ss:$16 sps:$4 sm:$0xff]  }
 0x266   :  { %v4976_v32 = vmax.f32 %v10078_v40, 0.0  ;;  %v10111_v22 = vadd.f32 %v4205_v30, %v12318_v35  ;;  %4567 = vmatmul.mubr.bf16.gmra.mrb[52].mxu0 %v11340_v0  ;;  %v4971_v37 = vmax.f32 %v10109_v38, 0.0  ;;  %v10909_v31 = vld [vmem:[#allocation13 + $0x1a4] ss:$16 sps:$4 sm:$0xff]   ;;  %v10912_v38 = vld [vmem:[#allocation13 + $0x1ac] ss:$16 sps:$4 sm:$0xff]  }
 0x267   :  { %v4978_v57 = vmax.f32 %v10110_v29, 0.0  ;;  %v4977_v17 = vmax.f32 %v10079_v14, 0.0  ;;  %4906 = vmatmul.mubr.bf16.gmra.mrb[52].mxu1 %v11340_v0  ;;  %6707 = vmatpush1.bf16.msra.mxu0 %v10889_v4  ;;  %v10910_v0 = vld [vmem:[#allocation13 + $0x1a8] ss:$16 sps:$4 sm:$0xff]  }
 0x268   :  { %v12366_v46 = vpack.c.bf16 %v4976_v32, %v4968_v60  ;;  %v4979_v25 = vmax.f32 %v10111_v22, 0.0  ;;  %7159 = vmatpush1.bf16.msra.mxu1 %v10892_v36  ;;  %6708 = vmatprep.subr.bf16.mxu0 %v10897_v24  ;;  %v11341_v36 = vld [vmem:[#allocation26 + $0x100] ss:$20 sps:$4 sm:$0xff]  }
 0x269   :  { %v12368_v63 = vpack.c.bf16 %v4978_v57, %v4970_v56  ;;  %v12370_v1 = vpack.c.bf16 %v4977_v17, %v4969_v53  ;;  %v3870_v11 = vpop.f32.mrb[12].mxu0  ;;  %7160 = vmatprep.subr.bf16.mxu1 %v10900_v33  ;;  %4576 = vmatprep.mubr.bf16.mxu0 %v11618_v23  ;;  %v10907_v33 = vld [vmem:[#allocation13 + $0x1a0] ss:$16 sps:$4 sm:$0xff]   ;;  %v10915_v56 = vld [vmem:[#allocation13 + $0x1c4] ss:$16 sps:$4 sm:$0xff]  }
 0x26a   :  { %v12373_v3 = vpack.c.bf16 %v4979_v25, %v4971_v37  ;;  %v10080_v52 = vadd.f32 %v3870_v11, %v12307_v58  ;;  %v4209_v61 = vpop.f32.mrb[12].mxu1  ;;  %v3872_v2 = vpop.f32.mrb[13].mxu0  ;;  %4915 = vmatprep.mubr.bf16.mxu1 %v11618_v23 }
 0x26b   :  { %v10112_v50 = vadd.f32 %v4209_v61, %v12311_v59  ;;  %v10081_v47 = vadd.f32 %v3872_v2, %v12314_v42  ;;  %v4211_v12 = vpop.f32.mrb[13].mxu1  ;;  %v3874_v13 = vpop.f32.mrb[14].mxu0  ;;  %6709 = vmatpush1.bf16.msra.mxu0 %v10895_v16  ;;  %v10918_v16 = vld [vmem:[#allocation13 + $0x1cc] ss:$16 sps:$4 sm:$0xff]   ;;  %v10913_v2 = vld [vmem:[#allocation13 + $0x1c0] ss:$16 sps:$4 sm:$0xff]  }
 0x26c   :  { %v10113_v62 = vadd.f32 %v4211_v12, %v12318_v35  ;;  %v10082_v43 = vadd.f32 %v3874_v13, %v12307_v58  ;;  %v4213_v19 = vpop.f32.mrb[14].mxu1  ;;  %7161 = vmatpush1.bf16.msra.mxu1 %v10898_v54  ;;  %v3876_v20 = vpop.f32.mrb[15].mxu0  ;;  %6710 = vmatprep.subr.bf16.mxu0 %v10903_v7  ;;  %v4984_v40 = vmax.f32 %v10080_v52, 0.0 }
 0x26d   :  { %v10114_v6 = vadd.f32 %v4213_v19, %v12311_v59  ;;  %v10083_v10 = vadd.f32 %v3876_v20, %v12314_v42  ;;  %v4215_v4 = vpop.f32.mrb[15].mxu1  ;;  %7162 = vmatprep.subr.bf16.mxu1 %v10906_v49  ;;  %v4986_v24 = vmax.f32 %v10112_v50, 0.0  ;;  %v4985_v29 = vmax.f32 %v10081_v47, 0.0  ;;  %v10921_v20 = vld [vmem:[#allocation13 + $0x1e4] ss:$16 sps:$4 sm:$0xff]  }
 0x26e   :  { %v4992_v44 = vmax.f32 %v10082_v43, 0.0  ;;  %v10115_v51 = vadd.f32 %v4215_v4, %v12318_v35  ;;  %4577 = vmatmul.mubr.bf16.gmra.mrb[56].mxu0 %v11341_v36  ;;  %v4987_v60 = vmax.f32 %v10113_v62, 0.0  ;;  %v10924_v4 = vld [vmem:[#allocation13 + $0x1ec] ss:$16 sps:$4 sm:$0xff]  }
 0x26f   :  { %v4994_v14 = vmax.f32 %v10114_v6, 0.0  ;;  %v4993_v30 = vmax.f32 %v10083_v10, 0.0  ;;  %4916 = vmatmul.mubr.bf16.gmra.mrb[56].mxu1 %v11341_v36  ;;  %6711 = vmatpush1.bf16.msra.mxu0 %v10901_v41  ;;  %v10916_v41 = vld [vmem:[#allocation13 + $0x1c8] ss:$16 sps:$4 sm:$0xff]   ;;  %v10919_v36 = vld [vmem:[#allocation13 + $0x1e0] ss:$16 sps:$4 sm:$0xff]  }
 0x270   :  { %v12384_v32 = vpack.c.bf16 %v4992_v44, %v4984_v40  ;;  %v4995_v22 = vmax.f32 %v10115_v51, 0.0  ;;  %7163 = vmatpush1.bf16.msra.mxu1 %v10904_v26  ;;  %6712 = vmatprep.subr.bf16.mxu0 %v10909_v31  ;;  %v11342_v10 = vld [vmem:[#allocation26 + $0x128] ss:$20 sps:$4 sm:$0xff]  }
 0x271   :  { %v12386_v53 = vpack.c.bf16 %v4994_v14, %v4986_v24  ;;  %v12388_v57 = vpack.c.bf16 %v4993_v30, %v4985_v29  ;;  %v3880_v17 = vpop.f32.mrb[16].mxu0  ;;  %7164 = vmatprep.subr.bf16.mxu1 %v10912_v38  ;;  %4586 = vmatprep.mubr.bf16.mxu0 %v11618_v23  ;;  %v10922_v30 = vld [vmem:[#allocation13 + $0x1e8] ss:$16 sps:$4 sm:$0xff]  }
 0x272   :  { %v12391_v37 = vpack.c.bf16 %v4995_v22, %v4987_v60  ;;  %v10084_v25 = vadd.f32 %v3880_v17, %v12307_v58  ;;  %v4219_v54 = vpop.f32.mrb[16].mxu1  ;;  %v3882_v7 = vpop.f32.mrb[17].mxu0  ;;  %4925 = vmatprep.mubr.bf16.mxu1 %v11618_v23 }
 0x273   :  { %v10116_v11 = vadd.f32 %v4219_v54, %v12311_v59  ;;  %v10085_v49 = vadd.f32 %v3882_v7, %v12314_v42  ;;  %v4221_v52 = vpop.f32.mrb[17].mxu1  ;;  %v3884_v61 = vpop.f32.mrb[18].mxu0  ;;  %6713 = vmatpush1.bf16.msra.mxu0 %v10907_v33  ;;  %v10927_v33 = vld [vmem:[#allocation13 + $0x204] ss:$16 sps:$4 sm:$0xff]  }
 0x274   :  { %v10117_v50 = vadd.f32 %v4221_v52, %v12318_v35  ;;  %v10086_v47 = vadd.f32 %v3884_v61, %v12307_v58  ;;  %v4223_v12 = vpop.f32.mrb[18].mxu1  ;;  %7165 = vmatpush1.bf16.msra.mxu1 %v10910_v0  ;;  %v3886_v13 = vpop.f32.mrb[19].mxu0  ;;  %6714 = vmatprep.subr.bf16.mxu0 %v10915_v56  ;;  %v5000_v26 = vmax.f32 %v10084_v25, 0.0  ;;  %v10930_v56 = vld [vmem:[#allocation13 + $0x20c] ss:$16 sps:$4 sm:$0xff]  }
 0x275   :  { %v10118_v62 = vadd.f32 %v4223_v12, %v12311_v59  ;;  %v10087_v43 = vadd.f32 %v3886_v13, %v12314_v42  ;;  %v4225_v19 = vpop.f32.mrb[19].mxu1  ;;  %7166 = vmatprep.subr.bf16.mxu1 %v10918_v16  ;;  %v5002_v38 = vmax.f32 %v10116_v11, 0.0  ;;  %v5001_v40 = vmax.f32 %v10085_v49, 0.0 }
 0x276   :  { %v5008_v31 = vmax.f32 %v10086_v47, 0.0  ;;  %v10119_v6 = vadd.f32 %v4225_v19, %v12318_v35  ;;  %4587 = vmatmul.mubr.bf16.gmra.mrb[60].mxu0 %v11342_v10  ;;  %v5003_v24 = vmax.f32 %v10117_v50, 0.0  ;;  %v10925_v47 = vld [vmem:[#allocation13 + $0x200] ss:$16 sps:$4 sm:$0xff]  }
 0x277   :  { %v5010_v44 = vmax.f32 %v10118_v62, 0.0  ;;  %v5009_v51 = vmax.f32 %v10087_v43, 0.0  ;;  %4926 = vmatmul.mubr.bf16.gmra.mrb[60].mxu1 %v11342_v10  ;;  %6715 = vmatpush1.bf16.msra.mxu0 %v10913_v2  ;;  %v10928_v62 = vld [vmem:[#allocation13 + $0x208] ss:$16 sps:$4 sm:$0xff]   ;;  %v10933_v43 = vld [vmem:[#allocation13 + $0x224] ss:$16 sps:$4 sm:$0xff]  }
 0x278   :  { %v12402_v29 = vpack.c.bf16 %v5008_v31, %v5000_v26  ;;  %v5011_v14 = vmax.f32 %v10119_v6, 0.0  ;;  %6718 = vmatprep.mubr.bf16.mxu0 %v12334_v8  ;;  %7167 = vmatpush1.bf16.msra.mxu1 %v10916_v41  ;;  %v10936_v31 = vld [vmem:[#allocation13 + $0x22c] ss:$16 sps:$4 sm:$0xff]  }
 0x279   :  { %v12405_v60 = vpack.c.bf16 %v5010_v44, %v5002_v38  ;;  %v12407_v22 = vpack.c.bf16 %v5009_v51, %v5001_v40  ;;  %7170 = vmatprep.mubr.bf16.mxu1 %v12334_v8  ;;  %v3890_v0 = vpop.f32.mrb[20].mxu0  ;;  %6716 = vmatprep.subr.bf16.mxu0 %v10921_v20 }
 0x27a   :  { %v12410_v17 = vpack.c.bf16 %v5011_v14, %v5003_v24  ;;  %v10088_v16 = vadd.f32 %v3890_v0, %v12307_v58  ;;  %v4229_v25 = vpop.f32.mrb[20].mxu1  ;;  %v3892_v54 = vpop.f32.mrb[21].mxu0  ;;  %7168 = vmatprep.subr.bf16.mxu1 %v10924_v4  ;;  %v10939_v0 = vld [vmem:[#allocation13 + $0x244] ss:$16 sps:$4 sm:$0xff]  }
 0x27b   :  { %v10120_v7 = vadd.f32 %v4229_v25, %v12311_v59  ;;  %v10089_v11 = vadd.f32 %v3892_v54, %v12314_v42  ;;  %v4231_v49 = vpop.f32.mrb[21].mxu1  ;;  %v3894_v52 = vpop.f32.mrb[22].mxu0  ;;  %6717 = vmatpush1.bf16.msra.mxu0 %v10919_v36  ;;  %v10931_v36 = vld [vmem:[#allocation13 + $0x220] ss:$16 sps:$4 sm:$0xff]   ;;  %v10942_v54 = vld [vmem:[#allocation13 + $0x24c] ss:$16 sps:$4 sm:$0xff]  }
 0x27c   :  { %v10121_v61 = vadd.f32 %v4231_v49, %v12318_v35  ;;  %v10090_v8 = vadd.f32 %v3894_v52, %v12307_v58  ;;  %v4233_v2 = vpop.f32.mrb[22].mxu1  ;;  %7169 = vmatpush1.bf16.msra.mxu1 %v10922_v30  ;;  %v3896_v50 = vpop.f32.mrb[23].mxu0  ;;  %6799 = vmatprep.subr.bf16.mxu0 %v10927_v33  ;;  %v5016_v19 = vmax.f32 %v10088_v16, 0.0  ;;  %v10934_v33 = vld [vmem:[#allocation13 + $0x228] ss:$16 sps:$4 sm:$0xff]  }
 0x27d   :  { %v10122_v12 = vadd.f32 %v4233_v2, %v12311_v59  ;;  %v10091_v13 = vadd.f32 %v3896_v50, %v12314_v42  ;;  %v4235_v41 = vpop.f32.mrb[23].mxu1  ;;  %7251 = vmatprep.subr.bf16.mxu1 %v10930_v56  ;;  %v5018_v6 = vmax.f32 %v10120_v7, 0.0  ;;  %v5017_v10 = vmax.f32 %v10089_v11, 0.0  ;;  %v10937_v50 = vld [vmem:[#allocation13 + $0x240] ss:$16 sps:$4 sm:$0xff]  }
 0x27e   :  { %v5024_v20 = vmax.f32 %v10090_v8, 0.0  ;;  %v10123_v26 = vadd.f32 %v4235_v41, %v12318_v35  ;;  %6719 = vmatmul.mubr.bf16.vlgmr.msra.gmra.mrb[64].mxu0 %v12330_v34  ;;  %v5019_v40 = vmax.f32 %v10121_v61, 0.0  ;;  %v10940_v41 = vld [vmem:[#allocation13 + $0x248] ss:$16 sps:$4 sm:$0xff]  }
 0x27f   :  { %v5026_v4 = vmax.f32 %v10122_v12, 0.0  ;;  %v5025_v38 = vmax.f32 %v10091_v13, 0.0  ;;  %7171 = vmatmul.mubr.bf16.vlgmr.msra.gmra.mrb[64].mxu1 %v12330_v34  ;;  %6728 = vmatprep.mubr.bf16.mxu0 %v12352_v18 }
 0x280   :  { %v12423_v44 = vpack.c.bf16 %v5024_v20, %v5016_v19  ;;  %v5027_v51 = vmax.f32 %v10123_v26, 0.0  ;;  %6800 = vmatpush1.bf16.msra.mxu0 %v10925_v47  ;;  %7180 = vmatprep.mubr.bf16.mxu1 %v12352_v18  ;;  %v10948_v26 = vld [vmem:[#allocation13 + $0x26c] ss:$16 sps:$4 sm:$0xff]  }
 0x281   :  { %v12426_v24 = vpack.c.bf16 %v5026_v4, %v5018_v6  ;;  %v12428_v14 = vpack.c.bf16 %v5025_v38, %v5017_v10  ;;  %7252 = vmatpush1.bf16.msra.mxu1 %v10928_v62  ;;  %v3900_v30 = vpop.f32.mrb[24].mxu0  ;;  %6801 = vmatprep.subr.bf16.mxu0 %v10933_v43  ;;  %v10945_v62 = vld [vmem:[#allocation13 + $0x264] ss:$16 sps:$4 sm:$0xff]  }
 0x282   :  { %v12430_v34 = vpack.c.bf16 %v5027_v51, %v5019_v40  ;;  %v10092_v56 = vadd.f32 %v3900_v30, %v12307_v58  ;;  %v4239_v16 = vpop.f32.mrb[24].mxu1  ;;  %v3902_v25 = vpop.f32.mrb[25].mxu0  ;;  %7253 = vmatprep.subr.bf16.mxu1 %v10936_v31 }
 0x283   :  { %v10124_v18 = vadd.f32 %v4239_v16, %v12311_v59  ;;  %v10093_v7 = vadd.f32 %v3902_v25, %v12314_v42  ;;  %v4241_v11 = vpop.f32.mrb[25].mxu1  ;;  %v3904_v49 = vpop.f32.mrb[26].mxu0  ;;  %v10951_v16 = vld [vmem:[#allocation13 + $0x284] ss:$16 sps:$4 sm:$0xff]  }
 0x284   :  { %v10125_v52 = vadd.f32 %v4241_v11, %v12318_v35  ;;  %v10094_v61 = vadd.f32 %v3904_v49, %v12307_v58  ;;  %v4243_v8 = vpop.f32.mrb[26].mxu1  ;;  %6802 = vmatpush1.bf16.msra.mxu0 %v10931_v36  ;;  %v3906_v2 = vpop.f32.mrb[27].mxu0  ;;  %v5032_v43 = vmax.f32 %v10092_v56, 0.0  ;;  %v10943_v36 = vld [vmem:[#allocation13 + $0x260] ss:$16 sps:$4 sm:$0xff]  }
 0x285   :  { %v10126_v47 = vadd.f32 %v4243_v8, %v12311_v59  ;;  %7254 = vmatpush1.bf16.msra.mxu1 %v10934_v33  ;;  %v10095_v12 = vadd.f32 %v3906_v2, %v12314_v42  ;;  %v4245_v13 = vpop.f32.mrb[27].mxu1  ;;  %6803 = vmatprep.subr.bf16.mxu0 %v10939_v0  ;;  %v5034_v31 = vmax.f32 %v10124_v18, 0.0  ;;  %v5033_v6 = vmax.f32 %v10093_v7, 0.0  ;;  %v10946_v56 = vld [vmem:[#allocation13 + $0x268] ss:$16 sps:$4 sm:$0xff]  }
 0x286   :  { %v5040_v19 = vmax.f32 %v10094_v61, 0.0  ;;  %v10127_v20 = vadd.f32 %v4245_v13, %v12318_v35  ;;  %6729 = vmatmul.mubr.bf16.gmra.mrb[68].mxu0 %v12348_v5  ;;  %7255 = vmatprep.subr.bf16.mxu1 %v10942_v54  ;;  %v5035_v38 = vmax.f32 %v10125_v52, 0.0  ;;  %v10954_v7 = vld [vmem:[#allocation13 + $0x28c] ss:$16 sps:$4 sm:$0xff]  }
 0x287   :  { %v5042_v10 = vmax.f32 %v10126_v47, 0.0  ;;  %v5041_v4 = vmax.f32 %v10095_v12, 0.0  ;;  %7181 = vmatmul.mubr.bf16.gmra.mrb[68].mxu1 %v12348_v5  ;;  %6738 = vmatprep.mubr.bf16.mxu0 %v12370_v1  ;;  %v10949_v47 = vld [vmem:[#allocation13 + $0x280] ss:$16 sps:$4 sm:$0xff]  }
 0x288   :  { %v12443_v40 = vpack.c.bf16 %v5040_v19, %v5032_v43  ;;  %v5043_v51 = vmax.f32 %v10127_v20, 0.0  ;;  %6804 = vmatpush1.bf16.msra.mxu0 %v10937_v50  ;;  %7190 = vmatprep.mubr.bf16.mxu1 %v12370_v1  ;;  %v10957_v43 = vld [vmem:[#allocation13 + $0x2a4] ss:$16 sps:$4 sm:$0xff]  }
 0x289   :  { %v12446_v30 = vpack.c.bf16 %v5042_v10, %v5034_v31  ;;  %v12448_v33 = vpack.c.bf16 %v5041_v4, %v5033_v6  ;;  %7256 = vmatpush1.bf16.msra.mxu1 %v10940_v41  ;;  %v3910_v0 = vpop.f32.mrb[28].mxu0  ;;  %6805 = vmatprep.subr.bf16.mxu0 %v10945_v62  ;;  %v10952_v62 = vld [vmem:[#allocation13 + $0x288] ss:$16 sps:$4 sm:$0xff]  }
 0x28a   :  { %v12450_v5 = vpack.c.bf16 %v5043_v51, %v5035_v38  ;;  %v10096_v25 = vadd.f32 %v3910_v0, %v12307_v58  ;;  %v4249_v54 = vpop.f32.mrb[28].mxu1  ;;  %v3912_v18 = vpop.f32.mrb[29].mxu0  ;;  %7257 = vmatprep.subr.bf16.mxu1 %v10948_v26  ;;  %v10958_v0 = vld [vmem:[#allocation13 + $0x2a8] ss:$16 sps:$4 sm:$0xff]  }
 0x28b   :  { %v10128_v1 = vadd.f32 %v4249_v54, %v12311_v59  ;;  %v10097_v11 = vadd.f32 %v3912_v18, %v12314_v42  ;;  %v4251_v49 = vpop.f32.mrb[29].mxu1  ;;  %v3914_v52 = vpop.f32.mrb[30].mxu0  ;;  %v10964_v54 = vld [vmem:[#allocation13 + $0x2c8] ss:$16 sps:$4 sm:$0xff]   ;;  %v10969_v18 = vld [vmem:[#allocation13 + $0x2e4] ss:$16 sps:$4 sm:$0xff]  }
 0x28c   :  { %v10129_v61 = vadd.f32 %v4251_v49, %v12318_v35  ;;  %v10098_v8 = vadd.f32 %v3914_v52, %v12307_v58  ;;  %v4253_v2 = vpop.f32.mrb[30].mxu1  ;;  %6806 = vmatpush1.bf16.msra.mxu0 %v10943_v36  ;;  %v3916_v50 = vpop.f32.mrb[31].mxu0  ;;  %v5048_v19 = vmax.f32 %v10096_v25, 0.0  ;;  %v10960_v58 = vld [vmem:[#allocation13 + $0x2ac] ss:$16 sps:$4 sm:$0xff]  }
 0x28d   :  { %v10130_v12 = vadd.f32 %v4253_v2, %v12311_v59  ;;  %7258 = vmatpush1.bf16.msra.mxu1 %v10946_v56  ;;  %v10099_v13 = vadd.f32 %v3916_v50, %v12314_v42  ;;  %v4255_v41 = vpop.f32.mrb[31].mxu1  ;;  %6807 = vmatprep.subr.bf16.mxu0 %v10951_v16  ;;  %v5050_v31 = vmax.f32 %v10128_v1, 0.0  ;;  %v5049_v6 = vmax.f32 %v10097_v11, 0.0  ;;  %v10963_v56 = vld [vmem:[#allocation13 + $0x2c4] ss:$16 sps:$4 sm:$0xff]  }
 0x28e   :  { %v5056_v20 = vmax.f32 %v10098_v8, 0.0  ;;  %v10131_v26 = vadd.f32 %v4255_v41, %v12318_v35  ;;  %6739 = vmatmul.mubr.bf16.gmra.mrb[72].mxu0 %v12366_v46  ;;  %7259 = vmatprep.subr.bf16.mxu1 %v10954_v7  ;;  %v5051_v59 = vmax.f32 %v10129_v61, 0.0  ;;  %v10955_v35 = vld [vmem:[#allocation13 + $0x2a0] ss:$16 sps:$4 sm:$0xff]   ;;  %v10970_v1 = vld [vmem:[#allocation13 + $0x2e8] ss:$16 sps:$4 sm:$0xff]  }
 0x28f   :  { %v5058_v10 = vmax.f32 %v10130_v12, 0.0  ;;  %v5057_v4 = vmax.f32 %v10099_v13, 0.0  ;;  %7191 = vmatmul.mubr.bf16.gmra.mrb[72].mxu1 %v12366_v46  ;;  %6748 = vmatprep.mubr.bf16.mxu0 %v12388_v57  ;;  %v10966_v46 = vld [vmem:[#allocation13 + $0x2cc] ss:$16 sps:$4 sm:$0xff]   ;;  %v10961_v25 = vld [vmem:[#allocation13 + $0x2c0] ss:$16 sps:$4 sm:$0xff]  }
 0x290   :  { %v12463_v42 = vpack.c.bf16 %v5056_v20, %v5048_v19  ;;  %v5059_v38 = vmax.f32 %v10131_v26, 0.0  ;;  %6808 = vmatpush1.bf16.msra.mxu0 %v10949_v47  ;;  %7200 = vmatprep.mubr.bf16.mxu1 %v12388_v57  ;;  %v10972_v57 = vld [vmem:[#allocation13 + $0x2ec] ss:$16 sps:$4 sm:$0xff]   ;;  %v10967_v7 = vld [vmem:[#allocation13 + $0x2e0] ss:$16 sps:$4 sm:$0xff]  }
 0x291   :  { %v12466_v51 = vpack.c.bf16 %v5058_v10, %v5050_v31  ;;  %v12468_v36 = vpack.c.bf16 %v5057_v4, %v5049_v6  ;;  %7260 = vmatpush1.bf16.msra.mxu1 %v10952_v62  ;;  %6809 = vmatprep.subr.bf16.mxu0 %v10957_v43  ;;  %v10975_v11 = vld [vmem:[#allocation13 + $0x304] ss:$16 sps:$4 sm:$0xff]   ;;  %v10978_v49 = vld [vmem:[#allocation13 + $0x30c] ss:$16 sps:$4 sm:$0xff]   ;;  %v10973_v52 = vld [vmem:[#allocation13 + $0x300] ss:$16 sps:$4 sm:$0xff]  }
 0x292   :  { %v12470_v16 = vpack.c.bf16 %v5059_v38, %v5051_v59  ;;  %7261 = vmatprep.subr.bf16.mxu1 %v10960_v58  ;;  %v10976_v61 = vld [vmem:[#allocation13 + $0x308] ss:$16 sps:$4 sm:$0xff]   ;;  %v10981_v8 = vld [vmem:[#allocation13 + $0x324] ss:$16 sps:$4 sm:$0xff]   ;;  %v10990_v47 = vld [vmem:[#allocation13 + $0x34c] ss:$16 sps:$4 sm:$0xff]  }
 0x293   :  { %v10982_v2 = vld [vmem:[#allocation13 + $0x328] ss:$16 sps:$4 sm:$0xff]   ;;  %v10987_v50 = vld [vmem:[#allocation13 + $0x344] ss:$16 sps:$4 sm:$0xff]   ;;  %v10985_v12 = vld [vmem:[#allocation13 + $0x340] ss:$16 sps:$4 sm:$0xff]  }
 0x294   :  { %6810 = vmatpush1.bf16.msra.mxu0 %v10955_v35  ;;  %v10988_v13 = vld [vmem:[#allocation13 + $0x348] ss:$16 sps:$4 sm:$0xff]   ;;  %v10993_v41 = vld [vmem:[#allocation13 + $0x364] ss:$16 sps:$4 sm:$0xff]   ;;  %v11002_v19 = vld [vmem:[#allocation13 + $0x38c] ss:$16 sps:$4 sm:$0xff]  }
 0x295   :  { %7262 = vmatpush1.bf16.msra.mxu1 %v10958_v0  ;;  %6811 = vmatprep.subr.bf16.mxu0 %v10963_v56  ;;  %v10994_v62 = vld [vmem:[#allocation13 + $0x368] ss:$16 sps:$4 sm:$0xff]   ;;  %v10999_v43 = vld [vmem:[#allocation13 + $0x384] ss:$16 sps:$4 sm:$0xff]   ;;  %v10997_v20 = vld [vmem:[#allocation13 + $0x380] ss:$16 sps:$4 sm:$0xff]  }
 0x296   :  { %6749 = vmatmul.mubr.bf16.gmra.mrb[76].mxu0 %v12384_v32  ;;  %7263 = vmatprep.subr.bf16.mxu1 %v10966_v46  ;;  %v11000_v26 = vld [vmem:[#allocation13 + $0x388] ss:$16 sps:$4 sm:$0xff]   ;;  %v11005_v58 = vld [vmem:[#allocation13 + $0x3a4] ss:$16 sps:$4 sm:$0xff]   ;;  %v11014_v10 = vld [vmem:[#allocation13 + $0x3cc] ss:$16 sps:$4 sm:$0xff]  }
 0x297   :  { %7201 = vmatmul.mubr.bf16.gmra.mrb[76].mxu1 %v12384_v32  ;;  %6758 = vmatprep.mubr.bf16.mxu0 %v12407_v22  ;;  %v10984_v32 = vld [vmem:[#allocation13 + $0x32c] ss:$16 sps:$4 sm:$0xff]   ;;  %v11006_v31 = vld [vmem:[#allocation13 + $0x3a8] ss:$16 sps:$4 sm:$0xff]   ;;  %v11011_v6 = vld [vmem:[#allocation13 + $0x3c4] ss:$16 sps:$4 sm:$0xff]  }
 0x298   :  { %6812 = vmatpush1.bf16.msra.mxu0 %v10961_v25  ;;  %7210 = vmatprep.mubr.bf16.mxu1 %v12407_v22  ;;  %v10979_v22 = vld [vmem:[#allocation13 + $0x320] ss:$16 sps:$4 sm:$0xff]   ;;  %v11012_v59 = vld [vmem:[#allocation13 + $0x3c8] ss:$16 sps:$4 sm:$0xff]   ;;  %v11017_v38 = vld [vmem:[#allocation13 + $0x3e4] ss:$16 sps:$4 sm:$0xff]  }
 0x299   :  { %7264 = vmatpush1.bf16.msra.mxu1 %v10964_v54  ;;  %6813 = vmatprep.subr.bf16.mxu0 %v10969_v18  ;;  %v11009_v4 = vld [vmem:[#allocation13 + $0x3c0] ss:$16 sps:$4 sm:$0xff]   ;;  %v11023_v0 = vld [vmem:[#allocation13 + $0x404] ss:$16 sps:$4 sm:$0xff]   ;;  %v11026_v56 = vld [vmem:[#allocation13 + $0x40c] ss:$16 sps:$4 sm:$0xff]  }
 0x29a   :  { %7265 = vmatprep.subr.bf16.mxu1 %v10972_v57  ;;  %v11015_v35 = vld [vmem:[#allocation13 + $0x3e0] ss:$16 sps:$4 sm:$0xff]   ;;  %v11024_v25 = vld [vmem:[#allocation13 + $0x408] ss:$16 sps:$4 sm:$0xff]   ;;  %v11029_v54 = vld [vmem:[#allocation13 + $0x424] ss:$16 sps:$4 sm:$0xff]  }
 0x29b   :  { %v11021_v46 = vld [vmem:[#allocation13 + $0x400] ss:$16 sps:$4 sm:$0xff]   ;;  %v11030_v18 = vld [vmem:[#allocation13 + $0x428] ss:$16 sps:$4 sm:$0xff]   ;;  %v11035_v57 = vld [vmem:[#allocation13 + $0x444] ss:$16 sps:$4 sm:$0xff]  }
 0x29c   :  { %6814 = vmatpush1.bf16.msra.mxu0 %v10967_v7  ;;  %v11038_v7 = vld [vmem:[#allocation13 + $0x44c] ss:$16 sps:$4 sm:$0xff]  }
 0x29d   :  { %7266 = vmatpush1.bf16.msra.mxu1 %v10970_v1  ;;  %6815 = vmatprep.subr.bf16.mxu0 %v10975_v11  ;;  %v11033_v1 = vld [vmem:[#allocation13 + $0x440] ss:$16 sps:$4 sm:$0xff]   ;;  %v11036_v11 = vld [vmem:[#allocation13 + $0x448] ss:$16 sps:$4 sm:$0xff]  }
 0x29e   :  { %6759 = vmatmul.mubr.bf16.gmra.mrb[80].mxu0 %v12402_v29  ;;  %7267 = vmatprep.subr.bf16.mxu1 %v10978_v49  ;;  %v11041_v49 = vld [vmem:[#allocation13 + $0x464] ss:$16 sps:$4 sm:$0xff]  }
 0x29f   :  { %7211 = vmatmul.mubr.bf16.gmra.mrb[80].mxu1 %v12402_v29  ;;  %6768 = vmatprep.mubr.bf16.mxu0 %v12428_v14  ;;  %v10996_v29 = vld [vmem:[#allocation13 + $0x36c] ss:$16 sps:$4 sm:$0xff]  }
 0x2a0   :  { %6816 = vmatpush1.bf16.msra.mxu0 %v10973_v52  ;;  %7220 = vmatprep.mubr.bf16.mxu1 %v12428_v14  ;;  %v10991_v14 = vld [vmem:[#allocation13 + $0x360] ss:$16 sps:$4 sm:$0xff]   ;;  %v11042_v52 = vld [vmem:[#allocation13 + $0x468] ss:$16 sps:$4 sm:$0xff]  }
 0x2a1   :  { %7268 = vmatpush1.bf16.msra.mxu1 %v10976_v61  ;;  %6817 = vmatprep.subr.bf16.mxu0 %v10981_v8  ;;  %v11047_v61 = vld [vmem:[#allocation13 + $0x484] ss:$16 sps:$4 sm:$0xff]   ;;  %v11050_v8 = vld [vmem:[#allocation13 + $0x48c] ss:$16 sps:$4 sm:$0xff]  }
 0x2a2   :  { %7269 = vmatprep.subr.bf16.mxu1 %v10984_v32  ;;  %v11045_v32 = vld [vmem:[#allocation13 + $0x480] ss:$16 sps:$4 sm:$0xff]  }
 0x2a4   :  { %6818 = vmatpush1.bf16.msra.mxu0 %v10979_v22  ;;  %v11048_v22 = vld [vmem:[#allocation13 + $0x488] ss:$16 sps:$4 sm:$0xff]  }
 0x2a5   :  { %7270 = vmatpush1.bf16.msra.mxu1 %v10982_v2  ;;  %6819 = vmatprep.subr.bf16.mxu0 %v10987_v50  ;;  %v11053_v2 = vld [vmem:[#allocation13 + $0x4a4] ss:$16 sps:$4 sm:$0xff]   ;;  %v11054_v50 = vld [vmem:[#allocation13 + $0x4a8] ss:$16 sps:$4 sm:$0xff]  }
 0x2a6   :  { %6769 = vmatmul.mubr.bf16.gmra.mrb[84].mxu0 %v12423_v44  ;;  %7271 = vmatprep.subr.bf16.mxu1 %v10990_v47  ;;  %v11059_v47 = vld [vmem:[#allocation13 + $0x4c4] ss:$16 sps:$4 sm:$0xff]  }
 0x2a7   :  { %7221 = vmatmul.mubr.bf16.gmra.mrb[84].mxu1 %v12423_v44  ;;  %6778 = vmatprep.mubr.bf16.mxu0 %v12448_v33  ;;  %v11008_v44 = vld [vmem:[#allocation13 + $0x3ac] ss:$16 sps:$4 sm:$0xff]  }
 0x2a8   :  { %6820 = vmatpush1.bf16.msra.mxu0 %v10985_v12  ;;  %7230 = vmatprep.mubr.bf16.mxu1 %v12448_v33  ;;  %v11003_v33 = vld [vmem:[#allocation13 + $0x3a0] ss:$16 sps:$4 sm:$0xff]   ;;  %v11062_v12 = vld [vmem:[#allocation13 + $0x4cc] ss:$16 sps:$4 sm:$0xff]  }
 0x2a9   :  { %7272 = vmatpush1.bf16.msra.mxu1 %v10988_v13  ;;  %6821 = vmatprep.subr.bf16.mxu0 %v10993_v41  ;;  %v11057_v13 = vld [vmem:[#allocation13 + $0x4c0] ss:$16 sps:$4 sm:$0xff]   ;;  %v11060_v41 = vld [vmem:[#allocation13 + $0x4c8] ss:$16 sps:$4 sm:$0xff]  }
 0x2aa   :  { %7273 = vmatprep.subr.bf16.mxu1 %v10996_v29  ;;  %v11065_v29 = vld [vmem:[#allocation13 + $0x4e4] ss:$16 sps:$4 sm:$0xff]  }
 0x2ac   :  { %6822 = vmatpush1.bf16.msra.mxu0 %v10991_v14  ;;  %v11066_v14 = vld [vmem:[#allocation13 + $0x4e8] ss:$16 sps:$4 sm:$0xff]  }
 0x2ad   :  { %7274 = vmatpush1.bf16.msra.mxu1 %v10994_v62  ;;  %6823 = vmatprep.subr.bf16.mxu0 %v10999_v43  ;;  %v11071_v62 = vld [vmem:[#allocation13 + $0x504] ss:$16 sps:$4 sm:$0xff]   ;;  %v11074_v43 = vld [vmem:[#allocation13 + $0x50c] ss:$16 sps:$4 sm:$0xff]  }
 0x2ae   :  { %6779 = vmatmul.mubr.bf16.gmra.mrb[88].mxu0 %v12443_v40  ;;  %7275 = vmatprep.subr.bf16.mxu1 %v11002_v19  ;;  %v11069_v19 = vld [vmem:[#allocation13 + $0x500] ss:$16 sps:$4 sm:$0xff]  }
 0x2af   :  { %7231 = vmatmul.mubr.bf16.gmra.mrb[88].mxu1 %v12443_v40  ;;  %6788 = vmatprep.mubr.bf16.mxu0 %v12468_v36  ;;  %v11020_v40 = vld [vmem:[#allocation13 + $0x3ec] ss:$16 sps:$4 sm:$0xff]  }
 0x2b0   :  { %6824 = vmatpush1.bf16.msra.mxu0 %v10997_v20  ;;  %7240 = vmatprep.mubr.bf16.mxu1 %v12468_v36  ;;  %v11018_v36 = vld [vmem:[#allocation13 + $0x3e8] ss:$16 sps:$4 sm:$0xff]  }
 0x2b1   :  { %7276 = vmatpush1.bf16.msra.mxu1 %v11000_v26  ;;  %6825 = vmatprep.subr.bf16.mxu0 %v11005_v58  ;;  %v11072_v20 = vld [vmem:[#allocation13 + $0x508] ss:$16 sps:$4 sm:$0xff]   ;;  %v11077_v26 = vld [vmem:[#allocation13 + $0x524] ss:$16 sps:$4 sm:$0xff]  }
 0x2b2   :  { %7277 = vmatprep.subr.bf16.mxu1 %v11008_v44  ;;  %v11078_v58 = vld [vmem:[#allocation13 + $0x528] ss:$16 sps:$4 sm:$0xff]   ;;  %v11083_v44 = vld [vmem:[#allocation13 + $0x544] ss:$16 sps:$4 sm:$0xff]  }
 0x2b4   :  { %6826 = vmatpush1.bf16.msra.mxu0 %v11003_v33  ;;  %v11086_v33 = vld [vmem:[#allocation13 + $0x54c] ss:$16 sps:$4 sm:$0xff]  }
 0x2b5   :  { %7278 = vmatpush1.bf16.msra.mxu1 %v11006_v31  ;;  %6827 = vmatprep.subr.bf16.mxu0 %v11011_v6  ;;  %v11081_v31 = vld [vmem:[#allocation13 + $0x540] ss:$16 sps:$4 sm:$0xff]   ;;  %v11084_v6 = vld [vmem:[#allocation13 + $0x548] ss:$16 sps:$4 sm:$0xff]  }
 0x2b6   :  { %6789 = vmatmul.mubr.bf16.gmra.mrb[92].mxu0 %v12463_v42  ;;  %7279 = vmatprep.subr.bf16.mxu1 %v11014_v10  ;;  %v11089_v10 = vld [vmem:[#allocation13 + $0x564] ss:$16 sps:$4 sm:$0xff]  }
 0x2b7   :  { %7241 = vmatmul.mubr.bf16.gmra.mrb[92].mxu1 %v12463_v42  ;;  %6831 = vmatprep.mubr.bf16.mxu0 %v12337_v28  ;;  %v11032_v42 = vld [vmem:[#allocation13 + $0x42c] ss:$16 sps:$4 sm:$0xff]  }
 0x2b8   :  { %6828 = vmatpush1.bf16.msra.mxu0 %v11009_v4  ;;  %7283 = vmatprep.mubr.bf16.mxu1 %v12337_v28  ;;  %v11027_v28 = vld [vmem:[#allocation13 + $0x420] ss:$16 sps:$4 sm:$0xff]   ;;  %v11090_v4 = vld [vmem:[#allocation13 + $0x568] ss:$16 sps:$4 sm:$0xff]  }
 0x2b9   :  { %7280 = vmatpush1.bf16.msra.mxu1 %v11012_v59  ;;  %6829 = vmatprep.subr.bf16.mxu0 %v11017_v38  ;;  %v11095_v59 = vld [vmem:[#allocation13 + $0x584] ss:$16 sps:$4 sm:$0xff]   ;;  %v11098_v38 = vld [vmem:[#allocation13 + $0x58c] ss:$16 sps:$4 sm:$0xff]  }
 0x2ba   :  { %7281 = vmatprep.subr.bf16.mxu1 %v11020_v40  ;;  %v11093_v40 = vld [vmem:[#allocation13 + $0x580] ss:$16 sps:$4 sm:$0xff]  }
 0x2bc   :  { %6830 = vmatpush1.bf16.msra.mxu0 %v11015_v35  ;;  %v11096_v35 = vld [vmem:[#allocation13 + $0x588] ss:$16 sps:$4 sm:$0xff]  }
 0x2bd   :  { %7282 = vmatpush1.bf16.msra.mxu1 %v11018_v36  ;;  %6912 = vmatprep.subr.bf16.mxu0 %v11023_v0  ;;  %v11101_v36 = vld [vmem:[#allocation13 + $0x5a4] ss:$16 sps:$4 sm:$0xff]   ;;  %v11102_v0 = vld [vmem:[#allocation13 + $0x5a8] ss:$16 sps:$4 sm:$0xff]  }
 0x2be   :  { %7364 = vmatprep.subr.bf16.mxu1 %v11026_v56  ;;  %v11107_v56 = vld [vmem:[#allocation13 + $0x5c4] ss:$16 sps:$4 sm:$0xff]  }
 0x2bf   :  { %6832 = vmatmul.mubr.bf16.vlgmr.msra.gmra.mrb[64].mxu0 %v12332_v48 }
 0x2c0   :  { %7284 = vmatmul.mubr.bf16.vlgmr.msra.gmra.mrb[64].mxu1 %v12332_v48  ;;  %6841 = vmatprep.mubr.bf16.mxu0 %v12355_v21  ;;  %v11044_v48 = vld [vmem:[#allocation13 + $0x46c] ss:$16 sps:$4 sm:$0xff]  }
 0x2c1   :  { %7293 = vmatprep.mubr.bf16.mxu1 %v12355_v21  ;;  %6913 = vmatpush1.bf16.msra.mxu0 %v11021_v46  ;;  %v11039_v21 = vld [vmem:[#allocation13 + $0x460] ss:$16 sps:$4 sm:$0xff]   ;;  %v11110_v46 = vld [vmem:[#allocation13 + $0x5cc] ss:$16 sps:$4 sm:$0xff]  }
 0x2c2   :  { %7365 = vmatpush1.bf16.msra.mxu1 %v11024_v25  ;;  %6914 = vmatprep.subr.bf16.mxu0 %v11029_v54  ;;  %v11105_v25 = vld [vmem:[#allocation13 + $0x5c0] ss:$16 sps:$4 sm:$0xff]   ;;  %v11108_v54 = vld [vmem:[#allocation13 + $0x5c8] ss:$16 sps:$4 sm:$0xff]  }
 0x2c3   :  { %7366 = vmatprep.subr.bf16.mxu1 %v11032_v42  ;;  %v11113_v42 = vld [vmem:[#allocation13 + $0x5e4] ss:$16 sps:$4 sm:$0xff]  }
 0x2c5   :  { %6915 = vmatpush1.bf16.msra.mxu0 %v11027_v28  ;;  %v11114_v28 = vld [vmem:[#allocation13 + $0x5e8] ss:$16 sps:$4 sm:$0xff]  }
 0x2c6   :  { %7367 = vmatpush1.bf16.msra.mxu1 %v11030_v18  ;;  %6916 = vmatprep.subr.bf16.mxu0 %v11035_v57  ;;  %v11119_v18 = vld [vmem:[#allocation13 + $0x604] ss:$16 sps:$4 sm:$0xff]   ;;  %v11122_v57 = vld [vmem:[#allocation13 + $0x60c] ss:$16 sps:$4 sm:$0xff]  }
 0x2c7   :  { %6842 = vmatmul.mubr.bf16.gmra.mrb[68].mxu0 %v12350_v15  ;;  %7368 = vmatprep.subr.bf16.mxu1 %v11038_v7  ;;  %v1750_v7 = vsub.s32 4, %v12294_v39 }
 0x2c8   :  { %7294 = vmatmul.mubr.bf16.gmra.mrb[68].mxu1 %v12350_v15  ;;  %6851 = vmatprep.mubr.bf16.mxu0 %v12373_v3  ;;  %v11056_v15 = vld [vmem:[#allocation13 + $0x4ac] ss:$16 sps:$4 sm:$0xff]  }
 0x2c9   :  { %7303 = vmatprep.mubr.bf16.mxu1 %v12373_v3  ;;  %6917 = vmatpush1.bf16.msra.mxu0 %v11033_v1  ;;  %v11051_v3 = vld [vmem:[#allocation13 + $0x4a0] ss:$16 sps:$4 sm:$0xff]   ;;  %v1758_v1 = vsub.s32 6, %v12294_v39 }
 0x2ca   :  { %7369 = vmatpush1.bf16.msra.mxu1 %v11036_v11  ;;  %6918 = vmatprep.subr.bf16.mxu0 %v11041_v49  ;;  %v1754_v11 = vsub.s32 5, %v12294_v39  ;;  %v11343_v49 = vld [vmem:[#allocation11] sm:$0xff] }
 0x2cb   :  { %7370 = vmatprep.subr.bf16.mxu1 %v11044_v48  ;;  %v12526_v48 = vrot.slane %v11343_v49, %v1750_v7 }
 0x2cd   :  { %6919 = vmatpush1.bf16.msra.mxu0 %v11039_v21  ;;  %v12528_v21 = vrot.slane %v11343_v49, %v1758_v1 }
 0x2ce   :  { %7371 = vmatpush1.bf16.msra.mxu1 %v11042_v52  ;;  %6920 = vmatprep.subr.bf16.mxu0 %v11047_v61  ;;  %v12530_v52 = vrot.slane %v11343_v49, %v1754_v11 }
 0x2cf   :  { %6852 = vmatmul.mubr.bf16.gmra.mrb[72].mxu0 %v12368_v63  ;;  %7372 = vmatprep.subr.bf16.mxu1 %v11050_v8 }
 0x2d0   :  { %7304 = vmatmul.mubr.bf16.gmra.mrb[72].mxu1 %v12368_v63  ;;  %6861 = vmatprep.mubr.bf16.mxu0 %v12391_v37  ;;  %v11068_v63 = vld [vmem:[#allocation13 + $0x4ec] ss:$16 sps:$4 sm:$0xff]  }
 0x2d1   :  { %7313 = vmatprep.mubr.bf16.mxu1 %v12391_v37  ;;  %6921 = vmatpush1.bf16.msra.mxu0 %v11045_v32  ;;  %v11063_v37 = vld [vmem:[#allocation13 + $0x4e0] ss:$16 sps:$4 sm:$0xff]  }
 0x2d2   :  { %7373 = vmatpush1.bf16.msra.mxu1 %v11048_v22  ;;  %6922 = vmatprep.subr.bf16.mxu0 %v11053_v2 }
 0x2d3   :  { %7374 = vmatprep.subr.bf16.mxu1 %v11056_v15 }
 0x2d5   :  { %6923 = vmatpush1.bf16.msra.mxu0 %v11051_v3 }
 0x2d6   :  { %7375 = vmatpush1.bf16.msra.mxu1 %v11054_v50  ;;  %6924 = vmatprep.subr.bf16.mxu0 %v11059_v47 }
 0x2d7   :  { %6862 = vmatmul.mubr.bf16.gmra.mrb[76].mxu0 %v12386_v53  ;;  %7376 = vmatprep.subr.bf16.mxu1 %v11062_v12 }
 0x2d8   :  { %7314 = vmatmul.mubr.bf16.gmra.mrb[76].mxu1 %v12386_v53  ;;  %6871 = vmatprep.mubr.bf16.mxu0 %v12410_v17  ;;  %v11080_v53 = vld [vmem:[#allocation13 + $0x52c] ss:$16 sps:$4 sm:$0xff]  }
 0x2d9   :  { %7323 = vmatprep.mubr.bf16.mxu1 %v12410_v17  ;;  %6925 = vmatpush1.bf16.msra.mxu0 %v11057_v13  ;;  %v11075_v17 = vld [vmem:[#allocation13 + $0x520] ss:$16 sps:$4 sm:$0xff]  }
 0x2da   :  { %7377 = vmatpush1.bf16.msra.mxu1 %v11060_v41  ;;  %6926 = vmatprep.subr.bf16.mxu0 %v11065_v29 }
 0x2db   :  { %7378 = vmatprep.subr.bf16.mxu1 %v11068_v63 }
 0x2dd   :  { %6927 = vmatpush1.bf16.msra.mxu0 %v11063_v37 }
 0x2de   :  { %7379 = vmatpush1.bf16.msra.mxu1 %v11066_v14  ;;  %6928 = vmatprep.subr.bf16.mxu0 %v11071_v62 }
 0x2df   :  { %6872 = vmatmul.mubr.bf16.gmra.mrb[80].mxu0 %v12405_v60  ;;  %7380 = vmatprep.subr.bf16.mxu1 %v11074_v43 }
 0x2e0   :  { %7324 = vmatmul.mubr.bf16.gmra.mrb[80].mxu1 %v12405_v60  ;;  %6881 = vmatprep.mubr.bf16.mxu0 %v12430_v34  ;;  %v11092_v60 = vld [vmem:[#allocation13 + $0x56c] ss:$16 sps:$4 sm:$0xff]  }
 0x2e1   :  { %7333 = vmatprep.mubr.bf16.mxu1 %v12430_v34  ;;  %6929 = vmatpush1.bf16.msra.mxu0 %v11069_v19  ;;  %v11087_v34 = vld [vmem:[#allocation13 + $0x560] ss:$16 sps:$4 sm:$0xff]  }
 0x2e2   :  { %7381 = vmatpush1.bf16.msra.mxu1 %v11072_v20  ;;  %6930 = vmatprep.subr.bf16.mxu0 %v11077_v26 }
 0x2e3   :  { %7382 = vmatprep.subr.bf16.mxu1 %v11080_v53 }
 0x2e5   :  { %6931 = vmatpush1.bf16.msra.mxu0 %v11075_v17 }
 0x2e6   :  { %7383 = vmatpush1.bf16.msra.mxu1 %v11078_v58  ;;  %6932 = vmatprep.subr.bf16.mxu0 %v11083_v44 }
 0x2e7   :  { %6882 = vmatmul.mubr.bf16.gmra.mrb[84].mxu0 %v12426_v24  ;;  %7384 = vmatprep.subr.bf16.mxu1 %v11086_v33 }
 0x2e8   :  { %7334 = vmatmul.mubr.bf16.gmra.mrb[84].mxu1 %v12426_v24  ;;  %6891 = vmatprep.mubr.bf16.mxu0 %v12450_v5  ;;  %v11104_v24 = vld [vmem:[#allocation13 + $0x5ac] ss:$16 sps:$4 sm:$0xff]  }
 0x2e9   :  { %7343 = vmatprep.mubr.bf16.mxu1 %v12450_v5  ;;  %6933 = vmatpush1.bf16.msra.mxu0 %v11081_v31  ;;  %v11099_v5 = vld [vmem:[#allocation13 + $0x5a0] ss:$16 sps:$4 sm:$0xff]  }
 0x2ea   :  { %7385 = vmatpush1.bf16.msra.mxu1 %v11084_v6  ;;  %6934 = vmatprep.subr.bf16.mxu0 %v11089_v10 }
 0x2eb   :  { %7386 = vmatprep.subr.bf16.mxu1 %v11092_v60  ;;  %v11117_v60 = vld [vmem:[#allocation13 + $0x600] ss:$16 sps:$4 sm:$0xff]  }
 0x2ed   :  { %6935 = vmatpush1.bf16.msra.mxu0 %v11087_v34  ;;  %v11120_v34 = vld [vmem:[#allocation13 + $0x608] ss:$16 sps:$4 sm:$0xff]  }
 0x2ee   :  { %7387 = vmatpush1.bf16.msra.mxu1 %v11090_v4  ;;  %6936 = vmatprep.subr.bf16.mxu0 %v11095_v59 }
 0x2ef   :  { %6892 = vmatmul.mubr.bf16.gmra.mrb[88].mxu0 %v12446_v30  ;;  %7388 = vmatprep.subr.bf16.mxu1 %v11098_v38 }
 0x2f0   :  { %7344 = vmatmul.mubr.bf16.gmra.mrb[88].mxu1 %v12446_v30  ;;  %6901 = vmatprep.mubr.bf16.mxu0 %v12470_v16  ;;  %v11116_v30 = vld [vmem:[#allocation13 + $0x5ec] ss:$16 sps:$4 sm:$0xff]  }
 0x2f1   :  { %7353 = vmatprep.mubr.bf16.mxu1 %v12470_v16  ;;  %6937 = vmatpush1.bf16.msra.mxu0 %v11093_v40  ;;  %v11111_v16 = vld [vmem:[#allocation13 + $0x5e0] ss:$16 sps:$4 sm:$0xff]  }
 0x2f2   :  { %7389 = vmatpush1.bf16.msra.mxu1 %v11096_v35  ;;  %6938 = vmatprep.subr.bf16.mxu0 %v11101_v36  ;;  %v11125_v35 = vld [vmem:[#allocation13 + $0x624] ss:$16 sps:$4 sm:$0xff]   ;;  %v11128_v36 = vld [vmem:[#allocation13 + $0x62c] ss:$16 sps:$4 sm:$0xff]  }
 0x2f3   :  { %7390 = vmatprep.subr.bf16.mxu1 %v11104_v24 }
 0x2f5   :  { %6939 = vmatpush1.bf16.msra.mxu0 %v11099_v5 }
 0x2f6   :  { %7391 = vmatpush1.bf16.msra.mxu1 %v11102_v0  ;;  %6940 = vmatprep.subr.bf16.mxu0 %v11107_v56 }
 0x2f7   :  { %6902 = vmatmul.mubr.bf16.gmra.mrb[92].mxu0 %v12466_v51  ;;  %7392 = vmatprep.subr.bf16.mxu1 %v11110_v46 }
 0x2f8   :  { %7354 = vmatmul.mubr.bf16.gmra.mrb[92].mxu1 %v12466_v51  ;;  %v1762_v51 = vsub.s32 7, %v12294_v39  ;;  %v11309_v39 = vld [vmem:[#allocation19 + $0x40] sm:$0xff]  }
 0x2f9   :  { %6941 = vmatpush1.bf16.msra.mxu0 %v11105_v25 }
 0x2fa   :  { %7393 = vmatpush1.bf16.msra.mxu1 %v11108_v54  ;;  %6942 = vmatprep.subr.bf16.mxu0 %v11113_v42  ;;  %v12532_v61 = vrot.slane %v11343_v49, %v1762_v51  ;;  %v11131_v51 = vld [vmem:[#allocation13 + $0x644] ss:$16 sps:$4 sm:$0xff]   ;;  %v11134_v49 = vld [vmem:[#allocation13 + $0x64c] ss:$16 sps:$4 sm:$0xff]  }
 0x2fb   :  { %7394 = vmatprep.subr.bf16.mxu1 %v11116_v30 }
 0x2fd   :  { %6943 = vmatpush1.bf16.msra.mxu0 %v11111_v16 }
 0x2fe   :  { %7395 = vmatpush1.bf16.msra.mxu1 %v11114_v28  ;;  %7025 = vmatprep.subr.bf16.mxu0 %v11119_v18  ;;  %v11123_v18 = vld [vmem:[#allocation13 + $0x620] ss:$16 sps:$4 sm:$0xff]  }
 0x2ff   :  { %7477 = vmatprep.subr.bf16.mxu1 %v11122_v57  ;;  %v11126_v57 = vld [vmem:[#allocation13 + $0x628] ss:$16 sps:$4 sm:$0xff]  }
 0x311   :  { %v4518_v8 = vpop.f32.mrb[32].mxu0 }
 0x312   :  { %v10132_v32 = vadd.f32 %v4518_v8, %v12526_v48  ;;  %v4857_v22 = vpop.f32.mrb[32].mxu1  ;;  %v4520_v2 = vpop.f32.mrb[33].mxu0 }
 0x313   :  { %v10164_v15 = vadd.f32 %v4857_v22, %v12528_v21  ;;  %v10133_v3 = vadd.f32 %v4520_v2, %v12530_v52  ;;  %v4859_v50 = vpop.f32.mrb[33].mxu1  ;;  %v4522_v47 = vpop.f32.mrb[34].mxu0 }
 0x314   :  { %v10165_v12 = vadd.f32 %v4859_v50, %v12532_v61  ;;  %v10134_v13 = vadd.f32 %v4522_v47, %v12526_v48  ;;  %v4861_v41 = vpop.f32.mrb[34].mxu1  ;;  %v4524_v29 = vpop.f32.mrb[35].mxu0  ;;  %v4940_v62 = vmax.f32 %v10132_v32, 0.0 }
 0x315   :  { %v10166_v63 = vadd.f32 %v4861_v41, %v12528_v21  ;;  %v10135_v37 = vadd.f32 %v4524_v29, %v12530_v52  ;;  %v4863_v14 = vpop.f32.mrb[35].mxu1  ;;  %v4942_v20 = vmax.f32 %v10164_v15, 0.0  ;;  %v4941_v26 = vmax.f32 %v10133_v3, 0.0  ;;  %v11129_v41 = vld [vmem:[#allocation13 + $0x640] ss:$16 sps:$4 sm:$0xff]  }
 0x316   :  { %v4948_v43 = vmax.f32 %v10134_v13, 0.0  ;;  %v10167_v19 = vadd.f32 %v4863_v14, %v12532_v61  ;;  %v4943_v58 = vmax.f32 %v10165_v12, 0.0  ;;  %v11132_v29 = vld [vmem:[#allocation13 + $0x648] ss:$16 sps:$4 sm:$0xff]  }
 0x317   :  { %v4950_v53 = vmax.f32 %v10166_v63, 0.0  ;;  %v4949_v17 = vmax.f32 %v10135_v37, 0.0 }
 0x318   :  { %v5068_v44 = vpack.c.bf16 %v4948_v43, %v4940_v62  ;;  %v4951_v33 = vmax.f32 %v10167_v19, 0.0  ;;  %v11137_v43 = vld [vmem:[#allocation13 + $0x664] ss:$16 sps:$4 sm:$0xff]   ;;  %v11140_v19 = vld [vmem:[#allocation13 + $0x66c] ss:$16 sps:$4 sm:$0xff]  }
 0x319   :  { %v12542_v31 = vpack.c.bf16 %v4950_v53, %v4942_v20  ;;  %v5069_v6 = vpack.c.bf16 %v4949_v17, %v4941_v26  ;;  %v4528_v10 = vpop.f32.mrb[36].mxu0 }
 0x31a   :  { %v12544_v4 = vpack.c.bf16 %v4951_v33, %v4943_v58  ;;  %v10136_v59 = vadd.f32 %v4528_v10, %v12526_v48  ;;  %v4867_v38 = vpop.f32.mrb[36].mxu1  ;;  %v4530_v40 = vpop.f32.mrb[37].mxu0 }
 0x31b   :  { %v10168_v24 = vadd.f32 %v4867_v38, %v12528_v21  ;;  %v10137_v5 = vadd.f32 %v4530_v40, %v12530_v52  ;;  %v4869_v0 = vpop.f32.mrb[37].mxu1  ;;  %v4532_v56 = vpop.f32.mrb[38].mxu0  ;;  %6944 = vmatprep.mubr.bf16.mxu0 %v5069_v6  ;;  %7396 = vmatprep.mubr.bf16.mxu1 %v5069_v6  ;;  %v11138_v38 = vld [vmem:[#allocation13 + $0x668] ss:$16 sps:$4 sm:$0xff]  }
 0x31c   :  { %v10169_v46 = vadd.f32 %v4869_v0, %v12532_v61  ;;  %v10138_v25 = vadd.f32 %v4532_v56, %v12526_v48  ;;  %v4871_v54 = vpop.f32.mrb[38].mxu1  ;;  %v4534_v42 = vpop.f32.mrb[39].mxu0  ;;  %6945 = vmatmul.mubr.bf16.vlgmr.msra.gmra.mrb[64].mxu0 %v5068_v44  ;;  %7397 = vmatmul.mubr.bf16.vlgmr.msra.gmra.mrb[64].mxu1 %v5068_v44  ;;  %v4956_v7 = vmax.f32 %v10136_v59, 0.0  ;;  %v11135_v59 = vld [vmem:[#allocation13 + $0x660] ss:$16 sps:$4 sm:$0xff]  }
 0x31d   :  { %v10170_v30 = vadd.f32 %v4871_v54, %v12528_v21  ;;  %v10139_v16 = vadd.f32 %v4534_v42, %v12530_v52  ;;  %v4873_v28 = vpop.f32.mrb[39].mxu1  ;;  %7026 = vmatpush1.bf16.msra.mxu0 %v11117_v60  ;;  %7478 = vmatpush1.bf16.msra.mxu1 %v11120_v34  ;;  %v4958_v8 = vmax.f32 %v10168_v24, 0.0  ;;  %v4957_v32 = vmax.f32 %v10137_v5, 0.0  ;;  %v11143_v24 = vld [vmem:[#allocation13 + $0x684] ss:$16 sps:$4 sm:$0xff]  }
 0x31e   :  { %v4964_v1 = vmax.f32 %v10138_v25, 0.0  ;;  %v10171_v11 = vadd.f32 %v4873_v28, %v12532_v61  ;;  %7027 = vmatprep.subr.bf16.mxu0 %v11125_v35  ;;  %7479 = vmatprep.subr.bf16.mxu1 %v11128_v36  ;;  %v4959_v15 = vmax.f32 %v10169_v46, 0.0  ;;  %v11146_v5 = vld [vmem:[#allocation13 + $0x68c] ss:$16 sps:$4 sm:$0xff]  }
 0x31f   :  { %v4966_v22 = vmax.f32 %v10170_v30, 0.0  ;;  %v4965_v2 = vmax.f32 %v10139_v16, 0.0 }
 0x320   :  { %v5076_v3 = vpack.c.bf16 %v4964_v1, %v4956_v7  ;;  %v4967_v50 = vmax.f32 %v10171_v11, 0.0  ;;  %v11144_v7 = vld [vmem:[#allocation13 + $0x688] ss:$16 sps:$4 sm:$0xff]  }
 0x321   :  { %v12554_v47 = vpack.c.bf16 %v4966_v22, %v4958_v8  ;;  %v5077_v12 = vpack.c.bf16 %v4965_v2, %v4957_v32  ;;  %v4538_v13 = vpop.f32.mrb[40].mxu0  ;;  %7028 = vmatpush1.bf16.msra.mxu0 %v11123_v18  ;;  %7480 = vmatpush1.bf16.msra.mxu1 %v11126_v57  ;;  %v11141_v57 = vld [vmem:[#allocation13 + $0x680] ss:$16 sps:$4 sm:$0xff]   ;;  %v11149_v8 = vld [vmem:[#allocation13 + $0x6a4] ss:$16 sps:$4 sm:$0xff]  }
 0x322   :  { %v12556_v63 = vpack.c.bf16 %v4967_v50, %v4959_v15  ;;  %v10140_v37 = vadd.f32 %v4538_v13, %v12526_v48  ;;  %v4877_v14 = vpop.f32.mrb[40].mxu1  ;;  %v4540_v62 = vpop.f32.mrb[41].mxu0  ;;  %7029 = vmatprep.subr.bf16.mxu0 %v11131_v51  ;;  %7481 = vmatprep.subr.bf16.mxu1 %v11134_v49  ;;  %v11152_v32 = vld [vmem:[#allocation13 + $0x6ac] ss:$16 sps:$4 sm:$0xff]  }
 0x323   :  { %v10172_v20 = vadd.f32 %v4877_v14, %v12528_v21  ;;  %v10141_v26 = vadd.f32 %v4540_v62, %v12530_v52  ;;  %v4879_v53 = vpop.f32.mrb[41].mxu1  ;;  %v4542_v17 = vpop.f32.mrb[42].mxu0  ;;  %6954 = vmatprep.mubr.bf16.mxu0 %v5077_v12  ;;  %7406 = vmatprep.mubr.bf16.mxu1 %v5077_v12  ;;  %v11147_v62 = vld [vmem:[#allocation13 + $0x6a0] ss:$16 sps:$4 sm:$0xff]  }
 0x324   :  { %v10173_v58 = vadd.f32 %v4879_v53, %v12532_v61  ;;  %v10142_v44 = vadd.f32 %v4542_v17, %v12526_v48  ;;  %v4881_v33 = vpop.f32.mrb[42].mxu1  ;;  %v4544_v6 = vpop.f32.mrb[43].mxu0  ;;  %6955 = vmatmul.mubr.bf16.gmra.mrb[68].mxu0 %v5076_v3  ;;  %7407 = vmatmul.mubr.bf16.gmra.mrb[68].mxu1 %v5076_v3  ;;  %v4972_v40 = vmax.f32 %v10140_v37, 0.0  ;;  %v11155_v53 = vld [vmem:[#allocation13 + $0x6c4] ss:$16 sps:$4 sm:$0xff]  }
 0x325   :  { %v10174_v10 = vadd.f32 %v4881_v33, %v12528_v21  ;;  %v10143_v60 = vadd.f32 %v4544_v6, %v12530_v52  ;;  %v4883_v34 = vpop.f32.mrb[43].mxu1  ;;  %7030 = vmatpush1.bf16.msra.mxu0 %v11129_v41  ;;  %7482 = vmatpush1.bf16.msra.mxu1 %v11132_v29  ;;  %v4974_v0 = vmax.f32 %v10172_v20, 0.0  ;;  %v4973_v56 = vmax.f32 %v10141_v26, 0.0  ;;  %v11158_v17 = vld [vmem:[#allocation13 + $0x6cc] ss:$16 sps:$4 sm:$0xff]  }
 0x326   :  { %v4980_v35 = vmax.f32 %v10142_v44, 0.0  ;;  %v10175_v36 = vadd.f32 %v4883_v34, %v12532_v61  ;;  %7031 = vmatprep.subr.bf16.mxu0 %v11137_v43  ;;  %7483 = vmatprep.subr.bf16.mxu1 %v11140_v19  ;;  %v4975_v54 = vmax.f32 %v10173_v58, 0.0  ;;  %v11150_v43 = vld [vmem:[#allocation13 + $0x6a8] ss:$16 sps:$4 sm:$0xff]  }
 0x327   :  { %v4982_v46 = vmax.f32 %v10174_v10, 0.0  ;;  %v4981_v25 = vmax.f32 %v10143_v60, 0.0 }
 0x328   :  { %v5084_v42 = vpack.c.bf16 %v4980_v35, %v4972_v40  ;;  %v4983_v30 = vmax.f32 %v10175_v36, 0.0  ;;  %v11153_v35 = vld [vmem:[#allocation13 + $0x6c0] ss:$16 sps:$4 sm:$0xff]   ;;  %v11156_v36 = vld [vmem:[#allocation13 + $0x6c8] ss:$16 sps:$4 sm:$0xff]  }
 0x329   :  { %v12566_v16 = vpack.c.bf16 %v4982_v46, %v4974_v0  ;;  %v5085_v28 = vpack.c.bf16 %v4981_v25, %v4973_v56  ;;  %v4548_v18 = vpop.f32.mrb[44].mxu0  ;;  %7032 = vmatpush1.bf16.msra.mxu0 %v11135_v59  ;;  %7484 = vmatpush1.bf16.msra.mxu1 %v11138_v38  ;;  %v11161_v46 = vld [vmem:[#allocation13 + $0x6e4] ss:$16 sps:$4 sm:$0xff]   ;;  %v11164_v25 = vld [vmem:[#allocation13 + $0x6ec] ss:$16 sps:$4 sm:$0xff]  }
 0x32a   :  { %v12568_v1 = vpack.c.bf16 %v4983_v30, %v4975_v54  ;;  %v10144_v11 = vadd.f32 %v4548_v18, %v12526_v48  ;;  %v4887_v51 = vpop.f32.mrb[44].mxu1  ;;  %v4550_v49 = vpop.f32.mrb[45].mxu0  ;;  %7033 = vmatprep.subr.bf16.mxu0 %v11143_v24  ;;  %7485 = vmatprep.subr.bf16.mxu1 %v11146_v5 }
 0x32b   :  { %v10176_v22 = vadd.f32 %v4887_v51, %v12528_v21  ;;  %v10145_v2 = vadd.f32 %v4550_v49, %v12530_v52  ;;  %v4889_v15 = vpop.f32.mrb[45].mxu1  ;;  %v4552_v3 = vpop.f32.mrb[46].mxu0  ;;  %6964 = vmatprep.mubr.bf16.mxu0 %v5085_v28  ;;  %7416 = vmatprep.mubr.bf16.mxu1 %v5085_v28 }
 0x32c   :  { %v10177_v50 = vadd.f32 %v4889_v15, %v12532_v61  ;;  %v10146_v12 = vadd.f32 %v4552_v3, %v12526_v48  ;;  %v4891_v13 = vpop.f32.mrb[46].mxu1  ;;  %v4554_v41 = vpop.f32.mrb[47].mxu0  ;;  %6965 = vmatmul.mubr.bf16.gmra.mrb[72].mxu0 %v5084_v42  ;;  %7417 = vmatmul.mubr.bf16.gmra.mrb[72].mxu1 %v5084_v42  ;;  %v4988_v19 = vmax.f32 %v10144_v11, 0.0 }
 0x32d   :  { %v10178_v29 = vadd.f32 %v4891_v13, %v12528_v21  ;;  %v10147_v37 = vadd.f32 %v4554_v41, %v12530_v52  ;;  %v4893_v14 = vpop.f32.mrb[47].mxu1  ;;  %7034 = vmatpush1.bf16.msra.mxu0 %v11141_v57  ;;  %7486 = vmatpush1.bf16.msra.mxu1 %v11144_v7  ;;  %v4990_v58 = vmax.f32 %v10176_v22, 0.0  ;;  %v4989_v44 = vmax.f32 %v10145_v2, 0.0  ;;  %v11162_v22 = vld [vmem:[#allocation13 + $0x6e8] ss:$16 sps:$4 sm:$0xff]  }
 0x32e   :  { %v4996_v20 = vmax.f32 %v10146_v12, 0.0  ;;  %v10179_v26 = vadd.f32 %v4893_v14, %v12532_v61  ;;  %7035 = vmatprep.subr.bf16.mxu0 %v11149_v8  ;;  %7487 = vmatprep.subr.bf16.mxu1 %v11152_v32  ;;  %v4991_v10 = vmax.f32 %v10177_v50, 0.0  ;;  %v11159_v32 = vld [vmem:[#allocation13 + $0x6e0] ss:$16 sps:$4 sm:$0xff]   ;;  %v11167_v50 = vld [vmem:[#allocation13 + $0x704] ss:$16 sps:$4 sm:$0xff]  }
 0x32f   :  { %v4998_v33 = vmax.f32 %v10178_v29, 0.0  ;;  %v4997_v6 = vmax.f32 %v10147_v37, 0.0  ;;  %v11170_v12 = vld [vmem:[#allocation13 + $0x70c] ss:$16 sps:$4 sm:$0xff]  }
 0x330   :  { %v5092_v60 = vpack.c.bf16 %v4996_v20, %v4988_v19  ;;  %v4999_v34 = vmax.f32 %v10179_v26, 0.0 }
 0x331   :  { %v12578_v59 = vpack.c.bf16 %v4998_v33, %v4990_v58  ;;  %v5093_v38 = vpack.c.bf16 %v4997_v6, %v4989_v44  ;;  %v4558_v40 = vpop.f32.mrb[48].mxu0  ;;  %7036 = vmatpush1.bf16.msra.mxu0 %v11147_v62  ;;  %7488 = vmatpush1.bf16.msra.mxu1 %v11150_v43 }
 0x332   :  { %v12580_v24 = vpack.c.bf16 %v4999_v34, %v4991_v10  ;;  %v10148_v5 = vadd.f32 %v4558_v40, %v12526_v48  ;;  %v4897_v0 = vpop.f32.mrb[48].mxu1  ;;  %v4560_v56 = vpop.f32.mrb[49].mxu0  ;;  %7037 = vmatprep.subr.bf16.mxu0 %v11155_v53  ;;  %7489 = vmatprep.subr.bf16.mxu1 %v11158_v17  ;;  %v11165_v53 = vld [vmem:[#allocation13 + $0x700] ss:$16 sps:$4 sm:$0xff]   ;;  %v11168_v17 = vld [vmem:[#allocation13 + $0x708] ss:$16 sps:$4 sm:$0xff]  }
 0x333   :  { %v10180_v54 = vadd.f32 %v4897_v0, %v12528_v21  ;;  %v10149_v42 = vadd.f32 %v4560_v56, %v12530_v52  ;;  %v4899_v30 = vpop.f32.mrb[49].mxu1  ;;  %v4562_v28 = vpop.f32.mrb[50].mxu0  ;;  %6974 = vmatprep.mubr.bf16.mxu0 %v5093_v38  ;;  %7426 = vmatprep.mubr.bf16.mxu1 %v5093_v38  ;;  %v11173_v10 = vld [vmem:[#allocation13 + $0x724] ss:$16 sps:$4 sm:$0xff]  }
 0x334   :  { %v10181_v18 = vadd.f32 %v4899_v30, %v12532_v61  ;;  %v10150_v57 = vadd.f32 %v4562_v28, %v12526_v48  ;;  %v4901_v7 = vpop.f32.mrb[50].mxu1  ;;  %v4564_v11 = vpop.f32.mrb[51].mxu0  ;;  %6975 = vmatmul.mubr.bf16.gmra.mrb[76].mxu0 %v5092_v60  ;;  %7427 = vmatmul.mubr.bf16.gmra.mrb[76].mxu1 %v5092_v60  ;;  %v5004_v2 = vmax.f32 %v10148_v5, 0.0  ;;  %v11176_v60 = vld [vmem:[#allocation13 + $0x72c] ss:$16 sps:$4 sm:$0xff]  }
 0x335   :  { %v10182_v51 = vadd.f32 %v4901_v7, %v12528_v21  ;;  %v10151_v49 = vadd.f32 %v4564_v11, %v12530_v52  ;;  %v4903_v8 = vpop.f32.mrb[51].mxu1  ;;  %7038 = vmatpush1.bf16.msra.mxu0 %v11153_v35  ;;  %7490 = vmatpush1.bf16.msra.mxu1 %v11156_v36  ;;  %v5006_v13 = vmax.f32 %v10180_v54, 0.0  ;;  %v5005_v41 = vmax.f32 %v10149_v42, 0.0  ;;  %v11171_v42 = vld [vmem:[#allocation13 + $0x720] ss:$16 sps:$4 sm:$0xff]  }
 0x336   :  { %v5012_v15 = vmax.f32 %v10150_v57, 0.0  ;;  %v10183_v3 = vadd.f32 %v4903_v8, %v12532_v61  ;;  %7039 = vmatprep.subr.bf16.mxu0 %v11161_v46  ;;  %7491 = vmatprep.subr.bf16.mxu1 %v11164_v25  ;;  %v5007_v14 = vmax.f32 %v10181_v18, 0.0  ;;  %v11174_v30 = vld [vmem:[#allocation13 + $0x728] ss:$16 sps:$4 sm:$0xff]   ;;  %v11179_v7 = vld [vmem:[#allocation13 + $0x744] ss:$16 sps:$4 sm:$0xff]  }
 0x337   :  { %v5014_v29 = vmax.f32 %v10182_v51, 0.0  ;;  %v5013_v37 = vmax.f32 %v10151_v49, 0.0  ;;  %v11182_v11 = vld [vmem:[#allocation13 + $0x74c] ss:$16 sps:$4 sm:$0xff]  }
 0x338   :  { %v5100_v62 = vpack.c.bf16 %v5012_v15, %v5004_v2  ;;  %v5015_v43 = vmax.f32 %v10183_v3, 0.0 }
 0x339   :  { %v12590_v19 = vpack.c.bf16 %v5014_v29, %v5006_v13  ;;  %v5101_v20 = vpack.c.bf16 %v5013_v37, %v5005_v41  ;;  %v4568_v26 = vpop.f32.mrb[52].mxu0  ;;  %7040 = vmatpush1.bf16.msra.mxu0 %v11159_v32  ;;  %7492 = vmatpush1.bf16.msra.mxu1 %v11162_v22  ;;  %v11177_v13 = vld [vmem:[#allocation13 + $0x740] ss:$16 sps:$4 sm:$0xff]   ;;  %v11180_v41 = vld [vmem:[#allocation13 + $0x748] ss:$16 sps:$4 sm:$0xff]  }
 0x33a   :  { %v12592_v58 = vpack.c.bf16 %v5015_v43, %v5007_v14  ;;  %v10152_v44 = vadd.f32 %v4568_v26, %v12526_v48  ;;  %v4907_v33 = vpop.f32.mrb[52].mxu1  ;;  %v4570_v6 = vpop.f32.mrb[53].mxu0  ;;  %7041 = vmatprep.subr.bf16.mxu0 %v11167_v50  ;;  %7493 = vmatprep.subr.bf16.mxu1 %v11170_v12  ;;  %v11185_v43 = vld [vmem:[#allocation13 + $0x764] ss:$16 sps:$4 sm:$0xff]  }
 0x33b   :  { %v10184_v34 = vadd.f32 %v4907_v33, %v12528_v21  ;;  %v10153_v38 = vadd.f32 %v4570_v6, %v12530_v52  ;;  %v4909_v40 = vpop.f32.mrb[53].mxu1  ;;  %v4572_v35 = vpop.f32.mrb[54].mxu0  ;;  %6984 = vmatprep.mubr.bf16.mxu0 %v5101_v20  ;;  %7436 = vmatprep.mubr.bf16.mxu1 %v5101_v20  ;;  %v11188_v20 = vld [vmem:[#allocation13 + $0x76c] ss:$16 sps:$4 sm:$0xff]  }
 0x33c   :  { %v10185_v36 = vadd.f32 %v4909_v40, %v12532_v61  ;;  %v10154_v5 = vadd.f32 %v4572_v35, %v12526_v48  ;;  %v4911_v0 = vpop.f32.mrb[54].mxu1  ;;  %v4574_v56 = vpop.f32.mrb[55].mxu0  ;;  %6985 = vmatmul.mubr.bf16.gmra.mrb[80].mxu0 %v5100_v62  ;;  %7437 = vmatmul.mubr.bf16.gmra.mrb[80].mxu1 %v5100_v62  ;;  %v5020_v28 = vmax.f32 %v10152_v44, 0.0  ;;  %v11183_v35 = vld [vmem:[#allocation13 + $0x760] ss:$16 sps:$4 sm:$0xff]  }
 0x33d   :  { %v10186_v46 = vadd.f32 %v4911_v0, %v12528_v21  ;;  %v10155_v25 = vadd.f32 %v4574_v56, %v12530_v52  ;;  %v4913_v54 = vpop.f32.mrb[55].mxu1  ;;  %7042 = vmatpush1.bf16.msra.mxu0 %v11165_v53  ;;  %7494 = vmatpush1.bf16.msra.mxu1 %v11168_v17  ;;  %v5022_v51 = vmax.f32 %v10184_v34, 0.0  ;;  %v5021_v49 = vmax.f32 %v10153_v38, 0.0 }
 0x33e   :  { %v5028_v18 = vmax.f32 %v10154_v5, 0.0  ;;  %v10187_v57 = vadd.f32 %v4913_v54, %v12532_v61  ;;  %7043 = vmatprep.subr.bf16.mxu0 %v11173_v10  ;;  %7495 = vmatprep.subr.bf16.mxu1 %v11176_v60  ;;  %v5023_v22 = vmax.f32 %v10185_v36, 0.0  ;;  %v11186_v36 = vld [vmem:[#allocation13 + $0x768] ss:$16 sps:$4 sm:$0xff]  }
 0x33f   :  { %v5030_v8 = vmax.f32 %v10186_v46, 0.0  ;;  %v5029_v32 = vmax.f32 %v10155_v25, 0.0  ;;  %v11191_v46 = vld [vmem:[#allocation13 + $0x784] ss:$16 sps:$4 sm:$0xff]   ;;  %v11194_v25 = vld [vmem:[#allocation13 + $0x78c] ss:$16 sps:$4 sm:$0xff]  }
 0x340   :  { %v5108_v2 = vpack.c.bf16 %v5028_v18, %v5020_v28  ;;  %v5031_v15 = vmax.f32 %v10187_v57, 0.0 }
 0x341   :  { %v12602_v3 = vpack.c.bf16 %v5030_v8, %v5022_v51  ;;  %v5109_v50 = vpack.c.bf16 %v5029_v32, %v5021_v49  ;;  %v4578_v12 = vpop.f32.mrb[56].mxu0  ;;  %7044 = vmatpush1.bf16.msra.mxu0 %v11171_v42  ;;  %7496 = vmatpush1.bf16.msra.mxu1 %v11174_v30  ;;  %v11189_v8 = vld [vmem:[#allocation13 + $0x780] ss:$16 sps:$4 sm:$0xff]   ;;  %v11192_v32 = vld [vmem:[#allocation13 + $0x788] ss:$16 sps:$4 sm:$0xff]  }
 0x342   :  { %v12604_v29 = vpack.c.bf16 %v5031_v15, %v5023_v22  ;;  %v10156_v37 = vadd.f32 %v4578_v12, %v12526_v48  ;;  %v4917_v14 = vpop.f32.mrb[56].mxu1  ;;  %v4580_v62 = vpop.f32.mrb[57].mxu0  ;;  %7045 = vmatprep.subr.bf16.mxu0 %v11179_v7  ;;  %7497 = vmatprep.subr.bf16.mxu1 %v11182_v11  ;;  %v11197_v12 = vld [vmem:[#allocation13 + $0x7a4] ss:$16 sps:$4 sm:$0xff]  }
 0x343   :  { %v10188_v26 = vadd.f32 %v4917_v14, %v12528_v21  ;;  %v10157_v53 = vadd.f32 %v4580_v62, %v12530_v52  ;;  %v4919_v17 = vpop.f32.mrb[57].mxu1  ;;  %v4582_v44 = vpop.f32.mrb[58].mxu0  ;;  %6994 = vmatprep.mubr.bf16.mxu0 %v5109_v50  ;;  %7446 = vmatprep.mubr.bf16.mxu1 %v5109_v50 }
 0x344   :  { %v10189_v33 = vadd.f32 %v4919_v17, %v12532_v61  ;;  %v10158_v6 = vadd.f32 %v4582_v44, %v12526_v48  ;;  %v4921_v10 = vpop.f32.mrb[58].mxu1  ;;  %v4584_v60 = vpop.f32.mrb[59].mxu0  ;;  %6995 = vmatmul.mubr.bf16.gmra.mrb[84].mxu0 %v5108_v2  ;;  %7447 = vmatmul.mubr.bf16.gmra.mrb[84].mxu1 %v5108_v2  ;;  %v5036_v5 = vmax.f32 %v10156_v37, 0.0 }
 0x345   :  { %v10190_v34 = vadd.f32 %v4921_v10, %v12528_v21  ;;  %v10159_v38 = vadd.f32 %v4584_v60, %v12530_v52  ;;  %v4923_v40 = vpop.f32.mrb[59].mxu1  ;;  %7046 = vmatpush1.bf16.msra.mxu0 %v11177_v13  ;;  %7498 = vmatpush1.bf16.msra.mxu1 %v11180_v41  ;;  %v5038_v54 = vmax.f32 %v10188_v26, 0.0  ;;  %v5037_v42 = vmax.f32 %v10157_v53, 0.0  ;;  %v11200_v13 = vld [vmem:[#allocation13 + $0x7ac] ss:$16 sps:$4 sm:$0xff]  }
 0x346   :  { %v5044_v0 = vmax.f32 %v10158_v6, 0.0  ;;  %v10191_v56 = vadd.f32 %v4923_v40, %v12532_v61  ;;  %7047 = vmatprep.subr.bf16.mxu0 %v11185_v43  ;;  %7499 = vmatprep.subr.bf16.mxu1 %v11188_v20  ;;  %v5039_v18 = vmax.f32 %v10189_v33, 0.0  ;;  %v11195_v6 = vld [vmem:[#allocation13 + $0x7a0] ss:$16 sps:$4 sm:$0xff]   ;;  %v11198_v10 = vld [vmem:[#allocation13 + $0x7a8] ss:$16 sps:$4 sm:$0xff]  }
 0x347   :  { %v5046_v30 = vmax.f32 %v10190_v34, 0.0  ;;  %v5045_v28 = vmax.f32 %v10159_v38, 0.0  ;;  %v11206_v40 = vld [vmem:[#allocation13 + $0x7cc] ss:$16 sps:$4 sm:$0xff]  }
 0x348   :  { %v5116_v57 = vpack.c.bf16 %v5044_v0, %v5036_v5  ;;  %v5047_v7 = vmax.f32 %v10191_v56, 0.0 }
 0x349   :  { %v12614_v11 = vpack.c.bf16 %v5046_v30, %v5038_v54  ;;  %v5117_v51 = vpack.c.bf16 %v5045_v28, %v5037_v42  ;;  %v4588_v49 = vpop.f32.mrb[60].mxu0  ;;  %7048 = vmatpush1.bf16.msra.mxu0 %v11183_v35  ;;  %7500 = vmatpush1.bf16.msra.mxu1 %v11186_v36  ;;  %v11201_v54 = vld [vmem:[#allocation13 + $0x7c0] ss:$16 sps:$4 sm:$0xff]   ;;  %v11209_v30 = vld [vmem:[#allocation13 + $0x7e4] ss:$16 sps:$4 sm:$0xff]  }
 0x34a   :  { %v12616_v22 = vpack.c.bf16 %v5047_v7, %v5039_v18  ;;  %v10160_v2 = vadd.f32 %v4588_v49, %v12526_v48  ;;  %v4927_v15 = vpop.f32.mrb[60].mxu1  ;;  %v4590_v50 = vpop.f32.mrb[61].mxu0  ;;  %7049 = vmatprep.subr.bf16.mxu0 %v11191_v46  ;;  %7501 = vmatprep.subr.bf16.mxu1 %v11194_v25  ;;  %v11212_v28 = vld [vmem:[#allocation13 + $0x7ec] ss:$16 sps:$4 sm:$0xff]   ;;  %v11207_v18 = vld [vmem:[#allocation13 + $0x7e0] ss:$16 sps:$4 sm:$0xff]  }
 0x34b   :  { %v10192_v41 = vadd.f32 %v4927_v15, %v12528_v21  ;;  %v10161_v37 = vadd.f32 %v4590_v50, %v12530_v52  ;;  %v4929_v14 = vpop.f32.mrb[61].mxu1  ;;  %v4592_v62 = vpop.f32.mrb[62].mxu0  ;;  %7004 = vmatprep.mubr.bf16.mxu0 %v5117_v51  ;;  %7456 = vmatprep.mubr.bf16.mxu1 %v5117_v51  ;;  %v11215_v7 = vld [vmem:[#allocation16 + $0x4] ss:$8 sps:$4 sm:$0xff]   ;;  %v11213_v51 = vld [vmem:[#allocation16] ss:$8 sps:$4 sm:$0xff]  }
 0x34c   :  { %v10193_v43 = vadd.f32 %v4929_v14, %v12532_v61  ;;  %v10162_v20 = vadd.f32 %v4592_v62, %v12526_v48  ;;  %v4931_v26 = vpop.f32.mrb[62].mxu1  ;;  %v4594_v53 = vpop.f32.mrb[63].mxu0  ;;  %7005 = vmatmul.mubr.bf16.gmra.mrb[88].mxu0 %v5116_v57  ;;  %7457 = vmatmul.mubr.bf16.gmra.mrb[88].mxu1 %v5116_v57  ;;  %v5052_v60 = vmax.f32 %v10160_v2, 0.0  ;;  %v11203_v48 = vld [vmem:[#allocation13 + $0x7c4] ss:$16 sps:$4 sm:$0xff]  }
 0x34d   :  { %v10194_v17 = vadd.f32 %v4931_v26, %v12528_v21  ;;  %v10163_v44 = vadd.f32 %v4594_v53, %v12530_v52  ;;  %v4933_v33 = vpop.f32.mrb[63].mxu1  ;;  %7050 = vmatpush1.bf16.msra.mxu0 %v11189_v8  ;;  %7502 = vmatpush1.bf16.msra.mxu1 %v11192_v32  ;;  %v5054_v35 = vmax.f32 %v10192_v41, 0.0  ;;  %v5053_v36 = vmax.f32 %v10161_v37, 0.0  ;;  %v11210_v57 = vld [vmem:[#allocation13 + $0x7e8] ss:$16 sps:$4 sm:$0xff]  }
 0x34e   :  { %v5060_v34 = vmax.f32 %v10162_v20, 0.0  ;;  %v10195_v38 = vadd.f32 %v4933_v33, %v12532_v61  ;;  %7051 = vmatprep.subr.bf16.mxu0 %v11197_v12  ;;  %7503 = vmatprep.subr.bf16.mxu1 %v11200_v13  ;;  %v5055_v21 = vmax.f32 %v10193_v43, 0.0  ;;  %v11204_v61 = vld [vmem:[#allocation13 + $0x7c8] ss:$16 sps:$4 sm:$0xff]   ;;  %v11216_v8 = vld [vmem:[#allocation16 + $0x10] ss:$8 sps:$4 sm:$0xff]  }
 0x34f   :  { %v5062_v5 = vmax.f32 %v10194_v17, 0.0  ;;  %v5061_v0 = vmax.f32 %v10163_v44, 0.0  ;;  %v11218_v49 = vld [vmem:[#allocation16 + $0x14] ss:$8 sps:$4 sm:$0xff]   ;;  %v11219_v32 = vld [vmem:[#allocation16 + $0x20] ss:$8 sps:$4 sm:$0xff]  }
 0x350   :  { %v5124_v56 = vpack.c.bf16 %v5060_v34, %v5052_v60  ;;  %v5063_v52 = vmax.f32 %v10195_v38, 0.0  ;;  %v11224_v2 = vld [vmem:[#allocation16 + $0x34] ss:$8 sps:$4 sm:$0xff]   ;;  %v11225_v15 = vld [vmem:[#allocation16 + $0x40] ss:$8 sps:$4 sm:$0xff]  }
 0x351   :  { %v12626_v46 = vpack.c.bf16 %v5062_v5, %v5054_v35  ;;  %v5125_v25 = vpack.c.bf16 %v5061_v0, %v5053_v36  ;;  %7052 = vmatpush1.bf16.msra.mxu0 %v11195_v6  ;;  %7504 = vmatpush1.bf16.msra.mxu1 %v11198_v10  ;;  %v11230_v50 = vld [vmem:[#allocation16 + $0x54] ss:$8 sps:$4 sm:$0xff]   ;;  %v11231_v12 = vld [vmem:[#allocation16 + $0x60] ss:$8 sps:$4 sm:$0xff]   ;;  %v11258_v17 = vld [vmem:[#allocation16 + $0xf0] ss:$8 sps:$4 sm:$0xff]  }
 0x352   :  { %v12628_v42 = vpack.c.bf16 %v5063_v52, %v5055_v21  ;;  %7053 = vmatprep.subr.bf16.mxu0 %v11203_v48  ;;  %7505 = vmatprep.subr.bf16.mxu1 %v11206_v40  ;;  %v11236_v13 = vld [vmem:[#allocation16 + $0x74] ss:$8 sps:$4 sm:$0xff]   ;;  %v11237_v41 = vld [vmem:[#allocation16 + $0x80] ss:$8 sps:$4 sm:$0xff]  }
 0x353   :  { %7014 = vmatprep.mubr.bf16.mxu0 %v5125_v25  ;;  %7466 = vmatprep.mubr.bf16.mxu1 %v5125_v25  ;;  %v11242_v37 = vld [vmem:[#allocation16 + $0x94] ss:$8 sps:$4 sm:$0xff]   ;;  %v11243_v14 = vld [vmem:[#allocation16 + $0xa0] ss:$8 sps:$4 sm:$0xff]  }
 0x354   :  { %7015 = vmatmul.mubr.bf16.gmra.mrb[92].mxu0 %v5124_v56  ;;  %7467 = vmatmul.mubr.bf16.gmra.mrb[92].mxu1 %v5124_v56  ;;  %v11248_v62 = vld [vmem:[#allocation16 + $0xb4] ss:$8 sps:$4 sm:$0xff]   ;;  %v11249_v43 = vld [vmem:[#allocation16 + $0xc0] ss:$8 sps:$4 sm:$0xff]  }
 0x355   :  { %7054 = vmatpush1.bf16.msra.mxu0 %v11201_v54  ;;  %7057 = vmatprep.mubr.bf16.mxu0 %v12544_v4  ;;  %v11254_v20 = vld [vmem:[#allocation16 + $0xd4] ss:$8 sps:$4 sm:$0xff]   ;;  %v11255_v26 = vld [vmem:[#allocation16 + $0xe0] ss:$8 sps:$4 sm:$0xff]  }
 0x356   :  { %7506 = vmatpush1.bf16.msra.mxu1 %v11204_v61  ;;  %7509 = vmatprep.mubr.bf16.mxu1 %v12544_v4  ;;  %v11221_v4 = vld [vmem:[#allocation16 + $0x24] ss:$8 sps:$4 sm:$0xff]   ;;  %v11260_v53 = vld [vmem:[#allocation16 + $0xf4] ss:$8 sps:$4 sm:$0xff]  }
 0x357   :  { %7055 = vmatprep.subr.bf16.mxu0 %v11209_v30  ;;  %7507 = vmatprep.subr.bf16.mxu1 %v11212_v28  ;;  %v5384_v44 = vld [vmem:[#allocation14] sm:$0xf] }
 0x358   :  { %v12663_v33 = vrot.slane %v5384_v44, %v12299_v9  ;;  %v12667_v6 = vrot.slane %v5384_v44, %v1742_v55  ;;  %v12670_v10 = vrot.slane %v5384_v44, %v12303_v45  ;;  %v12674_v60 = vrot.slane %v5384_v44, %v1746_v27  ;;  %v11310_v27 = vld [vmem:[#allocation19] sm:$0xff]  }
 0x359   :  { %7056 = vmatpush1.bf16.msra.mxu0 %v11207_v18  ;;  %v11269_v44 = vld [vmem:[#allocation16 + $0x124] ss:$8 sps:$4 sm:$0xff]  }
 0x35a   :  { %7508 = vmatpush1.bf16.msra.mxu1 %v11210_v57  ;;  %8082 = vmatprep.subr.bf16.mxu0 %v11215_v7 }
 0x35b   :  { %9956 = vmatprep.subr.bf16.mxu1 %v11309_v39  ;;  %v11267_v39 = vld [vmem:[#allocation16 + $0x120] ss:$8 sps:$4 sm:$0xff]  }
 0x35c   :  { %7058 = vmatmul.mubr.bf16.vlgmr.msra.gmra.mrb[64].mxu0 %v12542_v31 }
 0x35d   :  { %7510 = vmatmul.mubr.bf16.vlgmr.msra.gmra.mrb[64].mxu1 %v12542_v31  ;;  %7067 = vmatprep.mubr.bf16.mxu0 %v12556_v63  ;;  %v11222_v31 = vld [vmem:[#allocation16 + $0x30] ss:$8 sps:$4 sm:$0xff]  }
 0x35e   :  { %7519 = vmatprep.mubr.bf16.mxu1 %v12556_v63  ;;  %8083 = vmatpush1.bf16.msra.mxu0 %v11213_v51  ;;  %v11227_v63 = vld [vmem:[#allocation16 + $0x44] ss:$8 sps:$4 sm:$0xff]  }
 0x35f   :  { %8084 = vmatprep.subr.bf16.mxu0 %v11218_v49  ;;  %9957 = vmatpush3.bf16.msra.mxu1 %v11310_v27  ;;  %v11312_v49 = vld [vmem:[#allocation19 + $0x8] sm:$0xff]  }
 0x362   :  { %8085 = vmatpush1.bf16.msra.mxu0 %v11216_v8 }
 0x363   :  { %8086 = vmatprep.subr.bf16.mxu0 %v11221_v4 }
 0x364   :  { %7068 = vmatmul.mubr.bf16.gmra.mrb[68].mxu0 %v12554_v47 }
 0x365   :  { %7520 = vmatmul.mubr.bf16.gmra.mrb[68].mxu1 %v12554_v47  ;;  %7077 = vmatprep.mubr.bf16.mxu0 %v12568_v1  ;;  %v11228_v47 = vld [vmem:[#allocation16 + $0x50] ss:$8 sps:$4 sm:$0xff]  }
 0x366   :  { %7529 = vmatprep.mubr.bf16.mxu1 %v12568_v1  ;;  %8087 = vmatpush1.bf16.msra.mxu0 %v11219_v32  ;;  %v11233_v1 = vld [vmem:[#allocation16 + $0x64] ss:$8 sps:$4 sm:$0xff]  }
 0x367   :  { %8088 = vmatprep.subr.bf16.mxu0 %v11224_v2  ;;  %v11313_v2 = vld [vmem:[#allocation19 + $0x50] sm:$0xff]  }
 0x36a   :  { %8089 = vmatpush1.bf16.msra.mxu0 %v11222_v31 }
 0x36b   :  { %8090 = vmatprep.subr.bf16.mxu0 %v11227_v63 }
 0x36c   :  { %7078 = vmatmul.mubr.bf16.gmra.mrb[72].mxu0 %v12566_v16 }
 0x36d   :  { %7530 = vmatmul.mubr.bf16.gmra.mrb[72].mxu1 %v12566_v16  ;;  %7087 = vmatprep.mubr.bf16.mxu0 %v12580_v24  ;;  %v11234_v16 = vld [vmem:[#allocation16 + $0x70] ss:$8 sps:$4 sm:$0xff]  }
 0x36e   :  { %7539 = vmatprep.mubr.bf16.mxu1 %v12580_v24  ;;  %8091 = vmatpush1.bf16.msra.mxu0 %v11225_v15  ;;  %v11239_v24 = vld [vmem:[#allocation16 + $0x84] ss:$8 sps:$4 sm:$0xff]  }
 0x36f   :  { %8092 = vmatprep.subr.bf16.mxu0 %v11230_v50  ;;  %v11261_v50 = vld [vmem:[#allocation16 + $0x100] ss:$8 sps:$4 sm:$0xff]  }
 0x372   :  { %8093 = vmatpush1.bf16.msra.mxu0 %v11228_v47 }
 0x373   :  { %8094 = vmatprep.subr.bf16.mxu0 %v11233_v1 }
 0x374   :  { %7088 = vmatmul.mubr.bf16.gmra.mrb[76].mxu0 %v12578_v59 }
 0x375   :  { %7540 = vmatmul.mubr.bf16.gmra.mrb[76].mxu1 %v12578_v59  ;;  %7097 = vmatprep.mubr.bf16.mxu0 %v12592_v58  ;;  %v11240_v59 = vld [vmem:[#allocation16 + $0x90] ss:$8 sps:$4 sm:$0xff]  }
 0x376   :  { %7549 = vmatprep.mubr.bf16.mxu1 %v12592_v58  ;;  %8095 = vmatpush1.bf16.msra.mxu0 %v11231_v12  ;;  %v11245_v58 = vld [vmem:[#allocation16 + $0xa4] ss:$8 sps:$4 sm:$0xff]  }
 0x377   :  { %8096 = vmatprep.subr.bf16.mxu0 %v11236_v13 }
 0x37a   :  { %8097 = vmatpush1.bf16.msra.mxu0 %v11234_v16  ;;  %v11266_v16 = vld [vmem:[#allocation16 + $0x114] ss:$8 sps:$4 sm:$0xff]  }
 0x37b   :  { %8098 = vmatprep.subr.bf16.mxu0 %v11239_v24 }
 0x37c   :  { %7098 = vmatmul.mubr.bf16.gmra.mrb[80].mxu0 %v12590_v19 }
 0x37d   :  { %7550 = vmatmul.mubr.bf16.gmra.mrb[80].mxu1 %v12590_v19  ;;  %7107 = vmatprep.mubr.bf16.mxu0 %v12604_v29  ;;  %v11246_v19 = vld [vmem:[#allocation16 + $0xb0] ss:$8 sps:$4 sm:$0xff]  }
 0x37e   :  { %7559 = vmatprep.mubr.bf16.mxu1 %v12604_v29  ;;  %8099 = vmatpush1.bf16.msra.mxu0 %v11237_v41  ;;  %v11251_v29 = vld [vmem:[#allocation16 + $0xc4] ss:$8 sps:$4 sm:$0xff]  }
 0x37f   :  { %8100 = vmatprep.subr.bf16.mxu0 %v11242_v37 }
 0x382   :  { %8101 = vmatpush1.bf16.msra.mxu0 %v11240_v59 }
 0x383   :  { %8102 = vmatprep.subr.bf16.mxu0 %v11245_v58  ;;  %v11314_v58 = vld [vmem:[#allocation19 + $0x10] sm:$0xff]  }
 0x384   :  { %7108 = vmatmul.mubr.bf16.gmra.mrb[84].mxu0 %v12602_v3 }
 0x385   :  { %7560 = vmatmul.mubr.bf16.gmra.mrb[84].mxu1 %v12602_v3  ;;  %7117 = vmatprep.mubr.bf16.mxu0 %v12616_v22  ;;  %v11252_v3 = vld [vmem:[#allocation16 + $0xd0] ss:$8 sps:$4 sm:$0xff]  }
 0x386   :  { %7569 = vmatprep.mubr.bf16.mxu1 %v12616_v22  ;;  %8103 = vmatpush1.bf16.msra.mxu0 %v11243_v14  ;;  %v11257_v22 = vld [vmem:[#allocation16 + $0xe4] ss:$8 sps:$4 sm:$0xff]  }
 0x387   :  { %8104 = vmatprep.subr.bf16.mxu0 %v11248_v62 }
 0x38a   :  { %8105 = vmatpush1.bf16.msra.mxu0 %v11246_v19 }
 0x38b   :  { %8106 = vmatprep.subr.bf16.mxu0 %v11251_v29 }
 0x38c   :  { %7118 = vmatmul.mubr.bf16.gmra.mrb[88].mxu0 %v12614_v11 }
 0x38d   :  { %7570 = vmatmul.mubr.bf16.gmra.mrb[88].mxu1 %v12614_v11  ;;  %7127 = vmatprep.mubr.bf16.mxu0 %v12628_v42  ;;  %v11263_v11 = vld [vmem:[#allocation16 + $0x104] ss:$8 sps:$4 sm:$0xff]  }
 0x38e   :  { %7579 = vmatprep.mubr.bf16.mxu1 %v12628_v42  ;;  %8107 = vmatpush1.bf16.msra.mxu0 %v11249_v43  ;;  %v11315_v43 = vld [vmem:[#allocation19 + $0x58] sm:$0xff]  }
 0x38f   :  { %8108 = vmatprep.subr.bf16.mxu0 %v11254_v20 }
 0x392   :  { %8109 = vmatpush1.bf16.msra.mxu0 %v11252_v3 }
 0x393   :  { %8110 = vmatprep.subr.bf16.mxu0 %v11257_v22 }
 0x394   :  { %7128 = vmatmul.mubr.bf16.gmra.mrb[92].mxu0 %v12626_v46 }
 0x395   :  { %7580 = vmatmul.mubr.bf16.gmra.mrb[92].mxu1 %v12626_v46  ;;  %v11311_v46 = vld [vmem:[#allocation19 + $0x48] sm:$0xff]  }
 0x396   :  { %8111 = vmatpush1.bf16.msra.mxu0 %v11255_v26  ;;  %9958 = vmatprep.subr.bf16.mxu1 %v11311_v46  ;;  %v11264_v26 = vld [vmem:[#allocation16 + $0x110] ss:$8 sps:$4 sm:$0xff]  }
 0x397   :  { %8112 = vmatprep.subr.bf16.mxu0 %v11260_v53  ;;  %9959 = vmatpush3.bf16.msra.mxu1 %v11312_v49 }
 0x398   :  { %9960 = vmatprep.subr.bf16.mxu1 %v11313_v2 }
 0x39a   :  { %8113 = vmatpush1.bf16.msra.mxu0 %v11258_v17 }
 0x39b   :  { %8195 = vmatprep.subr.bf16.mxu0 %v11263_v11  ;;  %9961 = vmatpush3.bf16.msra.mxu1 %v11314_v58 }
 0x39c   :  { %9962 = vmatprep.subr.bf16.mxu1 %v11315_v43 }
 0x42f   :  { %v7059_v34 = vpop.f32.mrb[64].mxu0 }
 0x430   :  { %v10196_v38 = vadd.f32 %v7059_v34, %v12663_v33  ;;  %v7511_v48 = vpop.f32.mrb[64].mxu1  ;;  %v7061_v40 = vpop.f32.mrb[65].mxu0 }
 0x431   :  { %v10228_v35 = vadd.f32 %v7511_v48, %v12667_v6  ;;  %v10197_v36 = vadd.f32 %v7061_v40, %v12670_v10  ;;  %v7513_v5 = vpop.f32.mrb[65].mxu1  ;;  %v7063_v0 = vpop.f32.mrb[66].mxu0 }
 0x432   :  { %v10229_v55 = vadd.f32 %v7513_v5, %v12674_v60  ;;  %v10198_v21 = vadd.f32 %v7063_v0, %v12663_v33  ;;  %v7515_v56 = vpop.f32.mrb[66].mxu1  ;;  %v7065_v52 = vpop.f32.mrb[67].mxu0  ;;  %v7590_v61 = vmax.f32 %v10196_v38, 0.0 }
 0x433   :  { %v10230_v25 = vadd.f32 %v7515_v56, %v12667_v6  ;;  %v10199_v54 = vadd.f32 %v7065_v52, %v12670_v10  ;;  %v7517_v42 = vpop.f32.mrb[67].mxu1  ;;  %v7592_v18 = vmax.f32 %v10228_v35, 0.0  ;;  %v7591_v57 = vmax.f32 %v10197_v36, 0.0  ;;  %v11316_v35 = vld [vmem:[#allocation19 + $0x18] sm:$0xff]  }
 0x434   :  { %v7594_v30 = vmax.f32 %v10198_v21, 0.0  ;;  %v10231_v28 = vadd.f32 %v7517_v42, %v12674_v60  ;;  %v7593_v8 = vmax.f32 %v10229_v55, 0.0  ;;  %v11317_v55 = vld [vmem:[#allocation19 + $0x60] sm:$0xff]   ;;  %v11272_v42 = vld [vmem:[#allocation16 + $0x134] ss:$8 sps:$4 sm:$0xff]   ;;  %9963 = vmatpush3.bf16.msra.mxu1 %v11316_v35 }
 0x435   :  { %v7596_v7 = vmax.f32 %v10230_v25, 0.0  ;;  %v7595_v51 = vmax.f32 %v10199_v54, 0.0  ;;  %9964 = vmatprep.subr.bf16.mxu1 %v11317_v55 }
 0x436   :  { %v7654_v4 = vpack.c.bf16 %v7594_v30, %v7590_v61  ;;  %v7597_v32 = vmax.f32 %v10231_v28, 0.0 }
 0x437   :  { %v12684_v31 = vpack.c.bf16 %v7596_v7, %v7592_v18  ;;  %v7655_v63 = vpack.c.bf16 %v7595_v51, %v7591_v57  ;;  %v7069_v15 = vpop.f32.mrb[68].mxu0  ;;  %v11318_v57 = vld [vmem:[#allocation19 + $0x20] sm:$0xff]  }
 0x438   :  { %v12686_v47 = vpack.c.bf16 %v7597_v32, %v7593_v8  ;;  %v10200_v1 = vadd.f32 %v7069_v15, %v12663_v33  ;;  %v7521_v12 = vpop.f32.mrb[68].mxu1  ;;  %v7071_v13 = vpop.f32.mrb[69].mxu0  ;;  %v11270_v15 = vld [vmem:[#allocation16 + $0x130] ss:$8 sps:$4 sm:$0xff]   ;;  %9965 = vmatpush3.bf16.msra.mxu1 %v11318_v57 }
 0x439   :  { %v10232_v24 = vadd.f32 %v7521_v12, %v12667_v6  ;;  %v10201_v41 = vadd.f32 %v7071_v13, %v12670_v10  ;;  %v7523_v37 = vpop.f32.mrb[69].mxu1  ;;  %v7073_v59 = vpop.f32.mrb[70].mxu0  ;;  %8114 = vmatprep.mubr.bf16.mxu0 %v7655_v63  ;;  %v11275_v13 = vld [vmem:[#allocation16 + $0x144] ss:$8 sps:$4 sm:$0xff]  }
 0x43a   :  { %v10233_v14 = vadd.f32 %v7523_v37, %v12674_v60  ;;  %v10202_v62 = vadd.f32 %v7073_v59, %v12663_v33  ;;  %v7525_v19 = vpop.f32.mrb[70].mxu1  ;;  %v7075_v29 = vpop.f32.mrb[71].mxu0  ;;  %8115 = vmatmul.mubr.bf16.vlgmr.msra.gmra.mrb[96].mxu0 %v7654_v4  ;;  %v7598_v53 = vmax.f32 %v10200_v1, 0.0  ;;  %v11319_v4 = vld [vmem:[#allocation19 + $0x68] sm:$0xff]  }
 0x43b   :  { %v10234_v20 = vadd.f32 %v7525_v19, %v12667_v6  ;;  %v10203_v3 = vadd.f32 %v7075_v29, %v12670_v10  ;;  %v7527_v22 = vpop.f32.mrb[71].mxu1  ;;  %8196 = vmatpush1.bf16.msra.mxu0 %v11261_v50  ;;  %v7600_v34 = vmax.f32 %v10232_v24, 0.0  ;;  %v7599_v38 = vmax.f32 %v10201_v41, 0.0  ;;  %v11320_v59 = vld [vmem:[#allocation19 + $0x28] sm:$0xff]   ;;  %9966 = vmatprep.subr.bf16.mxu1 %v11319_v4  ;;  %v11321_v19 = vld [vmem:[#allocation19 + $0x70] sm:$0xff]  }
 0x43c   :  { %v7602_v17 = vmax.f32 %v10202_v62, 0.0  ;;  %v10235_v11 = vadd.f32 %v7527_v22, %v12674_v60  ;;  %8197 = vmatprep.subr.bf16.mxu0 %v11266_v16  ;;  %v7601_v36 = vmax.f32 %v10233_v14, 0.0  ;;  %9967 = vmatpush3.bf16.msra.mxu1 %v11320_v59 }
 0x43d   :  { %v7604_v48 = vmax.f32 %v10234_v20, 0.0  ;;  %v7603_v40 = vmax.f32 %v10203_v3, 0.0  ;;  %v11273_v3 = vld [vmem:[#allocation16 + $0x140] ss:$8 sps:$4 sm:$0xff]   ;;  %9968 = vmatprep.subr.bf16.mxu1 %v11321_v19 }
 0x43e   :  { %v7658_v5 = vpack.c.bf16 %v7602_v17, %v7598_v53  ;;  %v7605_v0 = vmax.f32 %v10235_v11, 0.0  ;;  %v11278_v11 = vld [vmem:[#allocation16 + $0x154] ss:$8 sps:$4 sm:$0xff]  }
 0x43f   :  { %v12696_v21 = vpack.c.bf16 %v7604_v48, %v7600_v34  ;;  %v7659_v56 = vpack.c.bf16 %v7603_v40, %v7599_v38  ;;  %v7079_v52 = vpop.f32.mrb[72].mxu0  ;;  %8198 = vmatpush1.bf16.msra.mxu0 %v11264_v26  ;;  %v11322_v40 = vld [vmem:[#allocation19 + $0x30] sm:$0xff]  }
 0x440   :  { %v12698_v27 = vpack.c.bf16 %v7605_v0, %v7601_v36  ;;  %v10204_v46 = vadd.f32 %v7079_v52, %v12663_v33  ;;  %v7531_v25 = vpop.f32.mrb[72].mxu1  ;;  %v7081_v54 = vpop.f32.mrb[73].mxu0  ;;  %8199 = vmatprep.subr.bf16.mxu0 %v11269_v44  ;;  %9969 = vmatpush3.bf16.msra.mxu1 %v11322_v40 }
 0x441   :  { %v10236_v61 = vadd.f32 %v7531_v25, %v12667_v6  ;;  %v10205_v30 = vadd.f32 %v7081_v54, %v12670_v10  ;;  %v7533_v28 = vpop.f32.mrb[73].mxu1  ;;  %v7083_v18 = vpop.f32.mrb[74].mxu0  ;;  %8124 = vmatprep.mubr.bf16.mxu0 %v7659_v56 }
 0x442   :  { %v10237_v7 = vadd.f32 %v7533_v28, %v12674_v60  ;;  %v10206_v51 = vadd.f32 %v7083_v18, %v12663_v33  ;;  %v7535_v49 = vpop.f32.mrb[74].mxu1  ;;  %v7085_v8 = vpop.f32.mrb[75].mxu0  ;;  %8125 = vmatmul.mubr.bf16.gmra.mrb[100].mxu0 %v7658_v5  ;;  %v7606_v50 = vmax.f32 %v10204_v46, 0.0 }
 0x443   :  { %v10238_v32 = vadd.f32 %v7535_v49, %v12667_v6  ;;  %v10207_v2 = vadd.f32 %v7085_v8, %v12670_v10  ;;  %v7537_v63 = vpop.f32.mrb[75].mxu1  ;;  %8200 = vmatpush1.bf16.msra.mxu0 %v11267_v39  ;;  %v7608_v16 = vmax.f32 %v10236_v61, 0.0  ;;  %v7607_v24 = vmax.f32 %v10205_v30, 0.0  ;;  %v11276_v39 = vld [vmem:[#allocation16 + $0x150] ss:$8 sps:$4 sm:$0xff]  }
 0x444   :  { %v7610_v1 = vmax.f32 %v10206_v51, 0.0  ;;  %v10239_v12 = vadd.f32 %v7537_v63, %v12674_v60  ;;  %8201 = vmatprep.subr.bf16.mxu0 %v11272_v42  ;;  %v7609_v58 = vmax.f32 %v10237_v7, 0.0  ;;  %v11281_v42 = vld [vmem:[#allocation16 + $0x164] ss:$8 sps:$4 sm:$0xff]  }
 0x445   :  { %v7612_v41 = vmax.f32 %v10238_v32, 0.0  ;;  %v7611_v37 = vmax.f32 %v10207_v2, 0.0  ;;  %v11279_v32 = vld [vmem:[#allocation16 + $0x160] ss:$8 sps:$4 sm:$0xff]  }
 0x446   :  { %v7662_v14 = vpack.c.bf16 %v7610_v1, %v7606_v50  ;;  %v7613_v62 = vmax.f32 %v10239_v12, 0.0  ;;  %v11284_v1 = vld [vmem:[#allocation16 + $0x174] ss:$8 sps:$4 sm:$0xff]  }
 0x447   :  { %v12708_v29 = vpack.c.bf16 %v7612_v41, %v7608_v16  ;;  %v7663_v43 = vpack.c.bf16 %v7611_v37, %v7607_v24  ;;  %v7089_v20 = vpop.f32.mrb[76].mxu0  ;;  %8202 = vmatpush1.bf16.msra.mxu0 %v11270_v15 }
 0x448   :  { %v12710_v22 = vpack.c.bf16 %v7613_v62, %v7609_v58  ;;  %v10208_v26 = vadd.f32 %v7089_v20, %v12663_v33  ;;  %v7541_v53 = vpop.f32.mrb[76].mxu1  ;;  %v7091_v17 = vpop.f32.mrb[77].mxu0  ;;  %8203 = vmatprep.subr.bf16.mxu0 %v11275_v13 }
 0x449   :  { %v10240_v44 = vadd.f32 %v7541_v53, %v12667_v6  ;;  %v10209_v34 = vadd.f32 %v7091_v17, %v12670_v10  ;;  %v7543_v38 = vpop.f32.mrb[77].mxu1  ;;  %v7093_v48 = vpop.f32.mrb[78].mxu0  ;;  %8134 = vmatprep.mubr.bf16.mxu0 %v7663_v43  ;;  %v11282_v43 = vld [vmem:[#allocation16 + $0x170] ss:$8 sps:$4 sm:$0xff]   ;;  %v11287_v53 = vld [vmem:[#allocation16 + $0x184] ss:$8 sps:$4 sm:$0xff]  }
 0x44a   :  { %v10241_v35 = vadd.f32 %v7543_v38, %v12674_v60  ;;  %v10210_v36 = vadd.f32 %v7093_v48, %v12663_v33  ;;  %v7545_v5 = vpop.f32.mrb[78].mxu1  ;;  %v7095_v0 = vpop.f32.mrb[79].mxu0  ;;  %8135 = vmatmul.mubr.bf16.gmra.mrb[104].mxu0 %v7662_v14  ;;  %v7614_v46 = vmax.f32 %v10208_v26, 0.0 }
 0x44b   :  { %v10242_v55 = vadd.f32 %v7545_v5, %v12667_v6  ;;  %v10211_v56 = vadd.f32 %v7095_v0, %v12670_v10  ;;  %v7547_v52 = vpop.f32.mrb[79].mxu1  ;;  %8204 = vmatpush1.bf16.msra.mxu0 %v11273_v3  ;;  %v7616_v61 = vmax.f32 %v10240_v44, 0.0  ;;  %v7615_v30 = vmax.f32 %v10209_v34, 0.0  ;;  %v11285_v0 = vld [vmem:[#allocation16 + $0x180] ss:$8 sps:$4 sm:$0xff]  }
 0x44c   :  { %v7618_v25 = vmax.f32 %v10210_v36, 0.0  ;;  %v10243_v54 = vadd.f32 %v7547_v52, %v12674_v60  ;;  %8205 = vmatprep.subr.bf16.mxu0 %v11278_v11  ;;  %v7617_v57 = vmax.f32 %v10241_v35, 0.0 }
 0x44d   :  { %v7620_v28 = vmax.f32 %v10242_v55, 0.0  ;;  %v7619_v18 = vmax.f32 %v10211_v56, 0.0 }
 0x44e   :  { %v7666_v7 = vpack.c.bf16 %v7618_v25, %v7614_v46  ;;  %v7621_v51 = vmax.f32 %v10243_v54, 0.0  ;;  %v11290_v46 = vld [vmem:[#allocation16 + $0x194] ss:$8 sps:$4 sm:$0xff]  }
 0x44f   :  { %v12720_v49 = vpack.c.bf16 %v7620_v28, %v7616_v61  ;;  %v7667_v8 = vpack.c.bf16 %v7619_v18, %v7615_v30  ;;  %v7099_v4 = vpop.f32.mrb[80].mxu0  ;;  %8206 = vmatpush1.bf16.msra.mxu0 %v11276_v39 }
 0x450   :  { %v12722_v2 = vpack.c.bf16 %v7621_v51, %v7617_v57  ;;  %v10212_v63 = vadd.f32 %v7099_v4, %v12663_v33  ;;  %v7551_v15 = vpop.f32.mrb[80].mxu1  ;;  %v7101_v50 = vpop.f32.mrb[81].mxu0  ;;  %8207 = vmatprep.subr.bf16.mxu0 %v11281_v42  ;;  %v11288_v4 = vld [vmem:[#allocation16 + $0x190] ss:$8 sps:$4 sm:$0xff]  }
 0x451   :  { %v10244_v12 = vadd.f32 %v7551_v15, %v12667_v6  ;;  %v10213_v13 = vadd.f32 %v7101_v50, %v12670_v10  ;;  %v7553_v16 = vpop.f32.mrb[81].mxu1  ;;  %v7103_v24 = vpop.f32.mrb[82].mxu0  ;;  %8144 = vmatprep.mubr.bf16.mxu0 %v7667_v8  ;;  %v11293_v50 = vld [vmem:[#allocation16 + $0x1a4] ss:$8 sps:$4 sm:$0xff]  }
 0x452   :  { %v10245_v41 = vadd.f32 %v7553_v16, %v12674_v60  ;;  %v10214_v37 = vadd.f32 %v7103_v24, %v12663_v33  ;;  %v7555_v59 = vpop.f32.mrb[82].mxu1  ;;  %v7105_v58 = vpop.f32.mrb[83].mxu0  ;;  %8145 = vmatmul.mubr.bf16.gmra.mrb[108].mxu0 %v7666_v7  ;;  %v7622_v20 = vmax.f32 %v10212_v63, 0.0 }
 0x453   :  { %v10246_v14 = vadd.f32 %v7555_v59, %v12667_v6  ;;  %v10215_v62 = vadd.f32 %v7105_v58, %v12670_v10  ;;  %v7557_v19 = vpop.f32.mrb[83].mxu1  ;;  %8208 = vmatpush1.bf16.msra.mxu0 %v11279_v32  ;;  %v7624_v17 = vmax.f32 %v10244_v12, 0.0  ;;  %v7623_v11 = vmax.f32 %v10213_v13, 0.0 }
 0x454   :  { %v7626_v3 = vmax.f32 %v10214_v37, 0.0  ;;  %v10247_v26 = vadd.f32 %v7557_v19, %v12674_v60  ;;  %8209 = vmatprep.subr.bf16.mxu0 %v11284_v1  ;;  %v7625_v38 = vmax.f32 %v10245_v41, 0.0 }
 0x455   :  { %v7628_v44 = vmax.f32 %v10246_v14, 0.0  ;;  %v7627_v34 = vmax.f32 %v10215_v62, 0.0  ;;  %v11291_v62 = vld [vmem:[#allocation16 + $0x1a0] ss:$8 sps:$4 sm:$0xff]  }
 0x456   :  { %v7670_v48 = vpack.c.bf16 %v7626_v3, %v7622_v20  ;;  %v7629_v40 = vmax.f32 %v10247_v26, 0.0  ;;  %v11296_v26 = vld [vmem:[#allocation16 + $0x1b4] ss:$8 sps:$4 sm:$0xff]  }
 0x457   :  { %v12732_v35 = vpack.c.bf16 %v7628_v44, %v7624_v17  ;;  %v7671_v36 = vpack.c.bf16 %v7627_v34, %v7623_v11  ;;  %v7109_v5 = vpop.f32.mrb[84].mxu0  ;;  %8210 = vmatpush1.bf16.msra.mxu0 %v11282_v43 }
 0x458   :  { %v12734_v55 = vpack.c.bf16 %v7629_v40, %v7625_v38  ;;  %v10216_v56 = vadd.f32 %v7109_v5, %v12663_v33  ;;  %v7561_v52 = vpop.f32.mrb[84].mxu1  ;;  %v7111_v39 = vpop.f32.mrb[85].mxu0  ;;  %8211 = vmatprep.subr.bf16.mxu0 %v11287_v53 }
 0x459   :  { %v10248_v25 = vadd.f32 %v7561_v52, %v12667_v6  ;;  %v10217_v54 = vadd.f32 %v7111_v39, %v12670_v10  ;;  %v7563_v42 = vpop.f32.mrb[85].mxu1  ;;  %v7113_v61 = vpop.f32.mrb[86].mxu0  ;;  %8154 = vmatprep.mubr.bf16.mxu0 %v7671_v36 }
 0x45a   :  { %v10249_v30 = vadd.f32 %v7563_v42, %v12674_v60  ;;  %v10218_v28 = vadd.f32 %v7113_v61, %v12663_v33  ;;  %v7565_v18 = vpop.f32.mrb[86].mxu1  ;;  %v7115_v57 = vpop.f32.mrb[87].mxu0  ;;  %8155 = vmatmul.mubr.bf16.gmra.mrb[112].mxu0 %v7670_v48  ;;  %v7630_v32 = vmax.f32 %v10216_v56, 0.0  ;;  %v11294_v56 = vld [vmem:[#allocation16 + $0x1b0] ss:$8 sps:$4 sm:$0xff]  }
 0x45b   :  { %v10250_v7 = vadd.f32 %v7565_v18, %v12667_v6  ;;  %v10219_v51 = vadd.f32 %v7115_v57, %v12670_v10  ;;  %v7567_v8 = vpop.f32.mrb[87].mxu1  ;;  %8212 = vmatpush1.bf16.msra.mxu0 %v11285_v0  ;;  %v7632_v1 = vmax.f32 %v10248_v25, 0.0  ;;  %v7631_v12 = vmax.f32 %v10217_v54, 0.0  ;;  %v11299_v25 = vld [vmem:[#allocation16 + $0x1c4] ss:$8 sps:$4 sm:$0xff]  }
 0x45c   :  { %v7634_v63 = vmax.f32 %v10218_v28, 0.0  ;;  %v10251_v15 = vadd.f32 %v7567_v8, %v12674_v60  ;;  %8213 = vmatprep.subr.bf16.mxu0 %v11290_v46  ;;  %v7633_v24 = vmax.f32 %v10249_v30, 0.0 }
 0x45d   :  { %v7636_v13 = vmax.f32 %v10250_v7, 0.0  ;;  %v7635_v16 = vmax.f32 %v10219_v51, 0.0 }
 0x45e   :  { %v7674_v41 = vpack.c.bf16 %v7634_v63, %v7630_v32  ;;  %v7637_v37 = vmax.f32 %v10251_v15, 0.0 }
 0x45f   :  { %v12744_v59 = vpack.c.bf16 %v7636_v13, %v7632_v1  ;;  %v7675_v58 = vpack.c.bf16 %v7635_v16, %v7631_v12  ;;  %v7119_v14 = vpop.f32.mrb[88].mxu0  ;;  %8214 = vmatpush1.bf16.msra.mxu0 %v11288_v4  ;;  %v11297_v4 = vld [vmem:[#allocation16 + $0x1c0] ss:$8 sps:$4 sm:$0xff]   ;;  %v11302_v1 = vld [vmem:[#allocation16 + $0x1d4] ss:$8 sps:$4 sm:$0xff]  }
 0x460   :  { %v12746_v19 = vpack.c.bf16 %v7637_v37, %v7633_v24  ;;  %v10220_v43 = vadd.f32 %v7119_v14, %v12663_v33  ;;  %v7571_v20 = vpop.f32.mrb[88].mxu1  ;;  %v7121_v3 = vpop.f32.mrb[89].mxu0  ;;  %8215 = vmatprep.subr.bf16.mxu0 %v11293_v50 }
 0x461   :  { %v10252_v53 = vadd.f32 %v7571_v20, %v12667_v6  ;;  %v10221_v17 = vadd.f32 %v7121_v3, %v12670_v10  ;;  %v7573_v11 = vpop.f32.mrb[89].mxu1  ;;  %v7123_v44 = vpop.f32.mrb[90].mxu0  ;;  %8164 = vmatprep.mubr.bf16.mxu0 %v7675_v58  ;;  %v11300_v3 = vld [vmem:[#allocation16 + $0x1d0] ss:$8 sps:$4 sm:$0xff]  }
 0x462   :  { %v10253_v34 = vadd.f32 %v7573_v11, %v12674_v60  ;;  %v10222_v38 = vadd.f32 %v7123_v44, %v12663_v33  ;;  %v7575_v48 = vpop.f32.mrb[90].mxu1  ;;  %v7125_v40 = vpop.f32.mrb[91].mxu0  ;;  %8165 = vmatmul.mubr.bf16.gmra.mrb[116].mxu0 %v7674_v41  ;;  %v7638_v52 = vmax.f32 %v10220_v43, 0.0  ;;  %v11305_v11 = vld [vmem:[#allocation16 + $0x1e4] ss:$8 sps:$4 sm:$0xff]  }
 0x463   :  { %v10254_v36 = vadd.f32 %v7575_v48, %v12667_v6  ;;  %v10223_v5 = vadd.f32 %v7125_v40, %v12670_v10  ;;  %v7577_v0 = vpop.f32.mrb[91].mxu1  ;;  %8216 = vmatpush1.bf16.msra.mxu0 %v11291_v62  ;;  %v7640_v54 = vmax.f32 %v10252_v53, 0.0  ;;  %v7639_v42 = vmax.f32 %v10221_v17, 0.0 }
 0x464   :  { %v7642_v39 = vmax.f32 %v10222_v38, 0.0  ;;  %v10255_v46 = vadd.f32 %v7577_v0, %v12674_v60  ;;  %8217 = vmatprep.subr.bf16.mxu0 %v11296_v26  ;;  %v7641_v28 = vmax.f32 %v10253_v34, 0.0 }
 0x465   :  { %v7644_v61 = vmax.f32 %v10254_v36, 0.0  ;;  %v7643_v30 = vmax.f32 %v10223_v5, 0.0 }
 0x466   :  { %v7678_v18 = vpack.c.bf16 %v7642_v39, %v7638_v52  ;;  %v7645_v57 = vmax.f32 %v10255_v46, 0.0 }
 0x467   :  { %v12756_v7 = vpack.c.bf16 %v7644_v61, %v7640_v54  ;;  %v7679_v51 = vpack.c.bf16 %v7643_v30, %v7639_v42  ;;  %v7129_v8 = vpop.f32.mrb[92].mxu0  ;;  %8218 = vmatpush1.bf16.msra.mxu0 %v11294_v56  ;;  %v11308_v56 = vld [vmem:[#allocation16 + $0x1f4] ss:$8 sps:$4 sm:$0xff]  }
 0x468   :  { %v7681_v32 = vpack.c.bf16 %v7645_v57, %v7641_v28  ;;  %v10224_v63 = vadd.f32 %v7129_v8, %v12663_v33  ;;  %v7581_v15 = vpop.f32.mrb[92].mxu1  ;;  %v7131_v50 = vpop.f32.mrb[93].mxu0  ;;  %8219 = vmatprep.subr.bf16.mxu0 %v11299_v25  ;;  %v11326_v57 = vld [vmem:[#allocation22 + $0x8] sm:$0xff]  }
 0x469   :  { %v10256_v12 = vadd.f32 %v7581_v15, %v12667_v6  ;;  %v10225_v13 = vadd.f32 %v7131_v50, %v12670_v10  ;;  %v7583_v16 = vpop.f32.mrb[93].mxu1  ;;  %v7133_v24 = vpop.f32.mrb[94].mxu0  ;;  %8174 = vmatprep.mubr.bf16.mxu0 %v7679_v51  ;;  %v11327_v50 = vld [vmem:[#allocation22 + $0x10] sm:$0xff]  }
 0x46a   :  { %v10257_v41 = vadd.f32 %v7583_v16, %v12674_v60  ;;  %v10226_v37 = vadd.f32 %v7133_v24, %v12663_v33  ;;  %v7585_v58 = vpop.f32.mrb[94].mxu1  ;;  %v7135_v14 = vpop.f32.mrb[95].mxu0  ;;  %8175 = vmatmul.mubr.bf16.gmra.mrb[120].mxu0 %v7678_v18  ;;  %v7646_v26 = vmax.f32 %v10224_v63, 0.0 }
 0x46b   :  { %v10258_v62 = vadd.f32 %v7585_v58, %v12667_v6  ;;  %v10227_v43 = vadd.f32 %v7135_v14, %v12670_v10  ;;  %v7587_v20 = vpop.f32.mrb[95].mxu1  ;;  %8220 = vmatpush1.bf16.msra.mxu0 %v11297_v4  ;;  %v7648_v44 = vmax.f32 %v10256_v12, 0.0  ;;  %v7647_v34 = vmax.f32 %v10225_v13, 0.0  ;;  %v11303_v10 = vld [vmem:[#allocation16 + $0x1e0] ss:$8 sps:$4 sm:$0xff]  }
 0x46c   :  { %v7650_v53 = vmax.f32 %v10226_v37, 0.0  ;;  %v10259_v17 = vadd.f32 %v7587_v20, %v12674_v60  ;;  %8221 = vmatprep.subr.bf16.mxu0 %v11302_v1  ;;  %v7649_v48 = vmax.f32 %v10257_v41, 0.0  ;;  %v11306_v60 = vld [vmem:[#allocation16 + $0x1f0] ss:$8 sps:$4 sm:$0xff]   ;;  %v11328_v58 = vld [vmem:[#allocation22 + $0x18] sm:$0xff]  }
 0x46d   :  { %v7652_v38 = vmax.f32 %v10258_v62, 0.0  ;;  %v7651_v33 = vmax.f32 %v10227_v43, 0.0 }
 0x46e   :  { %v7682_v40 = vpack.c.bf16 %v7650_v53, %v7646_v26  ;;  %v7653_v36 = vmax.f32 %v10259_v17, 0.0  ;;  %v11329_v17 = vld [vmem:[#allocation22 + $0x20] sm:$0xff]  }
 0x46f   :  { %v7684_v5 = vpack.c.bf16 %v7652_v38, %v7648_v44  ;;  %v7683_v6 = vpack.c.bf16 %v7651_v33, %v7647_v34  ;;  %8222 = vmatpush1.bf16.msra.mxu0 %v11300_v3 }
 0x470   :  { %v7685_v0 = vpack.c.bf16 %v7653_v36, %v7649_v48  ;;  %8223 = vmatprep.subr.bf16.mxu0 %v11305_v11  ;;  %v11330_v36 = vld [vmem:[#allocation22 + $0x28] sm:$0xff]  }
 0x471   :  { %8184 = vmatprep.mubr.bf16.mxu0 %v7683_v6 }
 0x472   :  { %8185 = vmatmul.mubr.bf16.gmra.mrb[124].mxu0 %v7682_v40 }
 0x473   :  { %8224 = vmatpush1.bf16.msra.mxu0 %v11303_v10  ;;  %8227 = vmatprep.mubr.bf16.mxu0 %v12686_v47  ;;  %v11324_v47 = vld [vmem:[#allocation19 + $0x38] sm:$0xff]  }
 0x474   :  { %8225 = vmatprep.subr.bf16.mxu0 %v11308_v56 }
 0x477   :  { %8226 = vmatpush1.bf16.msra.mxu0 %v11306_v60 }
 0x47a   :  { %8228 = vmatmul.mubr.bf16.vlgmr.msra.gmra.mrb[96].mxu0 %v12684_v31  ;;  %v11323_v31 = vld [vmem:[#allocation19 + $0x78] sm:$0xff]  }
 0x47b   :  { %8237 = vmatprep.mubr.bf16.mxu0 %v12698_v27  ;;  %9970 = vmatprep.subr.bf16.mxu1 %v11323_v31  ;;  %v7750_v27 = vld [vmem:[#allocation17] sm:$0x3] }
 0x47c   :  { %9971 = vmatpush3.bf16.msra.mxu1 %v11324_v47 }
 0x482   :  { %8238 = vmatmul.mubr.bf16.gmra.mrb[100].mxu0 %v12696_v21  ;;  %v11325_v21 = vld [vmem:[#allocation22] sm:$0xff]  }
 0x483   :  { %8247 = vmatprep.mubr.bf16.mxu0 %v12710_v22  ;;  %10036 = vmatprep.subr.bf16.mxu1 %v11325_v21  ;;  %v12783_v22 = vrot.slane %v7750_v27, %v12303_v45 }
 0x48a   :  { %8248 = vmatmul.mubr.bf16.gmra.mrb[104].mxu0 %v12708_v29  ;;  %v12780_v29 = vrot.slane %v7750_v27, %v12299_v9 }
 0x48b   :  { %8257 = vmatprep.mubr.bf16.mxu0 %v12722_v2 }
 0x492   :  { %8258 = vmatmul.mubr.bf16.gmra.mrb[108].mxu0 %v12720_v49 }
 0x493   :  { %8267 = vmatprep.mubr.bf16.mxu0 %v12734_v55 }
 0x49a   :  { %8268 = vmatmul.mubr.bf16.gmra.mrb[112].mxu0 %v12732_v35 }
 0x49b   :  { %8277 = vmatprep.mubr.bf16.mxu0 %v12746_v19 }
 0x4a2   :  { %8278 = vmatmul.mubr.bf16.gmra.mrb[116].mxu0 %v12744_v59 }
 0x4a3   :  { %8287 = vmatprep.mubr.bf16.mxu0 %v7681_v32 }
 0x4aa   :  { %8288 = vmatmul.mubr.bf16.gmra.mrb[120].mxu0 %v12756_v7 }
 0x4ab   :  { %8297 = vmatprep.mubr.bf16.mxu0 %v7685_v0 }
 0x4b2   :  { %8298 = vmatmul.mubr.bf16.gmra.mrb[124].mxu0 %v7684_v5 }
 0x54d   :  { %v8229_v49 = vpop.f32.mrb[96].mxu0 }
 0x54e   :  { %v10260_v2 = vadd.f32 %v8229_v49, %v12780_v29  ;;  %v8231_v35 = vpop.f32.mrb[97].mxu0 }
 0x54f   :  { %v10261_v55 = vadd.f32 %v8231_v35, %v12783_v22  ;;  %v8233_v59 = vpop.f32.mrb[98].mxu0 }
 0x550   :  { %v10262_v19 = vadd.f32 %v8233_v59, %v12780_v29  ;;  %v8235_v52 = vpop.f32.mrb[99].mxu0  ;;  %v8308_v46 = vmax.f32 %v10260_v2, 0.0 }
 0x551   :  { %v10263_v39 = vadd.f32 %v8235_v52, %v12783_v22  ;;  %v8309_v54 = vmax.f32 %v10261_v55, 0.0 }
 0x552   :  { %v8310_v25 = vmax.f32 %v10262_v19, 0.0 }
 0x553   :  { %v8311_v42 = vmax.f32 %v10263_v39, 0.0 }
 0x554   :  { %v8340_v61 = vpack.c.bf16 %v8310_v25, %v8308_v46 }
 0x555   :  { %v8341_v30 = vpack.c.bf16 %v8311_v42, %v8309_v54  ;;  %v8239_v45 = vpop.f32.mrb[100].mxu0 }
 0x556   :  { %v10264_v28 = vadd.f32 %v8239_v45, %v12780_v29  ;;  %v8241_v18 = vpop.f32.mrb[101].mxu0 }
 0x557   :  { %v10265_v7 = vadd.f32 %v8241_v18, %v12783_v22  ;;  %v8243_v51 = vpop.f32.mrb[102].mxu0  ;;  %8523 = vmatprep.mubr.bf16.mxu1 %v8341_v30 }
 0x558   :  { %v10266_v8 = vadd.f32 %v8243_v51, %v12780_v29  ;;  %v8245_v4 = vpop.f32.mrb[103].mxu0  ;;  %8524 = vmatmul.mubr.bf16.vlgmr.msra.gmra.mrb[96].mxu1 %v8340_v61  ;;  %v8312_v63 = vmax.f32 %v10264_v28, 0.0 }
 0x559   :  { %v10267_v32 = vadd.f32 %v8245_v4, %v12783_v22  ;;  %10037 = vmatpush3.bf16.msra.mxu1 %v11325_v21  ;;  %v8313_v1 = vmax.f32 %v10265_v7, 0.0 }
 0x55a   :  { %v8314_v15 = vmax.f32 %v10266_v8, 0.0  ;;  %10038 = vmatprep.subr.bf16.mxu1 %v11326_v57 }
 0x55b   :  { %v8315_v12 = vmax.f32 %v10267_v32, 0.0 }
 0x55c   :  { %v8342_v13 = vpack.c.bf16 %v8314_v15, %v8312_v63 }
 0x55d   :  { %v8343_v16 = vpack.c.bf16 %v8315_v12, %v8313_v1  ;;  %v8249_v24 = vpop.f32.mrb[104].mxu0  ;;  %10039 = vmatpush3.bf16.msra.mxu1 %v11326_v57 }
 0x55e   :  { %v10268_v41 = vadd.f32 %v8249_v24, %v12780_v29  ;;  %v8251_v37 = vpop.f32.mrb[105].mxu0  ;;  %10040 = vmatprep.subr.bf16.mxu1 %v11327_v50 }
 0x55f   :  { %v10269_v14 = vadd.f32 %v8251_v37, %v12783_v22  ;;  %v8253_v62 = vpop.f32.mrb[106].mxu0  ;;  %8531 = vmatprep.mubr.bf16.mxu1 %v8343_v16 }
 0x560   :  { %v10270_v43 = vadd.f32 %v8253_v62, %v12780_v29  ;;  %v8255_v20 = vpop.f32.mrb[107].mxu0  ;;  %8532 = vmatmul.mubr.bf16.gmra.mrb[100].mxu1 %v8342_v13  ;;  %v8316_v26 = vmax.f32 %v10268_v41, 0.0 }
 0x561   :  { %v10271_v3 = vadd.f32 %v8255_v20, %v12783_v22  ;;  %10041 = vmatpush3.bf16.msra.mxu1 %v11327_v50  ;;  %v8317_v11 = vmax.f32 %v10269_v14, 0.0 }
 0x562   :  { %v8318_v53 = vmax.f32 %v10270_v43, 0.0  ;;  %10042 = vmatprep.subr.bf16.mxu1 %v11328_v58 }
 0x563   :  { %v8319_v44 = vmax.f32 %v10271_v3, 0.0 }
 0x564   :  { %v8344_v34 = vpack.c.bf16 %v8318_v53, %v8316_v26 }
 0x565   :  { %v8345_v38 = vpack.c.bf16 %v8319_v44, %v8317_v11  ;;  %v8259_v33 = vpop.f32.mrb[108].mxu0  ;;  %10043 = vmatpush3.bf16.msra.mxu1 %v11328_v58 }
 0x566   :  { %v10272_v48 = vadd.f32 %v8259_v33, %v12780_v29  ;;  %v8261_v40 = vpop.f32.mrb[109].mxu0  ;;  %10044 = vmatprep.subr.bf16.mxu1 %v11329_v17 }
 0x567   :  { %v10273_v5 = vadd.f32 %v8261_v40, %v12783_v22  ;;  %v8263_v6 = vpop.f32.mrb[110].mxu0  ;;  %8539 = vmatprep.mubr.bf16.mxu1 %v8345_v38 }
 0x568   :  { %v10274_v10 = vadd.f32 %v8263_v6, %v12780_v29  ;;  %v8265_v0 = vpop.f32.mrb[111].mxu0  ;;  %8540 = vmatmul.mubr.bf16.gmra.mrb[104].mxu1 %v8344_v34  ;;  %v8320_v60 = vmax.f32 %v10272_v48, 0.0 }
 0x569   :  { %v10275_v56 = vadd.f32 %v8265_v0, %v12783_v22  ;;  %10045 = vmatpush3.bf16.msra.mxu1 %v11329_v17  ;;  %v8321_v47 = vmax.f32 %v10273_v5, 0.0 }
 0x56a   :  { %v8322_v31 = vmax.f32 %v10274_v10, 0.0  ;;  %10046 = vmatprep.subr.bf16.mxu1 %v11330_v36 }
 0x56b   :  { %v8323_v21 = vmax.f32 %v10275_v56, 0.0 }
 0x56c   :  { %v8346_v27 = vpack.c.bf16 %v8322_v31, %v8320_v60 }
 0x56d   :  { %v8347_v49 = vpack.c.bf16 %v8323_v21, %v8321_v47  ;;  %v8269_v2 = vpop.f32.mrb[112].mxu0  ;;  %10047 = vmatpush3.bf16.msra.mxu1 %v11330_v36  ;;  %v11331_v47 = vld [vmem:[#allocation22 + $0x30] sm:$0xff]   ;;  %v11332_v21 = vld [vmem:[#allocation22 + $0x38] sm:$0xff]  }
 0x56e   :  { %v10276_v35 = vadd.f32 %v8269_v2, %v12780_v29  ;;  %v8271_v55 = vpop.f32.mrb[113].mxu0  ;;  %10048 = vmatprep.subr.bf16.mxu1 %v11331_v47  ;;  %v8832_v2 = vld [vmem:[%s12907_s10 + $0x20] sm:$0xff] }
 0x56f   :  { %v10277_v59 = vadd.f32 %v8271_v55, %v12783_v22  ;;  %v8273_v19 = vpop.f32.mrb[114].mxu0  ;;  %8547 = vmatprep.mubr.bf16.mxu1 %v8347_v49  ;;  %v8831_v49 = vld [vmem:[%s12907_s10 + $0x18] sm:$0xff]  ;;  %v8834_v55 = vld [vmem:[%s12907_s10 + $0x30] sm:$0xff] }
 0x570   :  { %v10278_v52 = vadd.f32 %v8273_v19, %v12780_v29  ;;  %v8275_v39 = vpop.f32.mrb[115].mxu0  ;;  %8548 = vmatmul.mubr.bf16.gmra.mrb[108].mxu1 %v8346_v27  ;;  %v8324_v25 = vmax.f32 %v10276_v35, 0.0  ;;  %v8830_v27 = vld [vmem:[%s12907_s10 + $0x10] sm:$0xff]  ;;  %v8833_v35 = vld [vmem:[%s12907_s10 + $0x28] sm:$0xff] }
 0x571   :  { %v10279_v46 = vadd.f32 %v8275_v39, %v12783_v22  ;;  %v8325_v42 = vmax.f32 %v10277_v59, 0.0  ;;  %10049 = vmatpush3.bf16.msra.mxu1 %v11331_v47  ;;  %v12838_v19 = vld [vmem:[#allocation20] ss:$0 sm:$0xff] }
 0x572   :  { %v8326_v54 = vmax.f32 %v10278_v52, 0.0  ;;  %10050 = vmatprep.subr.bf16.mxu1 %v11332_v21 }
 0x573   :  { %v8327_v61 = vmax.f32 %v10279_v46, 0.0 }
 0x574   :  { %v8348_v30 = vpack.c.bf16 %v8326_v54, %v8324_v25 }
 0x575   :  { %v8349_v45 = vpack.c.bf16 %v8327_v61, %v8325_v42  ;;  %v8279_v28 = vpop.f32.mrb[116].mxu0  ;;  %10051 = vmatpush3.bf16.msra.mxu1 %v11332_v21 }
 0x576   :  { %v10280_v18 = vadd.f32 %v8279_v28, %v12780_v29  ;;  %v8281_v57 = vpop.f32.mrb[117].mxu0 }
 0x577   :  { %v10281_v7 = vadd.f32 %v8281_v57, %v12783_v22  ;;  %v8283_v51 = vpop.f32.mrb[118].mxu0  ;;  %8555 = vmatprep.mubr.bf16.mxu1 %v8349_v45 }
 0x578   :  { %v10282_v8 = vadd.f32 %v8283_v51, %v12780_v29  ;;  %v8285_v4 = vpop.f32.mrb[119].mxu0  ;;  %8556 = vmatmul.mubr.bf16.gmra.mrb[112].mxu1 %v8348_v30  ;;  %v8328_v63 = vmax.f32 %v10280_v18, 0.0 }
 0x579   :  { %v10283_v32 = vadd.f32 %v8285_v4, %v12783_v22  ;;  %v8329_v50 = vmax.f32 %v10281_v7, 0.0 }
 0x57a   :  { %v8330_v15 = vmax.f32 %v10282_v8, 0.0 }
 0x57b   :  { %v8331_v1 = vmax.f32 %v10283_v32, 0.0 }
 0x57c   :  { %v8350_v12 = vpack.c.bf16 %v8330_v15, %v8328_v63 }
 0x57d   :  { %v8351_v13 = vpack.c.bf16 %v8331_v1, %v8329_v50  ;;  %v8289_v16 = vpop.f32.mrb[120].mxu0 }
 0x57e   :  { %v10284_v24 = vadd.f32 %v8289_v16, %v12780_v29  ;;  %v8291_v41 = vpop.f32.mrb[121].mxu0 }
 0x57f   :  { %v10285_v37 = vadd.f32 %v8291_v41, %v12783_v22  ;;  %v8293_v58 = vpop.f32.mrb[122].mxu0  ;;  %8563 = vmatprep.mubr.bf16.mxu1 %v8351_v13 }
 0x580   :  { %v10286_v14 = vadd.f32 %v8293_v58, %v12780_v29  ;;  %v8295_v62 = vpop.f32.mrb[123].mxu0  ;;  %8564 = vmatmul.mubr.bf16.gmra.mrb[116].mxu1 %v8350_v12  ;;  %v8332_v20 = vmax.f32 %v10284_v24, 0.0 }
 0x581   :  { %v10287_v43 = vadd.f32 %v8295_v62, %v12783_v22  ;;  %v8333_v26 = vmax.f32 %v10285_v37, 0.0 }
 0x582   :  { %v8334_v3 = vmax.f32 %v10286_v14, 0.0 }
 0x583   :  { %v8335_v53 = vmax.f32 %v10287_v43, 0.0 }
 0x584   :  { %v8352_v17 = vpack.c.bf16 %v8334_v3, %v8332_v20 }
 0x585   :  { %v8353_v11 = vpack.c.bf16 %v8335_v53, %v8333_v26  ;;  %v8299_v44 = vpop.f32.mrb[124].mxu0 }
 0x586   :  { %v10288_v34 = vadd.f32 %v8299_v44, %v12780_v29  ;;  %v8301_v38 = vpop.f32.mrb[125].mxu0 }
 0x587   :  { %v10289_v33 = vadd.f32 %v8301_v38, %v12783_v22  ;;  %v8303_v48 = vpop.f32.mrb[126].mxu0  ;;  %8571 = vmatprep.mubr.bf16.mxu1 %v8353_v11 }
 0x588   :  { %v10290_v40 = vadd.f32 %v8303_v48, %v12780_v29  ;;  %v8305_v36 = vpop.f32.mrb[127].mxu0  ;;  %8572 = vmatmul.mubr.bf16.gmra.mrb[120].mxu1 %v8352_v17  ;;  %v8336_v6 = vmax.f32 %v10288_v34, 0.0  ;;  %v8828_v29 = vld [vmem:[%s12907_s10] sm:$0xff] }
 0x589   :  { %v10291_v5 = vadd.f32 %v8305_v36, %v12783_v22  ;;  %v8337_v0 = vmax.f32 %v10289_v33, 0.0  ;;  %8846 = vperm.xlu1 %10793, %v8828_v29   ;;  %v8829_v22 = vld [vmem:[%s12907_s10 + $0x8] sm:$0xff] }
 0x58a   :  { %v8338_v10 = vmax.f32 %v10290_v40, 0.0 }
 0x58b   :  { %v8339_v56 = vmax.f32 %v10291_v5, 0.0 }
 0x58c   :  { %v8354_v60 = vpack.c.bf16 %v8338_v10, %v8336_v6 }
 0x58d   :  { %v8355_v31 = vpack.c.bf16 %v8339_v56, %v8337_v0  ;;  %8851 = vperm.xlu1 %10793, %v8829_v22  }
 0x58f   :  { %8579 = vmatprep.mubr.bf16.mxu1 %v8355_v31 }
 0x590   :  { %8580 = vmatmul.mubr.bf16.gmra.mrb[124].mxu1 %v8354_v60 }
 0x591   :  { %8856 = vperm.xlu1 %10793, %v8830_v27  }
 0x595   :  { %8861 = vperm.xlu1 %10793, %v8831_v49  }
 0x599   :  { %8866 = vperm.xlu1 %10793, %v8832_v2  }
 0x59d   :  { %8871 = vperm.xlu1 %10793, %v8833_v35  }
 0x5a1   :  { %8876 = vperm.xlu1 %10793, %v8834_v55  }
 0x62b   :  { %v9972_v59 = vpop.f32.mrb[96].mxu1 }
 0x62c   :  { %v9973_v52 = vpop.f32.mrb[97].mxu1 }
 0x62d   :  { %v9974_v39 = vadd.f32 %v9973_v52, %v9972_v59  ;;  %v9975_v46 = vpop.f32.mrb[98].mxu1 }
 0x62e   :  { %v9976_v25 = vpop.f32.mrb[99].mxu1 }
 0x62f   :  { %v8526_v54 = vadd.f32 %v9974_v39, %v12838_v19  ;;  %v9977_v42 = vadd.f32 %v9976_v25, %v9975_v46 }
 0x631   :  { %v8529_v61 = vadd.f32 %v9977_v42, %v12838_v19  ;;  %v8588_v30 = vmax.f32 %v8526_v54, 0.0 }
 0x633   :  { %v8589_v45 = vmax.f32 %v8529_v61, 0.0  ;;  %v9978_v28 = vpop.f32.mrb[100].mxu1 }
 0x634   :  { %v9979_v18 = vpop.f32.mrb[101].mxu1 }
 0x635   :  { %v9980_v57 = vadd.f32 %v9979_v18, %v9978_v28  ;;  %v9981_v7 = vpop.f32.mrb[102].mxu1  ;;  %v8604_v51 = vpack.c.bf16 %v8589_v45, %v8588_v30 }
 0x636   :  { %v9982_v8 = vpop.f32.mrb[103].mxu1 }
 0x637   :  { %v8534_v4 = vadd.f32 %v9980_v57, %v12838_v19  ;;  %v9983_v32 = vadd.f32 %v9982_v8, %v9981_v7  ;;  %10052 = vmatprep.mubr.bf16.mxu1 %v8604_v51 }
 0x639   :  { %v8537_v63 = vadd.f32 %v9983_v32, %v12838_v19  ;;  %v8590_v15 = vmax.f32 %v8534_v4, 0.0 }
 0x63b   :  { %v8591_v50 = vmax.f32 %v8537_v63, 0.0  ;;  %v9984_v1 = vpop.f32.mrb[104].mxu1 }
 0x63c   :  { %v9985_v12 = vpop.f32.mrb[105].mxu1 }
 0x63d   :  { %v8605_v13 = vpack.c.bf16 %v8591_v50, %v8590_v15  ;;  %v9986_v16 = vadd.f32 %v9985_v12, %v9984_v1  ;;  %v9987_v24 = vpop.f32.mrb[106].mxu1 }
 0x63e   :  { %v9988_v41 = vpop.f32.mrb[107].mxu1 }
 0x63f   :  { %v8542_v37 = vadd.f32 %v9986_v16, %v12838_v19  ;;  %v9989_v58 = vadd.f32 %v9988_v41, %v9987_v24  ;;  %10053 = vmatmul.mubr.bf16.vlgmr.msra.gmra.mrb[128].mxu1 %v8605_v13 }
 0x641   :  { %v8545_v14 = vadd.f32 %v9989_v58, %v12838_v19  ;;  %v8592_v62 = vmax.f32 %v8542_v37, 0.0  ;;  %v8835_v37 = vld [vmem:[%s12907_s10 + $0x38] sm:$0xff]  ;;  %v8836_v58 = vld [vmem:[%s12907_s10 + $0x40] sm:$0xff] }
 0x642   :  { %8881 = vperm.xlu1 %10793, %v8835_v37  }
 0x643   :  { %v8593_v43 = vmax.f32 %v8545_v14, 0.0  ;;  %v9990_v20 = vpop.f32.mrb[108].mxu1  ;;  %v8837_v14 = vld [vmem:[%s12907_s10 + $0x48] sm:$0xff] }
 0x644   :  { %v9991_v3 = vpop.f32.mrb[109].mxu1 }
 0x645   :  { %v9992_v26 = vadd.f32 %v9991_v3, %v9990_v20  ;;  %v9993_v53 = vpop.f32.mrb[110].mxu1  ;;  %v8606_v17 = vpack.c.bf16 %v8593_v43, %v8592_v62  ;;  %v8839_v62 = vld [vmem:[%s12907_s10 + $0x58] sm:$0xff]  ;;  %v8840_v43 = vld [vmem:[%s12907_s10 + $0x60] sm:$0xff]  ;;  %v8841_v20 = vld [vmem:[%s12907_s10 + $0x68] sm:$0xff] }
 0x646   :  { %v9994_v11 = vpop.f32.mrb[111].mxu1  ;;  %8886 = vperm.xlu1 %10793, %v8836_v58   ;;  %v8842_v3 = vld [vmem:[%s12907_s10 + $0x70] sm:$0xff] }
 0x647   :  { %v8550_v44 = vadd.f32 %v9992_v26, %v12838_v19  ;;  %v9995_v34 = vadd.f32 %v9994_v11, %v9993_v53  ;;  %10056 = vmatprep.mubr.bf16.mxu1 %v8606_v17  ;;  %v8843_v26 = vld [vmem:[%s12907_s10 + $0x78] sm:$0xff]  ;;  %v9769_v53 = vld [vmem:[#allocation23] ss:$0 sm:$0xff] }
 0x649   :  { %v8553_v38 = vadd.f32 %v9995_v34, %v12838_v19  ;;  %v8594_v33 = vmax.f32 %v8550_v44, 0.0 }
 0x64a   :  { %8891 = vperm.xlu1 %10793, %v8837_v14  }
 0x64b   :  { %v8595_v48 = vmax.f32 %v8553_v38, 0.0  ;;  %v9996_v40 = vpop.f32.mrb[112].mxu1 }
 0x64c   :  { %v9997_v36 = vpop.f32.mrb[113].mxu1 }
 0x64d   :  { %v9998_v5 = vadd.f32 %v9997_v36, %v9996_v40  ;;  %v9999_v6 = vpop.f32.mrb[114].mxu1  ;;  %v8607_v10 = vpack.c.bf16 %v8595_v48, %v8594_v33 }
 0x64e   :  { %v10000_v0 = vpop.f32.mrb[115].mxu1 }
 0x64f   :  { %v8558_v56 = vadd.f32 %v9998_v5, %v12838_v19  ;;  %v10001_v60 = vadd.f32 %v10000_v0, %v9999_v6  ;;  %10057 = vmatmul.mubr.bf16.gmra.mrb[132].mxu1 %v8607_v10 }
 0x651   :  { %v8561_v31 = vadd.f32 %v10001_v60, %v12838_v19  ;;  %v8596_v47 = vmax.f32 %v8558_v56, 0.0 }
 0x653   :  { %v8597_v21 = vmax.f32 %v8561_v31, 0.0  ;;  %v10002_v29 = vpop.f32.mrb[116].mxu1 }
 0x654   :  { %v10003_v22 = vpop.f32.mrb[117].mxu1 }
 0x655   :  { %v10004_v27 = vadd.f32 %v10003_v22, %v10002_v29  ;;  %v10005_v49 = vpop.f32.mrb[118].mxu1  ;;  %v8608_v2 = vpack.c.bf16 %v8597_v21, %v8596_v47 }
 0x656   :  { %v10006_v35 = vpop.f32.mrb[119].mxu1 }
 0x657   :  { %v8566_v55 = vadd.f32 %v10004_v27, %v12838_v19  ;;  %v10007_v59 = vadd.f32 %v10006_v35, %v10005_v49  ;;  %10060 = vmatprep.mubr.bf16.mxu1 %v8608_v2 }
 0x659   :  { %v8569_v52 = vadd.f32 %v10007_v59, %v12838_v19  ;;  %v8598_v39 = vmax.f32 %v8566_v55, 0.0 }
 0x65b   :  { %v8599_v46 = vmax.f32 %v8569_v52, 0.0  ;;  %v10008_v25 = vpop.f32.mrb[120].mxu1 }
 0x65c   :  { %v10009_v54 = vpop.f32.mrb[121].mxu1 }
 0x65d   :  { %v10010_v42 = vadd.f32 %v10009_v54, %v10008_v25  ;;  %v10011_v61 = vpop.f32.mrb[122].mxu1  ;;  %v8609_v30 = vpack.c.bf16 %v8599_v46, %v8598_v39 }
 0x65e   :  { %v10012_v45 = vpop.f32.mrb[123].mxu1 }
 0x65f   :  { %v8574_v28 = vadd.f32 %v10010_v42, %v12838_v19  ;;  %v10013_v18 = vadd.f32 %v10012_v45, %v10011_v61  ;;  %10061 = vmatmul.mubr.bf16.gmra.mrb[136].mxu1 %v8609_v30 }
 0x661   :  { %v8577_v57 = vadd.f32 %v10013_v18, %v12838_v19  ;;  %v8600_v7 = vmax.f32 %v8574_v28, 0.0 }
 0x663   :  { %v8601_v51 = vmax.f32 %v8577_v57, 0.0  ;;  %v10014_v8 = vpop.f32.mrb[124].mxu1 }
 0x664   :  { %v10015_v4 = vpop.f32.mrb[125].mxu1 }
 0x665   :  { %v10016_v32 = vadd.f32 %v10015_v4, %v10014_v8  ;;  %v10017_v63 = vpop.f32.mrb[126].mxu1  ;;  %v8610_v15 = vpack.c.bf16 %v8601_v51, %v8600_v7 }
 0x666   :  { %v10018_v50 = vpop.f32.mrb[127].mxu1 }
 0x667   :  { %v8582_v1 = vadd.f32 %v10016_v32, %v12838_v19  ;;  %v10019_v12 = vadd.f32 %v10018_v50, %v10017_v63  ;;  %10064 = vmatprep.mubr.bf16.mxu1 %v8610_v15 }
 0x669   :  { %v8585_v13 = vadd.f32 %v10019_v12, %v12838_v19  ;;  %v8602_v16 = vmax.f32 %v8582_v1, 0.0  ;;  %v8838_v19 = vld [vmem:[%s12907_s10 + $0x50] sm:$0xff]  ;;  %s11620_s10 = smov [#allocation25]  }
 0x66a   :  { %8896 = vperm.xlu1 %10793, %v8838_v19   ;;  %s8979_s24 = sshll.u32 %s11620_s10, 4  ;;  %s8980_s24 = int_to_ptr.vmem [resolvable:$true] %s8979_s24 }
 0x66b   :  { %v8603_v24 = vmax.f32 %v8585_v13, 0.0  ;;  %v8961_v13 = vld [vmem:[#allocation7] sm:$0x1]  ;;  %s11564_s19 = scalar_lea.vmem %s8980_s24, 16  ;;  %s11568_s13 = scalar_lea.vmem %s8980_s24, 32 }
 0x66c   :  { %p11565_p10 = scmp.ne.s32.totalorder %s8980_s24, %s11564_s19  ;;  %p11569_p11 = scmp.lt.s32.totalorder %s8980_s24, %s8980_s24 }
 0x66d   :  { %v8611_v41 = vpack.c.bf16 %v8603_v24, %v8602_v16  ;;  %v8847_v16 = vpop.permute.xlu1 %8846  ;;  %p11570_p12 = scmp.lt.s32.totalorder %s11568_s13, %s11564_s19 }
 0x66e   :  { %8901 = vperm.xlu1 %10793, %v8839_v62  }
 0x66f   :  { %10065 = vmatmul.mubr.bf16.gmra.mrb[140].mxu1 %v8611_v41  ;;  %p11571_p13 = por %p11570_p12, %p11569_p11 }
 0x671   :  { %v8852_v24 = vpop.permute.xlu1 %8851  ;;  %p11572_p0 = pnand %p11571_p13, %p11565_p10 }
 0x672   :  { %8906 = vperm.xlu1 %10793, %v8840_v43  }
 0x675   :  { %v8857_v41 = vpop.permute.xlu1 %8856 }
 0x676   :  { %8911 = vperm.xlu1 %10793, %v8841_v20  }
 0x679   :  { %v8862_v58 = vpop.permute.xlu1 %8861 }
 0x67a   :  { %8916 = vperm.xlu1 %10793, %v8842_v3  }
 0x67d   :  { %v8867_v19 = vpop.permute.xlu1 %8866 }
 0x67e   :  { %8921 = vperm.xlu1 %10793, %v8843_v26  }
 0x681   :  { %v8872_v20 = vpop.permute.xlu1 %8871 }
 0x685   :  { %v8877_v26 = vpop.permute.xlu1 %8876 }
 0x712   :  { %v10054_v17 = vpop.f32.mrb[128].mxu1 }
 0x713   :  { %v8717_v11 = vpop.f32.mrb[129].mxu1  ;;  %v8726_v40 = vadd.f32 %v10054_v17, %v9769_v53 }
 0x714   :  { %v10055_v44 = vpop.f32.mrb[130].mxu1  ;;  %v8718_v34 = vadd.f32 %v9769_v53, %v8717_v11  ;;  %v8882_v11 = vpop.permute.xlu1 %8881 }
 0x715   :  { %v8720_v38 = vpop.f32.mrb[131].mxu1  ;;  %v8782_v5 = vmax.f32 %v8726_v40, 0.0  ;;  %v8729_v6 = vadd.f32 %v10055_v44, %v9769_v53 }
 0x716   :  { %v8721_v33 = vadd.f32 %v9769_v53, %v8720_v38  ;;  %v8780_v48 = vmax.f32 %v8718_v34, 0.0 }
 0x717   :  { %v8783_v10 = vmax.f32 %v8729_v6, 0.0 }
 0x718   :  { %8796 = vxpose.xlu0.b32.start [1/16] %v8780_v48, 128  ;;  %v8781_v36 = vmax.f32 %v8721_v33, 0.0  ;;  %v8887_v34 = vpop.permute.xlu1 %8886 }
 0x71c   :  { %8797 = vxpose.xlu0.b32.cont [2/16] %v8781_v36, 128  ;;  %v8892_v40 = vpop.permute.xlu1 %8891 }
 0x720   :  { %8798 = vxpose.xlu0.b32.cont [3/16] %v8782_v5, 128 }
 0x722   :  { %v10058_v0 = vpop.f32.mrb[132].mxu1 }
 0x723   :  { %v8733_v56 = vpop.f32.mrb[133].mxu1  ;;  %v8742_v22 = vadd.f32 %v10058_v0, %v9769_v53 }
 0x724   :  { %v8734_v60 = vadd.f32 %v9769_v53, %v8733_v56  ;;  %v10059_v31 = vpop.f32.mrb[134].mxu1  ;;  %8799 = vxpose.xlu0.b32.cont [4/16] %v8783_v10, 128  ;;  %v8897_v56 = vpop.permute.xlu1 %8896 }
 0x725   :  { %v8736_v47 = vpop.f32.mrb[135].mxu1  ;;  %v8786_v49 = vmax.f32 %v8742_v22, 0.0  ;;  %v8745_v2 = vadd.f32 %v10059_v31, %v9769_v53 }
 0x726   :  { %v8784_v21 = vmax.f32 %v8734_v60, 0.0  ;;  %v8737_v29 = vadd.f32 %v9769_v53, %v8736_v47 }
 0x727   :  { %v8787_v35 = vmax.f32 %v8745_v2, 0.0 }
 0x728   :  { %8800 = vxpose.xlu0.b32.cont [5/16] %v8784_v21, 128  ;;  %v8785_v27 = vmax.f32 %v8737_v29, 0.0  ;;  %v8902_v21 = vpop.permute.xlu1 %8901 }
 0x72c   :  { %8801 = vxpose.xlu0.b32.cont [6/16] %v8785_v27, 128 }
 0x730   :  { %8802 = vxpose.xlu0.b32.cont [7/16] %v8786_v49, 128 }
 0x732   :  { %v10062_v55 = vpop.f32.mrb[136].mxu1 }
 0x733   :  { %v8749_v59 = vpop.f32.mrb[137].mxu1  ;;  %v8758_v42 = vadd.f32 %v10062_v55, %v9769_v53 }
 0x734   :  { %v8750_v52 = vadd.f32 %v9769_v53, %v8749_v59  ;;  %v10063_v39 = vpop.f32.mrb[138].mxu1  ;;  %8803 = vxpose.xlu0.b32.cont [8/16] %v8787_v35, 128  ;;  %v8907_v35 = vpop.permute.xlu1 %8906 }
 0x735   :  { %v8752_v46 = vpop.f32.mrb[139].mxu1  ;;  %v8790_v30 = vmax.f32 %v8758_v42, 0.0  ;;  %v8761_v45 = vadd.f32 %v10063_v39, %v9769_v53 }
 0x736   :  { %v8788_v25 = vmax.f32 %v8750_v52, 0.0  ;;  %v8753_v54 = vadd.f32 %v9769_v53, %v8752_v46 }
 0x737   :  { %v8791_v28 = vmax.f32 %v8761_v45, 0.0 }
 0x738   :  { %8804 = vxpose.xlu0.b32.cont [9/16] %v8788_v25, 128  ;;  %v8789_v61 = vmax.f32 %v8753_v54, 0.0  ;;  %v8912_v46 = vpop.permute.xlu1 %8911 }
 0x73c   :  { %8805 = vxpose.xlu0.b32.cont [10/16] %v8789_v61, 128 }
 0x740   :  { %8806 = vxpose.xlu0.b32.cont [11/16] %v8790_v30, 128 }
 0x742   :  { %v10066_v18 = vpop.f32.mrb[140].mxu1 }
 0x743   :  { %v8765_v57 = vpop.f32.mrb[141].mxu1  ;;  %v8774_v63 = vadd.f32 %v10066_v18, %v9769_v53  ;;  %v8917_v18 = vpop.permute.xlu1 %8916 }
 0x744   :  { %v8766_v7 = vadd.f32 %v9769_v53, %v8765_v57  ;;  %v10067_v51 = vpop.f32.mrb[142].mxu1  ;;  %8807 = vxpose.xlu0.b32.cont [12/16] %v8791_v28, 128 }
 0x745   :  { %v8768_v8 = vpop.f32.mrb[143].mxu1  ;;  %v8794_v50 = vmax.f32 %v8774_v63, 0.0  ;;  %v8777_v1 = vadd.f32 %v10067_v51, %v9769_v53 }
 0x746   :  { %v8792_v4 = vmax.f32 %v8766_v7, 0.0  ;;  %v8769_v32 = vadd.f32 %v9769_v53, %v8768_v8 }
 0x747   :  { %v8795_v12 = vmax.f32 %v8777_v1, 0.0 }
 0x748   :  { %8808 = vxpose.xlu0.b32.cont [13/16] %v8792_v4, 128  ;;  %v8793_v15 = vmax.f32 %v8769_v32, 0.0 }
 0x74c   :  { %8809 = vxpose.xlu0.b32.cont [14/16] %v8793_v15, 128  ;;  %v8922_v15 = vpop.permute.xlu1 %8921 }
 0x750   :  { %8810 = vxpose.xlu0.b32.cont [15/16] %v8794_v50, 128 }
 0x754   :  { %8811 = vxpose.xlu0.b32.end [16/16] %v8795_v12, 128 }
 0x77d   :  { %10794 = vset.pattern.permute.xlu0 %v11618_v23 }
 0x77e   :  { %8964 = vperm.xlu0 %10794, %v8961_v13  }
 0x798   :  { %v8812_v37 = vpop.trf.xlu0 }
 0x799   :  { %v8924_v23 = vmul.f32 %v8847_v16, %v8812_v37 }
 0x79c   :  { %v8813_v14 = vpop.trf.xlu0 }
 0x79d   :  { %v8925_v33 = vmul.f32 %v8852_v24, %v8813_v14 }
 0x79f   :  { %v8940_v36 = vadd.f32 %v8925_v33, %v8924_v23 }
 0x7a0   :  { %v8814_v62 = vpop.trf.xlu0 }
 0x7a1   :  { %v8926_v5 = vmul.f32 %v8857_v41, %v8814_v62 }
 0x7a3   :  { %v8941_v10 = vadd.f32 %v8940_v36, %v8926_v5 }
 0x7a4   :  { %v8815_v43 = vpop.trf.xlu0 }
 0x7a5   :  { %v8927_v0 = vmul.f32 %v8862_v58, %v8815_v43 }
 0x7a7   :  { %v8942_v60 = vadd.f32 %v8941_v10, %v8927_v0 }
 0x7a8   :  { %v8816_v3 = vpop.trf.xlu0 }
 0x7a9   :  { %v8928_v31 = vmul.f32 %v8867_v19, %v8816_v3 }
 0x7ab   :  { %v8943_v29 = vadd.f32 %v8942_v60, %v8928_v31 }
 0x7ac   :  { %v8817_v53 = vpop.trf.xlu0 }
 0x7ad   :  { %v8929_v22 = vmul.f32 %v8872_v20, %v8817_v53 }
 0x7af   :  { %v8944_v49 = vadd.f32 %v8943_v29, %v8929_v22 }
 0x7b0   :  { %v8818_v17 = vpop.trf.xlu0 }
 0x7b1   :  { %v8930_v2 = vmul.f32 %v8877_v26, %v8818_v17 }
 0x7b3   :  { %v8945_v55 = vadd.f32 %v8944_v49, %v8930_v2 }
 0x7b4   :  { %v8819_v44 = vpop.trf.xlu0 }
 0x7b5   :  { %v8931_v59 = vmul.f32 %v8882_v11, %v8819_v44 }
 0x7b7   :  { %v8946_v25 = vadd.f32 %v8945_v55, %v8931_v59 }
 0x7b8   :  { %v8820_v38 = vpop.trf.xlu0 }
 0x7b9   :  { %v8932_v39 = vmul.f32 %v8887_v34, %v8820_v38 }
 0x7bb   :  { %v8947_v42 = vadd.f32 %v8946_v25, %v8932_v39 }
 0x7bc   :  { %v8821_v48 = vpop.trf.xlu0 }
 0x7bd   :  { %v8933_v54 = vmul.f32 %v8892_v40, %v8821_v48 }
 0x7bf   :  { %v8948_v45 = vadd.f32 %v8947_v42, %v8933_v54 }
 0x7c0   :  { %v8822_v6 = vpop.trf.xlu0 }
 0x7c1   :  { %v8934_v61 = vmul.f32 %v8897_v56, %v8822_v6 }
 0x7c3   :  { %v8949_v57 = vadd.f32 %v8948_v45, %v8934_v61 }
 0x7c4   :  { %v8823_v47 = vpop.trf.xlu0 }
 0x7c5   :  { %v8935_v28 = vmul.f32 %v8902_v21, %v8823_v47 }
 0x7c7   :  { %v8950_v51 = vadd.f32 %v8949_v57, %v8935_v28 }
 0x7c8   :  { %v8824_v27 = vpop.trf.xlu0 }
 0x7c9   :  { %v8936_v7 = vmul.f32 %v8907_v35, %v8824_v27 }
 0x7cb   :  { %v8951_v32 = vadd.f32 %v8950_v51, %v8936_v7 }
 0x7cc   :  { %v8825_v52 = vpop.trf.xlu0 }
 0x7cd   :  { %v8937_v8 = vmul.f32 %v8912_v46, %v8825_v52 }
 0x7cf   :  { %v8952_v50 = vadd.f32 %v8951_v32, %v8937_v8 }
 0x7d0   :  { %v8826_v30 = vpop.trf.xlu0 }
 0x7d1   :  { %v8938_v63 = vmul.f32 %v8917_v18, %v8826_v30 }
 0x7d3   :  { %v8953_v12 = vadd.f32 %v8952_v50, %v8938_v63 }
 0x7d4   :  { %v8827_v4 = vpop.trf.xlu0 }
 0x7d5   :  { %v8939_v1 = vmul.f32 %v8922_v15, %v8827_v4 }
 0x7d7   :  { %v8954_v13 = vadd.f32 %v8953_v12, %v8939_v1 }
 0x7d9   :  { %v8955_v16 = vrot.slane %v8954_v13, 4 }
 0x7db   :  { %v8956_v24 = vadd.f32 %v8955_v16, %v8954_v13 }
 0x7dd   :  { %v8957_v41 = vrot.slane %v8956_v24, 2 }
 0x7df   :  { %v8958_v37 = vadd.f32 %v8957_v41, %v8956_v24 }
 0x7e1   :  { %v8959_v58 = vrot.slane %v8958_v37, 1 }
 0x7e3   :  { %v8960_v19 = vadd.f32 %v8959_v58, %v8958_v37 }
 0x7fd   :  { %v8965_v14 = vpop.permute.xlu0 %8964 }
 0x7fe   :  { %v8970_v62 = vrot.slane %v8965_v14, %v12299_v9 }
 0x800   :  { %v8971_v43 = vadd.f32 %v8970_v62, %v8960_v19 }
 0x802   :  { %8972 = vst [vmem:[#allocation25] sm:$0x1] %v8971_v43 }
 0x803   :  { %11575 = shalt.err (!%p11572_p0)
}
 0x804   :  { %s11576_s1 = scalar_lea.hbm %s12911_s14, 16 }
 0x805   :  { %p11577_p1 = scmp.ne.s32.totalorder %s12911_s14, %s11576_s1  ;;  %p11580_p2 = scmp.lt.u32.totalorder %s11576_s1, %s12911_s14 }
 0x807   :  { %p11582_p3 = pnand %p11580_p2, %p11577_p1 }
 0x809   :  { %11585 = shalt.err (!%p11582_p3)
}
 0x80a   :  { %8982 = dma.vmem_to_hbm [thread:$0]  %s8980_s24, 16, %s12911_s14, [#allocation10]  }
 0x80b   :  { %11598 = dma.done.wait [#allocation10], 16  }
 0x80c   :  { %11599 = vsyncadd [#allocation10], 4294967280 }
 0x80d   :  { %8986 = vsyncpa [#allocation9], 1 }
 0x80e   :  { %8987 = vsyncpa [#allocation12], 1 }
 0x80f   :  { %8988 = vsyncpa [#allocation15], 1 }
 0x810   :  { %8989 = vsyncpa [#allocation18], 1 }
 0x811   :  { %8990 = vsyncpa [#allocation21], 1 }
 0x812   :  { %8991 = vsyncpa [#allocation24], 1 }
 0x813   :  { %8992 = vsyncpa [#allocation10], 1 }

</bundles_post_ra>
